<compile_context>
chip_gen: v6e
topology: v6e:2x2x1
jax: 0.10.0
libtpu: 0.0.40
codegen_flags: <defaults>
</compile_context>

<pallas_src>
import numpy as np

import jax
import jax.numpy as jnp
from jax.experimental import pallas as pl
from jax.experimental.pallas import tpu as pltpu


# ---------------------------------------------------------------------------
# In-kernel helpers
# ---------------------------------------------------------------------------
def _sigmoid(x):
    # 1 / (1 + exp(-x)); exp + approximate reciprocal both go to the EUP slot.
    return pl.reciprocal(1.0 + jnp.exp(-x), approx=True)


def _conv_taps(read_slab, w_ref, b_ref, rows, k, n):
    """Accumulate 5 row-slab matmuls (one per kernel row) + bias + sigmoid.

    read_slab(kh) -> (B, 8, k) bf16 slab of input rows for kernel row kh.
    w_ref[kh]     -> (k, n) Toeplitz-expanded weight (W taps/stride folded in).
    """
    acc = jnp.broadcast_to(b_ref[...], (rows, n))            # f32 bias init
    for kh in range(5):
        a = read_slab(kh).reshape(rows, k)                   # (B*8, k) bf16
        acc = acc + jnp.dot(a, w_ref[kh], preferred_element_type=jnp.float32)
    return _sigmoid(acc)                                     # (rows, n) f32


# ---------------------------------------------------------------------------
# Fused forward kernel
# ---------------------------------------------------------------------------
def _lenet_kernel(x_ref, w1_ref, w2_ref, w3_ref, w4_ref, wf_ref,
                  b1_ref, b2_ref, b3_ref, b4_ref, bf_ref,
                  out_ref, feat_ref,
                  in2_ref, in3_ref, in4_ref):
    # x_ref   : (4, B, 9, 128)  bf16  conv1 input, H blocked mod 4, lanes = w*3+ic
    # w*_ref  : (5, K, N)       bf16  per-kh Toeplitz conv weights
    # wf_ref  : (8, 128, 128)   bf16  per-h FC weight blocks (torch order folded in)
    # b*_ref  : (1, N)          f32   lane-expanded biases
    # out_ref : (B, 100)        f32   fc output
    # feat_ref: (B, 8, 128)     f32   conv4 activation, rows=(b,h), lanes=w*12+oc
    # in*_ref : VMEM scratches holding the (zero-padded) inputs of conv2..conv4
    B = x_ref.shape[1]
    R = B * 8

    # Zero-padding rows of the layer-input scratches must be exact zeros.
    in2_ref[...] = jnp.zeros_like(in2_ref)
    in3_ref[...] = jnp.zeros_like(in3_ref)
    in4_ref[...] = jnp.zeros_like(in4_ref)

    # ---- conv1: 3x32x32 -> 12x16x16, stride 2 ------------------------------
    # Output rows are produced per output-row parity q so they can be written
    # straight into conv2's H-parity-blocked input buffer (no de-interleave).
    for q in range(2):
        def read1(kh, _q=q):
            t = 2 * _q + kh                       # source row = 4*hq + (t&3)
            return x_ref[t & 3, :, pl.ds(t >> 2, 8), :]       # (B, 8, 128)
        act1 = _conv_taps(read1, w1_ref, b1_ref, R, 128, 256)  # (B*8, 256)
        in2_ref[q, :, pl.ds(1, 8), :] = (
            act1.reshape(B, 8, 256).astype(in2_ref.dtype))

    # ---- conv2: 12x16x16 -> 12x8x8, stride 2 -------------------------------
    def read2(kh):
        return in2_ref[kh & 1, :, pl.ds(kh >> 1, 8), :]        # (B, 8, 256)
    act2 = _conv_taps(read2, w2_ref, b2_ref, R, 256, 128)      # (B*8, 128)
    in3_ref[:, pl.ds(2, 8), :] = act2.reshape(B, 8, 128).astype(in3_ref.dtype)

    # ---- conv3: 12x8x8 -> 12x8x8, stride 1 ---------------------------------
    def read3(kh):
        return in3_ref[:, pl.ds(kh, 8), :]                     # (B, 8, 128)
    act3 = _conv_taps(read3, w3_ref, b3_ref, R, 128, 128)
    in4_ref[:, pl.ds(2, 8), :] = act3.reshape(B, 8, 128).astype(in4_ref.dtype)

    # ---- conv4: 12x8x8 -> 12x8x8, stride 1 ---------------------------------
    def read4(kh):
        return in4_ref[:, pl.ds(kh, 8), :]
    act4 = _conv_taps(read4, w4_ref, b4_ref, R, 128, 128)      # (B*8, 128) f32
    feat_ref[...] = act4.reshape(B, 8, 128)                    # natural layout

    # ---- FC: Linear(768, 100), torch flatten order folded into wf ----------
    act4b = act4.astype(wf_ref.dtype)                          # (B*8, 128) bf16
    bias_fc = bf_ref[...]                                      # (1, 128) f32
    for b in range(B):
        accb = bias_fc
        for h in range(8):
            r = b * 8 + h
            accb = accb + jnp.dot(act4b[r:r + 1, :], wf_ref[h],
                                  preferred_element_type=jnp.float32)
        out_ref[pl.ds(b, 1), :] = accb[:, :100]


def _full_spec(shape):
    nd = len(shape)
    return pl.BlockSpec(shape, lambda i, _nd=nd: (0,) * _nd)


def _lenet_pallas(x_blk, p):
    B = x_blk.shape[1]
    in_arrays = (x_blk, p["w1"], p["w2"], p["w3"], p["w4"], p["wf"],
                 p["b1"], p["b2"], p["b3"], p["b4"], p["bf"])
    in_specs = [_full_spec(a.shape) for a in in_arrays]
    out_shape = (jax.ShapeDtypeStruct((B, 100), jnp.float32),
                 jax.ShapeDtypeStruct((B, 8, 128), jnp.float32))
    out_specs = [_full_spec((B, 100)), _full_spec((B, 8, 128))]

    flops = 2 * (10 * B * 8 * 128 * 256 + 5 * B * 8 * 256 * 128
                 + 10 * B * 8 * 128 * 128 + B * 8 * 128 * 128)
    transcendentals = 2 * B * 8 * 256 + 3 * B * 8 * 128
    bytes_accessed = (sum(int(a.size) * a.dtype.itemsize for a in in_arrays)
                      + (B * 100 + B * 8 * 128) * 4)

    return pl.pallas_call(
        _lenet_kernel,
        out_shape=out_shape,
        grid=(1,),
        in_specs=in_specs,
        out_specs=out_specs,
        scratch_shapes=[
            pltpu.VMEM((2, B, 10, 256), jnp.bfloat16),   # conv2 input (H-parity blocked)
            pltpu.VMEM((B, 12, 128), jnp.bfloat16),      # conv3 input (H zero-padded)
            pltpu.VMEM((B, 12, 128), jnp.bfloat16),      # conv4 input (H zero-padded)
        ],
        compiler_params=pltpu.CompilerParams(
            dimension_semantics=("arbitrary",)),
        cost_estimate=pl.CostEstimate(flops=flops,
                                      transcendentals=transcendentals,
                                      bytes_accessed=bytes_accessed),
    )(*in_arrays)


# ---------------------------------------------------------------------------
# Forward wrapper (tiny XLA glue: input repack + torch-order feature reorder)
# ---------------------------------------------------------------------------
@jax.jit
def lenet_forward(params, x):
    B = x.shape[0]
    # NCHW -> (4, B, 9, 128): H padded by 2 and blocked mod 4, lanes = w*3 + ic.
    xt = jnp.transpose(x.astype(jnp.float32), (0, 2, 3, 1))        # (B,32,32,3)
    xp = jnp.pad(xt, ((0, 0), (2, 2), (0, 0), (0, 0)))             # (B,36,32,3)
    xf = xp.reshape(B, 36, 32 * 3)
    xf = jnp.pad(xf, ((0, 0), (0, 0), (0, 128 - 96)))              # (B,36,128)
    x_blk = jnp.transpose(xf.reshape(B, 9, 4, 128),
                          (2, 0, 1, 3)).astype(jnp.bfloat16)       # (4,B,9,128)

    out, feat_nat = _lenet_pallas(x_blk, params)

    # feat_nat[b, h, w*12+c] -> torch feature order (b, c*64 + h*8 + w).
    feature = feat_nat[:, :, :96].reshape(B, 8, 8, 12)
    feature = jnp.transpose(feature, (0, 3, 1, 2)).reshape(B, 768)
    return out, feature


# ---------------------------------------------------------------------------
# Parameter init (torch layout) + one-time weight re-packing (numpy, free)
# ---------------------------------------------------------------------------
def init_raw_params():
    key = jax.random.PRNGKey(42)
    ks = jax.random.split(key, 10)

    def u(k, shape, fan_in):
        bound = 1.0 / np.sqrt(float(fan_in))
        return np.asarray(jax.random.uniform(k, shape, jnp.float32, -bound, bound))

    return {
        "w1": u(ks[0], (12, 3, 5, 5), 75), "b1": u(ks[1], (12,), 75),
        "w2": u(ks[2], (12, 12, 5, 5), 300), "b2": u(ks[3], (12,), 300),
        "w3": u(ks[4], (12, 12, 5, 5), 300), "b3": u(ks[5], (12,), 300),
        "w4": u(ks[6], (12, 12, 5, 5), 300), "b4": u(ks[7], (12,), 300),
        "fc_w": u(ks[8], (100, 768), 768), "fc_b": u(ks[9], (100,), 768),
    }


def _toeplitz_conv(w_oihw, w_in, w_out, stride, k_pad, n_pad):
    """Per-kh Toeplitz weight: T[kh, wi*IC+ic, wo*OC+oc] = w[oc,ic,kh,kw],
    kw = wi - stride*wo + 2 (W padding/stride handled by zero entries)."""
    oc, ic, kh_n, kw_n = w_oihw.shape
    t = np.zeros((kh_n, k_pad, n_pad), np.float32)
    for kh in range(kh_n):
        for wo in range(w_out):
            for kw in range(kw_n):
                wi = stride * wo + kw - 2
                if 0 <= wi < w_in:
                    t[kh, wi * ic:(wi + 1) * ic,
                      wo * oc:(wo + 1) * oc] = w_oihw[:, :, kh, kw].T
    return t


def _fc_blocks(fc_w):
    """WfT[h, w*12+c, n] = fc_w[n, c*64 + h*8 + w]  (torch NCHW flatten)."""
    t = np.zeros((8, 128, 128), np.float32)
    for h in range(8):
        for w in range(8):
            for c in range(12):
                t[h, w * 12 + c, :100] = fc_w[:, c * 64 + h * 8 + w]
    return t


def _expand_bias(b, reps, pad):
    v = np.zeros((1, pad), np.float32)
    tb = np.tile(np.asarray(b, np.float32), reps)
    v[0, :tb.size] = tb
    return v


def prepare_params(raw, compute_dtype=jnp.bfloat16):
    # compute_dtype=jnp.float32 gives bit-closer parity to the torch model.
    return {
        "w1": jnp.asarray(_toeplitz_conv(raw["w1"], 32, 16, 2, 128, 256), compute_dtype),
        "w2": jnp.asarray(_toeplitz_conv(raw["w2"], 16, 8, 2, 256, 128), compute_dtype),
        "w3": jnp.asarray(_toeplitz_conv(raw["w3"], 8, 8, 1, 128, 128), compute_dtype),
        "w4": jnp.asarray(_toeplitz_conv(raw["w4"], 8, 8, 1, 128, 128), compute_dtype),
        "wf": jnp.asarray(_fc_blocks(raw["fc_w"]), compute_dtype),
        "b1": jnp.asarray(_expand_bias(raw["b1"], 16, 256)),
        "b2": jnp.asarray(_expand_bias(raw["b2"], 8, 128)),
        "b3": jnp.asarray(_expand_bias(raw["b3"], 8, 128)),
        "b4": jnp.asarray(_expand_bias(raw["b4"], 8, 128)),
        "bf": jnp.asarray(_expand_bias(raw["fc_b"], 1, 128)),
    }


# ---------------------------------------------------------------------------
# Pure-JAX reference (f32) for a correctness check
# ---------------------------------------------------------------------------
def lenet_reference(raw, x):
    def conv(h, w, b, stride):
        y = jax.lax.conv_general_dilated(
            h, jnp.asarray(w), window_strides=(stride, stride),
            padding=((2, 2), (2, 2)),
            dimension_numbers=("NCHW", "OIHW", "NCHW"))
        return jax.nn.sigmoid(y + jnp.asarray(b)[None, :, None, None])

    h = conv(x, raw["w1"], raw["b1"], 2)
    h = conv(h, raw["w2"], raw["b2"], 2)
    h = conv(h, raw["w3"], raw["b3"], 1)
    h = conv(h, raw["w4"], raw["b4"], 1)
    feat = h.reshape(x.shape[0], -1)
    out = feat @ jnp.asarray(raw["fc_w"]).T + jnp.asarray(raw["fc_b"])
    return out, feat


if __name__ == "__main__":
    # 32x32 input is required by the architecture (12*8*8 = 768 -> Linear(768,100)).
    x = jax.random.normal(jax.random.PRNGKey(0), (2, 3, 32, 32), dtype=jnp.float32)

    raw = init_raw_params()
    params = prepare_params(raw)

    out, feature = lenet_forward(params, x)
    jax.block_until_ready((out, feature))

    assert out.shape == (2, 100), out.shape
    assert feature.shape == (2, 768), feature.shape
    assert bool(jnp.all(jnp.isfinite(out))) and bool(jnp.all(jnp.isfinite(feature)))

    # Compare against the f32 reference (kernel uses bf16 MXU inputs + approx
    # reciprocal sigmoid, so allow a small tolerance).
    ref_out, ref_feat = lenet_reference(raw, x)
    np.testing.assert_allclose(np.asarray(feature), np.asarray(ref_feat),
                               atol=5e-2, rtol=0)
    np.testing.assert_allclose(np.asarray(out), np.asarray(ref_out),
                               atol=1e-1, rtol=0)

    print("KERNEL_OK")
</pallas_src>

<mosaic_0001>
module attributes {stable_mosaic.version = 11 : i64} {
  func.func @_lenet_kernel(%arg0: i32, %arg1: memref<4x2x9x128xbf16, #tpu.memory_space<vmem>>, %arg2: memref<5x128x256xbf16, #tpu.memory_space<vmem>>, %arg3: memref<5x256x128xbf16, #tpu.memory_space<vmem>>, %arg4: memref<5x128x128xbf16, #tpu.memory_space<vmem>>, %arg5: memref<5x128x128xbf16, #tpu.memory_space<vmem>>, %arg6: memref<8x128x128xbf16, #tpu.memory_space<vmem>>, %arg7: memref<1x256xf32, #tpu.memory_space<vmem>>, %arg8: memref<1x128xf32, #tpu.memory_space<vmem>>, %arg9: memref<1x128xf32, #tpu.memory_space<vmem>>, %arg10: memref<1x128xf32, #tpu.memory_space<vmem>>, %arg11: memref<1x128xf32, #tpu.memory_space<vmem>>, %arg12: memref<2x100xf32, #tpu.memory_space<vmem>>, %arg13: memref<2x8x128xf32, #tpu.memory_space<vmem>>, %arg14: memref<2x2x10x256xbf16, #tpu.memory_space<vmem>>, %arg15: memref<2x12x128xbf16, #tpu.memory_space<vmem>>, %arg16: memref<2x12x128xbf16, #tpu.memory_space<vmem>>) attributes {dimension_semantics = [#tpu.dimension_semantics<arbitrary>], iteration_bounds = array<i64: 1>, scalar_prefetch = 0 : i64, scratch_operands = 3 : i64, tpu.core_type = #tpu.core_type<tc>, window_params = [{pipeline_mode = #tpu.pipeline_mode<synchronous>, transform_indices = @transform_0, window_bounds = array<i64: 4, 2, 9, 128>}, {pipeline_mode = #tpu.pipeline_mode<synchronous>, transform_indices = @transform_1, window_bounds = array<i64: 5, 128, 256>}, {pipeline_mode = #tpu.pipeline_mode<synchronous>, transform_indices = @transform_2, window_bounds = array<i64: 5, 256, 128>}, {pipeline_mode = #tpu.pipeline_mode<synchronous>, transform_indices = @transform_3, window_bounds = array<i64: 5, 128, 128>}, {pipeline_mode = #tpu.pipeline_mode<synchronous>, transform_indices = @transform_4, window_bounds = array<i64: 5, 128, 128>}, {pipeline_mode = #tpu.pipeline_mode<synchronous>, transform_indices = @transform_5, window_bounds = array<i64: 8, 128, 128>}, {pipeline_mode = #tpu.pipeline_mode<synchronous>, transform_indices = @transform_6, window_bounds = array<i64: 1, 256>}, {pipeline_mode = #tpu.pipeline_mode<synchronous>, transform_indices = @transform_7, window_bounds = array<i64: 1, 128>}, {pipeline_mode = #tpu.pipeline_mode<synchronous>, transform_indices = @transform_8, window_bounds = array<i64: 1, 128>}, {pipeline_mode = #tpu.pipeline_mode<synchronous>, transform_indices = @transform_9, window_bounds = array<i64: 1, 128>}, {pipeline_mode = #tpu.pipeline_mode<synchronous>, transform_indices = @transform_10, window_bounds = array<i64: 1, 128>}, {pipeline_mode = #tpu.pipeline_mode<synchronous>, transform_indices = @transform_11, window_bounds = array<i64: 2, 100>}, {pipeline_mode = #tpu.pipeline_mode<synchronous>, transform_indices = @transform_12, window_bounds = array<i64: 2, 8, 128>}]} {
    %cst = arith.constant 0.000000e+00 : bf16
    %0 = vector.broadcast %cst : bf16 to vector<2x2x10x256xbf16>
    %c0 = arith.constant 0 : index
    %c0_0 = arith.constant 0 : index
    %c0_1 = arith.constant 0 : index
    %c0_2 = arith.constant 0 : index
    %1 = vector.load %arg14[%c0, %c0_0, %c0_1, %c0_2] : memref<2x2x10x256xbf16, #tpu.memory_space<vmem>>, vector<2x2x10x256xbf16>
    tpu.vector_store %arg14[%c0, %c0_0, %c0_1, %c0_2], %0 {strides = array<i32>} : memref<2x2x10x256xbf16, #tpu.memory_space<vmem>>, vector<2x2x10x256xbf16>,
    %cst_3 = arith.constant 0.000000e+00 : bf16
    %2 = vector.broadcast %cst_3 : bf16 to vector<2x12x128xbf16>
    %c0_4 = arith.constant 0 : index
    %c0_5 = arith.constant 0 : index
    %c0_6 = arith.constant 0 : index
    %3 = vector.load %arg15[%c0_4, %c0_5, %c0_6] : memref<2x12x128xbf16, #tpu.memory_space<vmem>>, vector<2x12x128xbf16>
    tpu.vector_store %arg15[%c0_4, %c0_5, %c0_6], %2 {strides = array<i32>} : memref<2x12x128xbf16, #tpu.memory_space<vmem>>, vector<2x12x128xbf16>,
    %cst_7 = arith.constant 0.000000e+00 : bf16
    %4 = vector.broadcast %cst_7 : bf16 to vector<2x12x128xbf16>
    %c0_8 = arith.constant 0 : index
    %c0_9 = arith.constant 0 : index
    %c0_10 = arith.constant 0 : index
    %5 = vector.load %arg16[%c0_8, %c0_9, %c0_10] : memref<2x12x128xbf16, #tpu.memory_space<vmem>>, vector<2x12x128xbf16>
    tpu.vector_store %arg16[%c0_8, %c0_9, %c0_10], %4 {strides = array<i32>} : memref<2x12x128xbf16, #tpu.memory_space<vmem>>, vector<2x12x128xbf16>,
    %c0_11 = arith.constant 0 : index
    %c0_12 = arith.constant 0 : index
    %6 = vector.load %arg7[%c0_11, %c0_12] : memref<1x256xf32, #tpu.memory_space<vmem>>, vector<1x256xf32>
    %7 = vector.shape_cast %6 : vector<1x256xf32> to vector<1x256xf32>
    %8 = vector.broadcast %7 : vector<1x256xf32> to vector<16x256xf32>
    %c0_13 = arith.constant 0 : index
    %c0_14 = arith.constant 0 : index
    %c0_15 = arith.constant 0 : index
    %c0_16 = arith.constant 0 : index
    %9 = vector.load %arg1[%c0_13, %c0_14, %c0_15, %c0_16] : memref<4x2x9x128xbf16, #tpu.memory_space<vmem>>, vector<1x2x8x128xbf16>
    %10 = vector.shape_cast %9 : vector<1x2x8x128xbf16> to vector<2x8x128xbf16>
    %11 = vector.shape_cast %10 : vector<2x8x128xbf16> to vector<16x128xbf16>
    %c0_17 = arith.constant 0 : index
    %c0_18 = arith.constant 0 : index
    %c0_19 = arith.constant 0 : index
    %12 = vector.load %arg2[%c0_17, %c0_18, %c0_19] : memref<5x128x256xbf16, #tpu.memory_space<vmem>>, vector<1x128x256xbf16>
    %13 = vector.shape_cast %12 : vector<1x128x256xbf16> to vector<128x256xbf16>
    %cst_20 = arith.constant dense<0.000000e+00> : vector<16x256xf32>
    %14 = tpu.matmul %11, %13, %cst_20 {dimension_numbers = #tpu.dot_dimension_numbers<[1], [0], [0], [1], [0, 0, 1, 1], [], []>} : vector<16x128xbf16>, vector<128x256xbf16>, vector<16x256xf32> -> vector<16x256xf32>
    %15 = arith.addf %8, %14 : vector<16x256xf32>
    %c1 = arith.constant 1 : index
    %c0_21 = arith.constant 0 : index
    %c0_22 = arith.constant 0 : index
    %c0_23 = arith.constant 0 : index
    %16 = vector.load %arg1[%c1, %c0_21, %c0_22, %c0_23] : memref<4x2x9x128xbf16, #tpu.memory_space<vmem>>, vector<1x2x8x128xbf16>
    %17 = vector.shape_cast %16 : vector<1x2x8x128xbf16> to vector<2x8x128xbf16>
    %18 = vector.shape_cast %17 : vector<2x8x128xbf16> to vector<16x128xbf16>
    %c1_24 = arith.constant 1 : index
    %c0_25 = arith.constant 0 : index
    %c0_26 = arith.constant 0 : index
    %19 = vector.load %arg2[%c1_24, %c0_25, %c0_26] : memref<5x128x256xbf16, #tpu.memory_space<vmem>>, vector<1x128x256xbf16>
    %20 = vector.shape_cast %19 : vector<1x128x256xbf16> to vector<128x256xbf16>
    %cst_27 = arith.constant dense<0.000000e+00> : vector<16x256xf32>
    %21 = tpu.matmul %18, %20, %cst_27 {dimension_numbers = #tpu.dot_dimension_numbers<[1], [0], [0], [1], [0, 0, 1, 1], [], []>} : vector<16x128xbf16>, vector<128x256xbf16>, vector<16x256xf32> -> vector<16x256xf32>
    %22 = arith.addf %15, %21 : vector<16x256xf32>
    %c2 = arith.constant 2 : index
    %c0_28 = arith.constant 0 : index
    %c0_29 = arith.constant 0 : index
    %c0_30 = arith.constant 0 : index
    %23 = vector.load %arg1[%c2, %c0_28, %c0_29, %c0_30] : memref<4x2x9x128xbf16, #tpu.memory_space<vmem>>, vector<1x2x8x128xbf16>
    %24 = vector.shape_cast %23 : vector<1x2x8x128xbf16> to vector<2x8x128xbf16>
    %25 = vector.shape_cast %24 : vector<2x8x128xbf16> to vector<16x128xbf16>
    %c2_31 = arith.constant 2 : index
    %c0_32 = arith.constant 0 : index
    %c0_33 = arith.constant 0 : index
    %26 = vector.load %arg2[%c2_31, %c0_32, %c0_33] : memref<5x128x256xbf16, #tpu.memory_space<vmem>>, vector<1x128x256xbf16>
    %27 = vector.shape_cast %26 : vector<1x128x256xbf16> to vector<128x256xbf16>
    %cst_34 = arith.constant dense<0.000000e+00> : vector<16x256xf32>
    %28 = tpu.matmul %25, %27, %cst_34 {dimension_numbers = #tpu.dot_dimension_numbers<[1], [0], [0], [1], [0, 0, 1, 1], [], []>} : vector<16x128xbf16>, vector<128x256xbf16>, vector<16x256xf32> -> vector<16x256xf32>
    %29 = arith.addf %22, %28 : vector<16x256xf32>
    %c3 = arith.constant 3 : index
    %c0_35 = arith.constant 0 : index
    %c0_36 = arith.constant 0 : index
    %c0_37 = arith.constant 0 : index
    %30 = vector.load %arg1[%c3, %c0_35, %c0_36, %c0_37] : memref<4x2x9x128xbf16, #tpu.memory_space<vmem>>, vector<1x2x8x128xbf16>
    %31 = vector.shape_cast %30 : vector<1x2x8x128xbf16> to vector<2x8x128xbf16>
    %32 = vector.shape_cast %31 : vector<2x8x128xbf16> to vector<16x128xbf16>
    %c3_38 = arith.constant 3 : index
    %c0_39 = arith.constant 0 : index
    %c0_40 = arith.constant 0 : index
    %33 = vector.load %arg2[%c3_38, %c0_39, %c0_40] : memref<5x128x256xbf16, #tpu.memory_space<vmem>>, vector<1x128x256xbf16>
    %34 = vector.shape_cast %33 : vector<1x128x256xbf16> to vector<128x256xbf16>
    %cst_41 = arith.constant dense<0.000000e+00> : vector<16x256xf32>
    %35 = tpu.matmul %32, %34, %cst_41 {dimension_numbers = #tpu.dot_dimension_numbers<[1], [0], [0], [1], [0, 0, 1, 1], [], []>} : vector<16x128xbf16>, vector<128x256xbf16>, vector<16x256xf32> -> vector<16x256xf32>
    %36 = arith.addf %29, %35 : vector<16x256xf32>
    %c0_42 = arith.constant 0 : index
    %c0_43 = arith.constant 0 : index
    %c1_44 = arith.constant 1 : index
    %c0_45 = arith.constant 0 : index
    %37 = vector.load %arg1[%c0_42, %c0_43, %c1_44, %c0_45] : memref<4x2x9x128xbf16, #tpu.memory_space<vmem>>, vector<1x2x8x128xbf16>
    %38 = vector.shape_cast %37 : vector<1x2x8x128xbf16> to vector<2x8x128xbf16>
    %39 = vector.shape_cast %38 : vector<2x8x128xbf16> to vector<16x128xbf16>
    %c4 = arith.constant 4 : index
    %c0_46 = arith.constant 0 : index
    %c0_47 = arith.constant 0 : index
    %40 = vector.load %arg2[%c4, %c0_46, %c0_47] : memref<5x128x256xbf16, #tpu.memory_space<vmem>>, vector<1x128x256xbf16>
    %41 = vector.shape_cast %40 : vector<1x128x256xbf16> to vector<128x256xbf16>
    %cst_48 = arith.constant dense<0.000000e+00> : vector<16x256xf32>
    %42 = tpu.matmul %39, %41, %cst_48 {dimension_numbers = #tpu.dot_dimension_numbers<[1], [0], [0], [1], [0, 0, 1, 1], [], []>} : vector<16x128xbf16>, vector<128x256xbf16>, vector<16x256xf32> -> vector<16x256xf32>
    %43 = arith.addf %36, %42 : vector<16x256xf32>
    %cst_49 = arith.constant 0.000000e+00 : f32
    %44 = vector.broadcast %cst_49 : f32 to vector<16x256xf32>
    %45 = arith.subf %44, %43 : vector<16x256xf32>
    %46 = math.exp %45 : vector<16x256xf32>
    %cst_50 = arith.constant 1.000000e+00 : f32
    %47 = vector.broadcast %cst_50 : f32 to vector<16x256xf32>
    %48 = arith.addf %47, %46 : vector<16x256xf32>
    %49 = tpu.reciprocal %48 {approx = true} : vector<16x256xf32> -> vector<16x256xf32>
    %50 = vector.shape_cast %49 : vector<16x256xf32> to vector<2x8x256xf32>
    %51 = arith.truncf %50 : vector<2x8x256xf32> to vector<2x8x256xbf16>
    %c0_51 = arith.constant 0 : index
    %c0_52 = arith.constant 0 : index
    %c1_53 = arith.constant 1 : index
    %c0_54 = arith.constant 0 : index
    %52 = vector.load %arg14[%c0_51, %c0_52, %c1_53, %c0_54] : memref<2x2x10x256xbf16, #tpu.memory_space<vmem>>, vector<1x2x8x256xbf16>
    %53 = vector.shape_cast %52 : vector<1x2x8x256xbf16> to vector<2x8x256xbf16>
    %54 = vector.shape_cast %51 : vector<2x8x256xbf16> to vector<1x2x8x256xbf16>
    tpu.vector_store %arg14[%c0_51, %c0_52, %c1_53, %c0_54], %54 {strides = array<i32>} : memref<2x2x10x256xbf16, #tpu.memory_space<vmem>>, vector<1x2x8x256xbf16>,
    %c0_55 = arith.constant 0 : index
    %c0_56 = arith.constant 0 : index
    %55 = vector.load %arg7[%c0_55, %c0_56] : memref<1x256xf32, #tpu.memory_space<vmem>>, vector<1x256xf32>
    %56 = vector.shape_cast %55 : vector<1x256xf32> to vector<1x256xf32>
    %57 = vector.broadcast %56 : vector<1x256xf32> to vector<16x256xf32>
    %c2_57 = arith.constant 2 : index
    %c0_58 = arith.constant 0 : index
    %c0_59 = arith.constant 0 : index
    %c0_60 = arith.constant 0 : index
    %58 = vector.load %arg1[%c2_57, %c0_58, %c0_59, %c0_60] : memref<4x2x9x128xbf16, #tpu.memory_space<vmem>>, vector<1x2x8x128xbf16>
    %59 = vector.shape_cast %58 : vector<1x2x8x128xbf16> to vector<2x8x128xbf16>
    %60 = vector.shape_cast %59 : vector<2x8x128xbf16> to vector<16x128xbf16>
    %c0_61 = arith.constant 0 : index
    %c0_62 = arith.constant 0 : index
    %c0_63 = arith.constant 0 : index
    %61 = vector.load %arg2[%c0_61, %c0_62, %c0_63] : memref<5x128x256xbf16, #tpu.memory_space<vmem>>, vector<1x128x256xbf16>
    %62 = vector.shape_cast %61 : vector<1x128x256xbf16> to vector<128x256xbf16>
    %cst_64 = arith.constant dense<0.000000e+00> : vector<16x256xf32>
    %63 = tpu.matmul %60, %62, %cst_64 {dimension_numbers = #tpu.dot_dimension_numbers<[1], [0], [0], [1], [0, 0, 1, 1], [], []>} : vector<16x128xbf16>, vector<128x256xbf16>, vector<16x256xf32> -> vector<16x256xf32>
    %64 = arith.addf %57, %63 : vector<16x256xf32>
    %c3_65 = arith.constant 3 : index
    %c0_66 = arith.constant 0 : index
    %c0_67 = arith.constant 0 : index
    %c0_68 = arith.constant 0 : index
    %65 = vector.load %arg1[%c3_65, %c0_66, %c0_67, %c0_68] : memref<4x2x9x128xbf16, #tpu.memory_space<vmem>>, vector<1x2x8x128xbf16>
    %66 = vector.shape_cast %65 : vector<1x2x8x128xbf16> to vector<2x8x128xbf16>
    %67 = vector.shape_cast %66 : vector<2x8x128xbf16> to vector<16x128xbf16>
    %c1_69 = arith.constant 1 : index
    %c0_70 = arith.constant 0 : index
    %c0_71 = arith.constant 0 : index
    %68 = vector.load %arg2[%c1_69, %c0_70, %c0_71] : memref<5x128x256xbf16, #tpu.memory_space<vmem>>, vector<1x128x256xbf16>
    %69 = vector.shape_cast %68 : vector<1x128x256xbf16> to vector<128x256xbf16>
    %cst_72 = arith.constant dense<0.000000e+00> : vector<16x256xf32>
    %70 = tpu.matmul %67, %69, %cst_72 {dimension_numbers = #tpu.dot_dimension_numbers<[1], [0], [0], [1], [0, 0, 1, 1], [], []>} : vector<16x128xbf16>, vector<128x256xbf16>, vector<16x256xf32> -> vector<16x256xf32>
    %71 = arith.addf %64, %70 : vector<16x256xf32>
    %c0_73 = arith.constant 0 : index
    %c0_74 = arith.constant 0 : index
    %c1_75 = arith.constant 1 : index
    %c0_76 = arith.constant 0 : index
    %72 = vector.load %arg1[%c0_73, %c0_74, %c1_75, %c0_76] : memref<4x2x9x128xbf16, #tpu.memory_space<vmem>>, vector<1x2x8x128xbf16>
    %73 = vector.shape_cast %72 : vector<1x2x8x128xbf16> to vector<2x8x128xbf16>
    %74 = vector.shape_cast %73 : vector<2x8x128xbf16> to vector<16x128xbf16>
    %c2_77 = arith.constant 2 : index
    %c0_78 = arith.constant 0 : index
    %c0_79 = arith.constant 0 : index
    %75 = vector.load %arg2[%c2_77, %c0_78, %c0_79] : memref<5x128x256xbf16, #tpu.memory_space<vmem>>, vector<1x128x256xbf16>
    %76 = vector.shape_cast %75 : vector<1x128x256xbf16> to vector<128x256xbf16>
    %cst_80 = arith.constant dense<0.000000e+00> : vector<16x256xf32>
    %77 = tpu.matmul %74, %76, %cst_80 {dimension_numbers = #tpu.dot_dimension_numbers<[1], [0], [0], [1], [0, 0, 1, 1], [], []>} : vector<16x128xbf16>, vector<128x256xbf16>, vector<16x256xf32> -> vector<16x256xf32>
    %78 = arith.addf %71, %77 : vector<16x256xf32>
    %c1_81 = arith.constant 1 : index
    %c0_82 = arith.constant 0 : index
    %c1_83 = arith.constant 1 : index
    %c0_84 = arith.constant 0 : index
    %79 = vector.load %arg1[%c1_81, %c0_82, %c1_83, %c0_84] : memref<4x2x9x128xbf16, #tpu.memory_space<vmem>>, vector<1x2x8x128xbf16>
    %80 = vector.shape_cast %79 : vector<1x2x8x128xbf16> to vector<2x8x128xbf16>
    %81 = vector.shape_cast %80 : vector<2x8x128xbf16> to vector<16x128xbf16>
    %c3_85 = arith.constant 3 : index
    %c0_86 = arith.constant 0 : index
    %c0_87 = arith.constant 0 : index
    %82 = vector.load %arg2[%c3_85, %c0_86, %c0_87] : memref<5x128x256xbf16, #tpu.memory_space<vmem>>, vector<1x128x256xbf16>
    %83 = vector.shape_cast %82 : vector<1x128x256xbf16> to vector<128x256xbf16>
    %cst_88 = arith.constant dense<0.000000e+00> : vector<16x256xf32>
    %84 = tpu.matmul %81, %83, %cst_88 {dimension_numbers = #tpu.dot_dimension_numbers<[1], [0], [0], [1], [0, 0, 1, 1], [], []>} : vector<16x128xbf16>, vector<128x256xbf16>, vector<16x256xf32> -> vector<16x256xf32>
    %85 = arith.addf %78, %84 : vector<16x256xf32>
    %c2_89 = arith.constant 2 : index
    %c0_90 = arith.constant 0 : index
    %c1_91 = arith.constant 1 : index
    %c0_92 = arith.constant 0 : index
    %86 = vector.load %arg1[%c2_89, %c0_90, %c1_91, %c0_92] : memref<4x2x9x128xbf16, #tpu.memory_space<vmem>>, vector<1x2x8x128xbf16>
    %87 = vector.shape_cast %86 : vector<1x2x8x128xbf16> to vector<2x8x128xbf16>
    %88 = vector.shape_cast %87 : vector<2x8x128xbf16> to vector<16x128xbf16>
    %c4_93 = arith.constant 4 : index
    %c0_94 = arith.constant 0 : index
    %c0_95 = arith.constant 0 : index
    %89 = vector.load %arg2[%c4_93, %c0_94, %c0_95] : memref<5x128x256xbf16, #tpu.memory_space<vmem>>, vector<1x128x256xbf16>
    %90 = vector.shape_cast %89 : vector<1x128x256xbf16> to vector<128x256xbf16>
    %cst_96 = arith.constant dense<0.000000e+00> : vector<16x256xf32>
    %91 = tpu.matmul %88, %90, %cst_96 {dimension_numbers = #tpu.dot_dimension_numbers<[1], [0], [0], [1], [0, 0, 1, 1], [], []>} : vector<16x128xbf16>, vector<128x256xbf16>, vector<16x256xf32> -> vector<16x256xf32>
    %92 = arith.addf %85, %91 : vector<16x256xf32>
    %cst_97 = arith.constant 0.000000e+00 : f32
    %93 = vector.broadcast %cst_97 : f32 to vector<16x256xf32>
    %94 = arith.subf %93, %92 : vector<16x256xf32>
    %95 = math.exp %94 : vector<16x256xf32>
    %cst_98 = arith.constant 1.000000e+00 : f32
    %96 = vector.broadcast %cst_98 : f32 to vector<16x256xf32>
    %97 = arith.addf %96, %95 : vector<16x256xf32>
    %98 = tpu.reciprocal %97 {approx = true} : vector<16x256xf32> -> vector<16x256xf32>
    %99 = vector.shape_cast %98 : vector<16x256xf32> to vector<2x8x256xf32>
    %100 = arith.truncf %99 : vector<2x8x256xf32> to vector<2x8x256xbf16>
    %c1_99 = arith.constant 1 : index
    %c0_100 = arith.constant 0 : index
    %c1_101 = arith.constant 1 : index
    %c0_102 = arith.constant 0 : index
    %101 = vector.load %arg14[%c1_99, %c0_100, %c1_101, %c0_102] : memref<2x2x10x256xbf16, #tpu.memory_space<vmem>>, vector<1x2x8x256xbf16>
    %102 = vector.shape_cast %101 : vector<1x2x8x256xbf16> to vector<2x8x256xbf16>
    %103 = vector.shape_cast %100 : vector<2x8x256xbf16> to vector<1x2x8x256xbf16>
    tpu.vector_store %arg14[%c1_99, %c0_100, %c1_101, %c0_102], %103 {strides = array<i32>} : memref<2x2x10x256xbf16, #tpu.memory_space<vmem>>, vector<1x2x8x256xbf16>,
    %c0_103 = arith.constant 0 : index
    %c0_104 = arith.constant 0 : index
    %104 = vector.load %arg8[%c0_103, %c0_104] : memref<1x128xf32, #tpu.memory_space<vmem>>, vector<1x128xf32>
    %105 = vector.shape_cast %104 : vector<1x128xf32> to vector<1x128xf32>
    %106 = vector.broadcast %105 : vector<1x128xf32> to vector<16x128xf32>
    %c0_105 = arith.constant 0 : index
    %c0_106 = arith.constant 0 : index
    %c0_107 = arith.constant 0 : index
    %c0_108 = arith.constant 0 : index
    %107 = vector.load %arg14[%c0_105, %c0_106, %c0_107, %c0_108] : memref<2x2x10x256xbf16, #tpu.memory_space<vmem>>, vector<1x2x8x256xbf16>
    %108 = vector.shape_cast %107 : vector<1x2x8x256xbf16> to vector<2x8x256xbf16>
    %109 = vector.shape_cast %108 : vector<2x8x256xbf16> to vector<16x256xbf16>
    %c0_109 = arith.constant 0 : index
    %c0_110 = arith.constant 0 : index
    %c0_111 = arith.constant 0 : index
    %110 = vector.load %arg3[%c0_109, %c0_110, %c0_111] : memref<5x256x128xbf16, #tpu.memory_space<vmem>>, vector<1x256x128xbf16>
    %111 = vector.shape_cast %110 : vector<1x256x128xbf16> to vector<256x128xbf16>
    %cst_112 = arith.constant dense<0.000000e+00> : vector<16x128xf32>
    %112 = tpu.matmul %109, %111, %cst_112 {dimension_numbers = #tpu.dot_dimension_numbers<[1], [0], [0], [1], [0, 0, 1, 1], [], []>} : vector<16x256xbf16>, vector<256x128xbf16>, vector<16x128xf32> -> vector<16x128xf32>
    %113 = arith.addf %106, %112 : vector<16x128xf32>
    %c1_113 = arith.constant 1 : index
    %c0_114 = arith.constant 0 : index
    %c0_115 = arith.constant 0 : index
    %c0_116 = arith.constant 0 : index
    %114 = vector.load %arg14[%c1_113, %c0_114, %c0_115, %c0_116] : memref<2x2x10x256xbf16, #tpu.memory_space<vmem>>, vector<1x2x8x256xbf16>
    %115 = vector.shape_cast %114 : vector<1x2x8x256xbf16> to vector<2x8x256xbf16>
    %116 = vector.shape_cast %115 : vector<2x8x256xbf16> to vector<16x256xbf16>
    %c1_117 = arith.constant 1 : index
    %c0_118 = arith.constant 0 : index
    %c0_119 = arith.constant 0 : index
    %117 = vector.load %arg3[%c1_117, %c0_118, %c0_119] : memref<5x256x128xbf16, #tpu.memory_space<vmem>>, vector<1x256x128xbf16>
    %118 = vector.shape_cast %117 : vector<1x256x128xbf16> to vector<256x128xbf16>
    %cst_120 = arith.constant dense<0.000000e+00> : vector<16x128xf32>
    %119 = tpu.matmul %116, %118, %cst_120 {dimension_numbers = #tpu.dot_dimension_numbers<[1], [0], [0], [1], [0, 0, 1, 1], [], []>} : vector<16x256xbf16>, vector<256x128xbf16>, vector<16x128xf32> -> vector<16x128xf32>
    %120 = arith.addf %113, %119 : vector<16x128xf32>
    %c0_121 = arith.constant 0 : index
    %c0_122 = arith.constant 0 : index
    %c1_123 = arith.constant 1 : index
    %c0_124 = arith.constant 0 : index
    %121 = vector.load %arg14[%c0_121, %c0_122, %c1_123, %c0_124] : memref<2x2x10x256xbf16, #tpu.memory_space<vmem>>, vector<1x2x8x256xbf16>
    %122 = vector.shape_cast %121 : vector<1x2x8x256xbf16> to vector<2x8x256xbf16>
    %123 = vector.shape_cast %122 : vector<2x8x256xbf16> to vector<16x256xbf16>
    %c2_125 = arith.constant 2 : index
    %c0_126 = arith.constant 0 : index
    %c0_127 = arith.constant 0 : index
    %124 = vector.load %arg3[%c2_125, %c0_126, %c0_127] : memref<5x256x128xbf16, #tpu.memory_space<vmem>>, vector<1x256x128xbf16>
    %125 = vector.shape_cast %124 : vector<1x256x128xbf16> to vector<256x128xbf16>
    %cst_128 = arith.constant dense<0.000000e+00> : vector<16x128xf32>
    %126 = tpu.matmul %123, %125, %cst_128 {dimension_numbers = #tpu.dot_dimension_numbers<[1], [0], [0], [1], [0, 0, 1, 1], [], []>} : vector<16x256xbf16>, vector<256x128xbf16>, vector<16x128xf32> -> vector<16x128xf32>
    %127 = arith.addf %120, %126 : vector<16x128xf32>
    %c1_129 = arith.constant 1 : index
    %c0_130 = arith.constant 0 : index
    %c1_131 = arith.constant 1 : index
    %c0_132 = arith.constant 0 : index
    %128 = vector.load %arg14[%c1_129, %c0_130, %c1_131, %c0_132] : memref<2x2x10x256xbf16, #tpu.memory_space<vmem>>, vector<1x2x8x256xbf16>
    %129 = vector.shape_cast %128 : vector<1x2x8x256xbf16> to vector<2x8x256xbf16>
    %130 = vector.shape_cast %129 : vector<2x8x256xbf16> to vector<16x256xbf16>
    %c3_133 = arith.constant 3 : index
    %c0_134 = arith.constant 0 : index
    %c0_135 = arith.constant 0 : index
    %131 = vector.load %arg3[%c3_133, %c0_134, %c0_135] : memref<5x256x128xbf16, #tpu.memory_space<vmem>>, vector<1x256x128xbf16>
    %132 = vector.shape_cast %131 : vector<1x256x128xbf16> to vector<256x128xbf16>
    %cst_136 = arith.constant dense<0.000000e+00> : vector<16x128xf32>
    %133 = tpu.matmul %130, %132, %cst_136 {dimension_numbers = #tpu.dot_dimension_numbers<[1], [0], [0], [1], [0, 0, 1, 1], [], []>} : vector<16x256xbf16>, vector<256x128xbf16>, vector<16x128xf32> -> vector<16x128xf32>
    %134 = arith.addf %127, %133 : vector<16x128xf32>
    %c0_137 = arith.constant 0 : index
    %c0_138 = arith.constant 0 : index
    %c2_139 = arith.constant 2 : index
    %c0_140 = arith.constant 0 : index
    %135 = vector.load %arg14[%c0_137, %c0_138, %c2_139, %c0_140] : memref<2x2x10x256xbf16, #tpu.memory_space<vmem>>, vector<1x2x8x256xbf16>
    %136 = vector.shape_cast %135 : vector<1x2x8x256xbf16> to vector<2x8x256xbf16>
    %137 = vector.shape_cast %136 : vector<2x8x256xbf16> to vector<16x256xbf16>
    %c4_141 = arith.constant 4 : index
    %c0_142 = arith.constant 0 : index
    %c0_143 = arith.constant 0 : index
    %138 = vector.load %arg3[%c4_141, %c0_142, %c0_143] : memref<5x256x128xbf16, #tpu.memory_space<vmem>>, vector<1x256x128xbf16>
    %139 = vector.shape_cast %138 : vector<1x256x128xbf16> to vector<256x128xbf16>
    %cst_144 = arith.constant dense<0.000000e+00> : vector<16x128xf32>
    %140 = tpu.matmul %137, %139, %cst_144 {dimension_numbers = #tpu.dot_dimension_numbers<[1], [0], [0], [1], [0, 0, 1, 1], [], []>} : vector<16x256xbf16>, vector<256x128xbf16>, vector<16x128xf32> -> vector<16x128xf32>
    %141 = arith.addf %134, %140 : vector<16x128xf32>
    %cst_145 = arith.constant 0.000000e+00 : f32
    %142 = vector.broadcast %cst_145 : f32 to vector<16x128xf32>
    %143 = arith.subf %142, %141 : vector<16x128xf32>
    %144 = math.exp %143 : vector<16x128xf32>
    %cst_146 = arith.constant 1.000000e+00 : f32
    %145 = vector.broadcast %cst_146 : f32 to vector<16x128xf32>
    %146 = arith.addf %145, %144 : vector<16x128xf32>
    %147 = tpu.reciprocal %146 {approx = true} : vector<16x128xf32> -> vector<16x128xf32>
    %148 = vector.shape_cast %147 : vector<16x128xf32> to vector<2x8x128xf32>
    %149 = arith.truncf %148 : vector<2x8x128xf32> to vector<2x8x128xbf16>
    %c0_147 = arith.constant 0 : index
    %c2_148 = arith.constant 2 : index
    %c0_149 = arith.constant 0 : index
    %150 = vector.load %arg15[%c0_147, %c2_148, %c0_149] : memref<2x12x128xbf16, #tpu.memory_space<vmem>>, vector<2x8x128xbf16>
    tpu.vector_store %arg15[%c0_147, %c2_148, %c0_149], %149 {strides = array<i32>} : memref<2x12x128xbf16, #tpu.memory_space<vmem>>, vector<2x8x128xbf16>,
    %c0_150 = arith.constant 0 : index
    %c0_151 = arith.constant 0 : index
    %151 = vector.load %arg9[%c0_150, %c0_151] : memref<1x128xf32, #tpu.memory_space<vmem>>, vector<1x128xf32>
    %152 = vector.shape_cast %151 : vector<1x128xf32> to vector<1x128xf32>
    %153 = vector.broadcast %152 : vector<1x128xf32> to vector<16x128xf32>
    %c0_152 = arith.constant 0 : index
    %c0_153 = arith.constant 0 : index
    %c0_154 = arith.constant 0 : index
    %154 = vector.load %arg15[%c0_152, %c0_153, %c0_154] : memref<2x12x128xbf16, #tpu.memory_space<vmem>>, vector<2x8x128xbf16>
    %155 = vector.shape_cast %154 : vector<2x8x128xbf16> to vector<16x128xbf16>
    %c0_155 = arith.constant 0 : index
    %c0_156 = arith.constant 0 : index
    %c0_157 = arith.constant 0 : index
    %156 = vector.load %arg4[%c0_155, %c0_156, %c0_157] : memref<5x128x128xbf16, #tpu.memory_space<vmem>>, vector<1x128x128xbf16>
    %157 = vector.shape_cast %156 : vector<1x128x128xbf16> to vector<128x128xbf16>
    %cst_158 = arith.constant dense<0.000000e+00> : vector<16x128xf32>
    %158 = tpu.matmul %155, %157, %cst_158 {dimension_numbers = #tpu.dot_dimension_numbers<[1], [0], [0], [1], [0, 0, 1, 1], [], []>} : vector<16x128xbf16>, vector<128x128xbf16>, vector<16x128xf32> -> vector<16x128xf32>
    %159 = arith.addf %153, %158 : vector<16x128xf32>
    %c0_159 = arith.constant 0 : index
    %c1_160 = arith.constant 1 : index
    %c0_161 = arith.constant 0 : index
    %160 = vector.load %arg15[%c0_159, %c1_160, %c0_161] : memref<2x12x128xbf16, #tpu.memory_space<vmem>>, vector<2x8x128xbf16>
    %161 = vector.shape_cast %160 : vector<2x8x128xbf16> to vector<16x128xbf16>
    %c1_162 = arith.constant 1 : index
    %c0_163 = arith.constant 0 : index
    %c0_164 = arith.constant 0 : index
    %162 = vector.load %arg4[%c1_162, %c0_163, %c0_164] : memref<5x128x128xbf16, #tpu.memory_space<vmem>>, vector<1x128x128xbf16>
    %163 = vector.shape_cast %162 : vector<1x128x128xbf16> to vector<128x128xbf16>
    %cst_165 = arith.constant dense<0.000000e+00> : vector<16x128xf32>
    %164 = tpu.matmul %161, %163, %cst_165 {dimension_numbers = #tpu.dot_dimension_numbers<[1], [0], [0], [1], [0, 0, 1, 1], [], []>} : vector<16x128xbf16>, vector<128x128xbf16>, vector<16x128xf32> -> vector<16x128xf32>
    %165 = arith.addf %159, %164 : vector<16x128xf32>
    %c0_166 = arith.constant 0 : index
    %c2_167 = arith.constant 2 : index
    %c0_168 = arith.constant 0 : index
    %166 = vector.load %arg15[%c0_166, %c2_167, %c0_168] : memref<2x12x128xbf16, #tpu.memory_space<vmem>>, vector<2x8x128xbf16>
    %167 = vector.shape_cast %166 : vector<2x8x128xbf16> to vector<16x128xbf16>
    %c2_169 = arith.constant 2 : index
    %c0_170 = arith.constant 0 : index
    %c0_171 = arith.constant 0 : index
    %168 = vector.load %arg4[%c2_169, %c0_170, %c0_171] : memref<5x128x128xbf16, #tpu.memory_space<vmem>>, vector<1x128x128xbf16>
    %169 = vector.shape_cast %168 : vector<1x128x128xbf16> to vector<128x128xbf16>
    %cst_172 = arith.constant dense<0.000000e+00> : vector<16x128xf32>
    %170 = tpu.matmul %167, %169, %cst_172 {dimension_numbers = #tpu.dot_dimension_numbers<[1], [0], [0], [1], [0, 0, 1, 1], [], []>} : vector<16x128xbf16>, vector<128x128xbf16>, vector<16x128xf32> -> vector<16x128xf32>
    %171 = arith.addf %165, %170 : vector<16x128xf32>
    %c0_173 = arith.constant 0 : index
    %c3_174 = arith.constant 3 : index
    %c0_175 = arith.constant 0 : index
    %172 = vector.load %arg15[%c0_173, %c3_174, %c0_175] : memref<2x12x128xbf16, #tpu.memory_space<vmem>>, vector<2x8x128xbf16>
    %173 = vector.shape_cast %172 : vector<2x8x128xbf16> to vector<16x128xbf16>
    %c3_176 = arith.constant 3 : index
    %c0_177 = arith.constant 0 : index
    %c0_178 = arith.constant 0 : index
    %174 = vector.load %arg4[%c3_176, %c0_177, %c0_178] : memref<5x128x128xbf16, #tpu.memory_space<vmem>>, vector<1x128x128xbf16>
    %175 = vector.shape_cast %174 : vector<1x128x128xbf16> to vector<128x128xbf16>
    %cst_179 = arith.constant dense<0.000000e+00> : vector<16x128xf32>
    %176 = tpu.matmul %173, %175, %cst_179 {dimension_numbers = #tpu.dot_dimension_numbers<[1], [0], [0], [1], [0, 0, 1, 1], [], []>} : vector<16x128xbf16>, vector<128x128xbf16>, vector<16x128xf32> -> vector<16x128xf32>
    %177 = arith.addf %171, %176 : vector<16x128xf32>
    %c0_180 = arith.constant 0 : index
    %c4_181 = arith.constant 4 : index
    %c0_182 = arith.constant 0 : index
    %178 = vector.load %arg15[%c0_180, %c4_181, %c0_182] : memref<2x12x128xbf16, #tpu.memory_space<vmem>>, vector<2x8x128xbf16>
    %179 = vector.shape_cast %178 : vector<2x8x128xbf16> to vector<16x128xbf16>
    %c4_183 = arith.constant 4 : index
    %c0_184 = arith.constant 0 : index
    %c0_185 = arith.constant 0 : index
    %180 = vector.load %arg4[%c4_183, %c0_184, %c0_185] : memref<5x128x128xbf16, #tpu.memory_space<vmem>>, vector<1x128x128xbf16>
    %181 = vector.shape_cast %180 : vector<1x128x128xbf16> to vector<128x128xbf16>
    %cst_186 = arith.constant dense<0.000000e+00> : vector<16x128xf32>
    %182 = tpu.matmul %179, %181, %cst_186 {dimension_numbers = #tpu.dot_dimension_numbers<[1], [0], [0], [1], [0, 0, 1, 1], [], []>} : vector<16x128xbf16>, vector<128x128xbf16>, vector<16x128xf32> -> vector<16x128xf32>
    %183 = arith.addf %177, %182 : vector<16x128xf32>
    %cst_187 = arith.constant 0.000000e+00 : f32
    %184 = vector.broadcast %cst_187 : f32 to vector<16x128xf32>
    %185 = arith.subf %184, %183 : vector<16x128xf32>
    %186 = math.exp %185 : vector<16x128xf32>
    %cst_188 = arith.constant 1.000000e+00 : f32
    %187 = vector.broadcast %cst_188 : f32 to vector<16x128xf32>
    %188 = arith.addf %187, %186 : vector<16x128xf32>
    %189 = tpu.reciprocal %188 {approx = true} : vector<16x128xf32> -> vector<16x128xf32>
    %190 = vector.shape_cast %189 : vector<16x128xf32> to vector<2x8x128xf32>
    %191 = arith.truncf %190 : vector<2x8x128xf32> to vector<2x8x128xbf16>
    %c0_189 = arith.constant 0 : index
    %c2_190 = arith.constant 2 : index
    %c0_191 = arith.constant 0 : index
    %192 = vector.load %arg16[%c0_189, %c2_190, %c0_191] : memref<2x12x128xbf16, #tpu.memory_space<vmem>>, vector<2x8x128xbf16>
    tpu.vector_store %arg16[%c0_189, %c2_190, %c0_191], %191 {strides = array<i32>} : memref<2x12x128xbf16, #tpu.memory_space<vmem>>, vector<2x8x128xbf16>,
    %c0_192 = arith.constant 0 : index
    %c0_193 = arith.constant 0 : index
    %193 = vector.load %arg10[%c0_192, %c0_193] : memref<1x128xf32, #tpu.memory_space<vmem>>, vector<1x128xf32>
    %194 = vector.shape_cast %193 : vector<1x128xf32> to vector<1x128xf32>
    %195 = vector.broadcast %194 : vector<1x128xf32> to vector<16x128xf32>
    %c0_194 = arith.constant 0 : index
    %c0_195 = arith.constant 0 : index
    %c0_196 = arith.constant 0 : index
    %196 = vector.load %arg16[%c0_194, %c0_195, %c0_196] : memref<2x12x128xbf16, #tpu.memory_space<vmem>>, vector<2x8x128xbf16>
    %197 = vector.shape_cast %196 : vector<2x8x128xbf16> to vector<16x128xbf16>
    %c0_197 = arith.constant 0 : index
    %c0_198 = arith.constant 0 : index
    %c0_199 = arith.constant 0 : index
    %198 = vector.load %arg5[%c0_197, %c0_198, %c0_199] : memref<5x128x128xbf16, #tpu.memory_space<vmem>>, vector<1x128x128xbf16>
    %199 = vector.shape_cast %198 : vector<1x128x128xbf16> to vector<128x128xbf16>
    %cst_200 = arith.constant dense<0.000000e+00> : vector<16x128xf32>
    %200 = tpu.matmul %197, %199, %cst_200 {dimension_numbers = #tpu.dot_dimension_numbers<[1], [0], [0], [1], [0, 0, 1, 1], [], []>} : vector<16x128xbf16>, vector<128x128xbf16>, vector<16x128xf32> -> vector<16x128xf32>
    %201 = arith.addf %195, %200 : vector<16x128xf32>
    %c0_201 = arith.constant 0 : index
    %c1_202 = arith.constant 1 : index
    %c0_203 = arith.constant 0 : index
    %202 = vector.load %arg16[%c0_201, %c1_202, %c0_203] : memref<2x12x128xbf16, #tpu.memory_space<vmem>>, vector<2x8x128xbf16>
    %203 = vector.shape_cast %202 : vector<2x8x128xbf16> to vector<16x128xbf16>
    %c1_204 = arith.constant 1 : index
    %c0_205 = arith.constant 0 : index
    %c0_206 = arith.constant 0 : index
    %204 = vector.load %arg5[%c1_204, %c0_205, %c0_206] : memref<5x128x128xbf16, #tpu.memory_space<vmem>>, vector<1x128x128xbf16>
    %205 = vector.shape_cast %204 : vector<1x128x128xbf16> to vector<128x128xbf16>
    %cst_207 = arith.constant dense<0.000000e+00> : vector<16x128xf32>
    %206 = tpu.matmul %203, %205, %cst_207 {dimension_numbers = #tpu.dot_dimension_numbers<[1], [0], [0], [1], [0, 0, 1, 1], [], []>} : vector<16x128xbf16>, vector<128x128xbf16>, vector<16x128xf32> -> vector<16x128xf32>
    %207 = arith.addf %201, %206 : vector<16x128xf32>
    %c0_208 = arith.constant 0 : index
    %c2_209 = arith.constant 2 : index
    %c0_210 = arith.constant 0 : index
    %208 = vector.load %arg16[%c0_208, %c2_209, %c0_210] : memref<2x12x128xbf16, #tpu.memory_space<vmem>>, vector<2x8x128xbf16>
    %209 = vector.shape_cast %208 : vector<2x8x128xbf16> to vector<16x128xbf16>
    %c2_211 = arith.constant 2 : index
    %c0_212 = arith.constant 0 : index
    %c0_213 = arith.constant 0 : index
    %210 = vector.load %arg5[%c2_211, %c0_212, %c0_213] : memref<5x128x128xbf16, #tpu.memory_space<vmem>>, vector<1x128x128xbf16>
    %211 = vector.shape_cast %210 : vector<1x128x128xbf16> to vector<128x128xbf16>
    %cst_214 = arith.constant dense<0.000000e+00> : vector<16x128xf32>
    %212 = tpu.matmul %209, %211, %cst_214 {dimension_numbers = #tpu.dot_dimension_numbers<[1], [0], [0], [1], [0, 0, 1, 1], [], []>} : vector<16x128xbf16>, vector<128x128xbf16>, vector<16x128xf32> -> vector<16x128xf32>
    %213 = arith.addf %207, %212 : vector<16x128xf32>
    %c0_215 = arith.constant 0 : index
    %c3_216 = arith.constant 3 : index
    %c0_217 = arith.constant 0 : index
    %214 = vector.load %arg16[%c0_215, %c3_216, %c0_217] : memref<2x12x128xbf16, #tpu.memory_space<vmem>>, vector<2x8x128xbf16>
    %215 = vector.shape_cast %214 : vector<2x8x128xbf16> to vector<16x128xbf16>
    %c3_218 = arith.constant 3 : index
    %c0_219 = arith.constant 0 : index
    %c0_220 = arith.constant 0 : index
    %216 = vector.load %arg5[%c3_218, %c0_219, %c0_220] : memref<5x128x128xbf16, #tpu.memory_space<vmem>>, vector<1x128x128xbf16>
    %217 = vector.shape_cast %216 : vector<1x128x128xbf16> to vector<128x128xbf16>
    %cst_221 = arith.constant dense<0.000000e+00> : vector<16x128xf32>
    %218 = tpu.matmul %215, %217, %cst_221 {dimension_numbers = #tpu.dot_dimension_numbers<[1], [0], [0], [1], [0, 0, 1, 1], [], []>} : vector<16x128xbf16>, vector<128x128xbf16>, vector<16x128xf32> -> vector<16x128xf32>
    %219 = arith.addf %213, %218 : vector<16x128xf32>
    %c0_222 = arith.constant 0 : index
    %c4_223 = arith.constant 4 : index
    %c0_224 = arith.constant 0 : index
    %220 = vector.load %arg16[%c0_222, %c4_223, %c0_224] : memref<2x12x128xbf16, #tpu.memory_space<vmem>>, vector<2x8x128xbf16>
    %221 = vector.shape_cast %220 : vector<2x8x128xbf16> to vector<16x128xbf16>
    %c4_225 = arith.constant 4 : index
    %c0_226 = arith.constant 0 : index
    %c0_227 = arith.constant 0 : index
    %222 = vector.load %arg5[%c4_225, %c0_226, %c0_227] : memref<5x128x128xbf16, #tpu.memory_space<vmem>>, vector<1x128x128xbf16>
    %223 = vector.shape_cast %222 : vector<1x128x128xbf16> to vector<128x128xbf16>
    %cst_228 = arith.constant dense<0.000000e+00> : vector<16x128xf32>
    %224 = tpu.matmul %221, %223, %cst_228 {dimension_numbers = #tpu.dot_dimension_numbers<[1], [0], [0], [1], [0, 0, 1, 1], [], []>} : vector<16x128xbf16>, vector<128x128xbf16>, vector<16x128xf32> -> vector<16x128xf32>
    %225 = arith.addf %219, %224 : vector<16x128xf32>
    %cst_229 = arith.constant 0.000000e+00 : f32
    %226 = vector.broadcast %cst_229 : f32 to vector<16x128xf32>
    %227 = arith.subf %226, %225 : vector<16x128xf32>
    %228 = math.exp %227 : vector<16x128xf32>
    %cst_230 = arith.constant 1.000000e+00 : f32
    %229 = vector.broadcast %cst_230 : f32 to vector<16x128xf32>
    %230 = arith.addf %229, %228 : vector<16x128xf32>
    %231 = tpu.reciprocal %230 {approx = true} : vector<16x128xf32> -> vector<16x128xf32>
    %232 = vector.shape_cast %231 : vector<16x128xf32> to vector<2x8x128xf32>
    %c0_231 = arith.constant 0 : index
    %c0_232 = arith.constant 0 : index
    %c0_233 = arith.constant 0 : index
    %233 = vector.load %arg13[%c0_231, %c0_232, %c0_233] : memref<2x8x128xf32, #tpu.memory_space<vmem>>, vector<2x8x128xf32>
    tpu.vector_store %arg13[%c0_231, %c0_232, %c0_233], %232 {strides = array<i32>} : memref<2x8x128xf32, #tpu.memory_space<vmem>>, vector<2x8x128xf32>,
    %234 = arith.truncf %231 : vector<16x128xf32> to vector<16x128xbf16>
    %c0_234 = arith.constant 0 : index
    %c0_235 = arith.constant 0 : index
    %235 = vector.load %arg11[%c0_234, %c0_235] : memref<1x128xf32, #tpu.memory_space<vmem>>, vector<1x128xf32>
    %236 = vector.extract_strided_slice %234 {offsets = [0, 0], sizes = [1, 128], strides = [1, 1]} : vector<16x128xbf16> to vector<1x128xbf16>
    %c0_236 = arith.constant 0 : index
    %c0_237 = arith.constant 0 : index
    %c0_238 = arith.constant 0 : index
    %237 = vector.load %arg6[%c0_236, %c0_237, %c0_238] : memref<8x128x128xbf16, #tpu.memory_space<vmem>>, vector<1x128x128xbf16>
    %238 = vector.shape_cast %237 : vector<1x128x128xbf16> to vector<128x128xbf16>
    %cst_239 = arith.constant dense<0.000000e+00> : vector<1x128xf32>
    %239 = tpu.matmul %236, %238, %cst_239 {dimension_numbers = #tpu.dot_dimension_numbers<[1], [0], [0], [1], [0, 0, 1, 1], [], []>} : vector<1x128xbf16>, vector<128x128xbf16>, vector<1x128xf32> -> vector<1x128xf32>
    %240 = arith.addf %235, %239 : vector<1x128xf32>
    %241 = vector.extract_strided_slice %234 {offsets = [1, 0], sizes = [1, 128], strides = [1, 1]} : vector<16x128xbf16> to vector<1x128xbf16>
    %c1_240 = arith.constant 1 : index
    %c0_241 = arith.constant 0 : index
    %c0_242 = arith.constant 0 : index
    %242 = vector.load %arg6[%c1_240, %c0_241, %c0_242] : memref<8x128x128xbf16, #tpu.memory_space<vmem>>, vector<1x128x128xbf16>
    %243 = vector.shape_cast %242 : vector<1x128x128xbf16> to vector<128x128xbf16>
    %cst_243 = arith.constant dense<0.000000e+00> : vector<1x128xf32>
    %244 = tpu.matmul %241, %243, %cst_243 {dimension_numbers = #tpu.dot_dimension_numbers<[1], [0], [0], [1], [0, 0, 1, 1], [], []>} : vector<1x128xbf16>, vector<128x128xbf16>, vector<1x128xf32> -> vector<1x128xf32>
    %245 = arith.addf %240, %244 : vector<1x128xf32>
    %246 = vector.extract_strided_slice %234 {offsets = [2, 0], sizes = [1, 128], strides = [1, 1]} : vector<16x128xbf16> to vector<1x128xbf16>
    %c2_244 = arith.constant 2 : index
    %c0_245 = arith.constant 0 : index
    %c0_246 = arith.constant 0 : index
    %247 = vector.load %arg6[%c2_244, %c0_245, %c0_246] : memref<8x128x128xbf16, #tpu.memory_space<vmem>>, vector<1x128x128xbf16>
    %248 = vector.shape_cast %247 : vector<1x128x128xbf16> to vector<128x128xbf16>
    %cst_247 = arith.constant dense<0.000000e+00> : vector<1x128xf32>
    %249 = tpu.matmul %246, %248, %cst_247 {dimension_numbers = #tpu.dot_dimension_numbers<[1], [0], [0], [1], [0, 0, 1, 1], [], []>} : vector<1x128xbf16>, vector<128x128xbf16>, vector<1x128xf32> -> vector<1x128xf32>
    %250 = arith.addf %245, %249 : vector<1x128xf32>
    %251 = vector.extract_strided_slice %234 {offsets = [3, 0], sizes = [1, 128], strides = [1, 1]} : vector<16x128xbf16> to vector<1x128xbf16>
    %c3_248 = arith.constant 3 : index
    %c0_249 = arith.constant 0 : index
    %c0_250 = arith.constant 0 : index
    %252 = vector.load %arg6[%c3_248, %c0_249, %c0_250] : memref<8x128x128xbf16, #tpu.memory_space<vmem>>, vector<1x128x128xbf16>
    %253 = vector.shape_cast %252 : vector<1x128x128xbf16> to vector<128x128xbf16>
    %cst_251 = arith.constant dense<0.000000e+00> : vector<1x128xf32>
    %254 = tpu.matmul %251, %253, %cst_251 {dimension_numbers = #tpu.dot_dimension_numbers<[1], [0], [0], [1], [0, 0, 1, 1], [], []>} : vector<1x128xbf16>, vector<128x128xbf16>, vector<1x128xf32> -> vector<1x128xf32>
    %255 = arith.addf %250, %254 : vector<1x128xf32>
    %256 = vector.extract_strided_slice %234 {offsets = [4, 0], sizes = [1, 128], strides = [1, 1]} : vector<16x128xbf16> to vector<1x128xbf16>
    %c4_252 = arith.constant 4 : index
    %c0_253 = arith.constant 0 : index
    %c0_254 = arith.constant 0 : index
    %257 = vector.load %arg6[%c4_252, %c0_253, %c0_254] : memref<8x128x128xbf16, #tpu.memory_space<vmem>>, vector<1x128x128xbf16>
    %258 = vector.shape_cast %257 : vector<1x128x128xbf16> to vector<128x128xbf16>
    %cst_255 = arith.constant dense<0.000000e+00> : vector<1x128xf32>
    %259 = tpu.matmul %256, %258, %cst_255 {dimension_numbers = #tpu.dot_dimension_numbers<[1], [0], [0], [1], [0, 0, 1, 1], [], []>} : vector<1x128xbf16>, vector<128x128xbf16>, vector<1x128xf32> -> vector<1x128xf32>
    %260 = arith.addf %255, %259 : vector<1x128xf32>
    %261 = vector.extract_strided_slice %234 {offsets = [5, 0], sizes = [1, 128], strides = [1, 1]} : vector<16x128xbf16> to vector<1x128xbf16>
    %c5 = arith.constant 5 : index
    %c0_256 = arith.constant 0 : index
    %c0_257 = arith.constant 0 : index
    %262 = vector.load %arg6[%c5, %c0_256, %c0_257] : memref<8x128x128xbf16, #tpu.memory_space<vmem>>, vector<1x128x128xbf16>
    %263 = vector.shape_cast %262 : vector<1x128x128xbf16> to vector<128x128xbf16>
    %cst_258 = arith.constant dense<0.000000e+00> : vector<1x128xf32>
    %264 = tpu.matmul %261, %263, %cst_258 {dimension_numbers = #tpu.dot_dimension_numbers<[1], [0], [0], [1], [0, 0, 1, 1], [], []>} : vector<1x128xbf16>, vector<128x128xbf16>, vector<1x128xf32> -> vector<1x128xf32>
    %265 = arith.addf %260, %264 : vector<1x128xf32>
    %266 = vector.extract_strided_slice %234 {offsets = [6, 0], sizes = [1, 128], strides = [1, 1]} : vector<16x128xbf16> to vector<1x128xbf16>
    %c6 = arith.constant 6 : index
    %c0_259 = arith.constant 0 : index
    %c0_260 = arith.constant 0 : index
    %267 = vector.load %arg6[%c6, %c0_259, %c0_260] : memref<8x128x128xbf16, #tpu.memory_space<vmem>>, vector<1x128x128xbf16>
    %268 = vector.shape_cast %267 : vector<1x128x128xbf16> to vector<128x128xbf16>
    %cst_261 = arith.constant dense<0.000000e+00> : vector<1x128xf32>
    %269 = tpu.matmul %266, %268, %cst_261 {dimension_numbers = #tpu.dot_dimension_numbers<[1], [0], [0], [1], [0, 0, 1, 1], [], []>} : vector<1x128xbf16>, vector<128x128xbf16>, vector<1x128xf32> -> vector<1x128xf32>
    %270 = arith.addf %265, %269 : vector<1x128xf32>
    %271 = vector.extract_strided_slice %234 {offsets = [7, 0], sizes = [1, 128], strides = [1, 1]} : vector<16x128xbf16> to vector<1x128xbf16>
    %c7 = arith.constant 7 : index
    %c0_262 = arith.constant 0 : index
    %c0_263 = arith.constant 0 : index
    %272 = vector.load %arg6[%c7, %c0_262, %c0_263] : memref<8x128x128xbf16, #tpu.memory_space<vmem>>, vector<1x128x128xbf16>
    %273 = vector.shape_cast %272 : vector<1x128x128xbf16> to vector<128x128xbf16>
    %cst_264 = arith.constant dense<0.000000e+00> : vector<1x128xf32>
    %274 = tpu.matmul %271, %273, %cst_264 {dimension_numbers = #tpu.dot_dimension_numbers<[1], [0], [0], [1], [0, 0, 1, 1], [], []>} : vector<1x128xbf16>, vector<128x128xbf16>, vector<1x128xf32> -> vector<1x128xf32>
    %275 = arith.addf %270, %274 : vector<1x128xf32>
    %276 = vector.extract_strided_slice %275 {offsets = [0, 0], sizes = [1, 100], strides = [1, 1]} : vector<1x128xf32> to vector<1x100xf32>
    %c0_265 = arith.constant 0 : index
    %c0_266 = arith.constant 0 : index
    %277 = vector.load %arg12[%c0_265, %c0_266] : memref<2x100xf32, #tpu.memory_space<vmem>>, vector<1x100xf32>
    tpu.vector_store %arg12[%c0_265, %c0_266], %276 {strides = array<i32>} : memref<2x100xf32, #tpu.memory_space<vmem>>, vector<1x100xf32>,
    %278 = vector.extract_strided_slice %234 {offsets = [8, 0], sizes = [1, 128], strides = [1, 1]} : vector<16x128xbf16> to vector<1x128xbf16>
    %c0_267 = arith.constant 0 : index
    %c0_268 = arith.constant 0 : index
    %c0_269 = arith.constant 0 : index
    %279 = vector.load %arg6[%c0_267, %c0_268, %c0_269] : memref<8x128x128xbf16, #tpu.memory_space<vmem>>, vector<1x128x128xbf16>
    %280 = vector.shape_cast %279 : vector<1x128x128xbf16> to vector<128x128xbf16>
    %cst_270 = arith.constant dense<0.000000e+00> : vector<1x128xf32>
    %281 = tpu.matmul %278, %280, %cst_270 {dimension_numbers = #tpu.dot_dimension_numbers<[1], [0], [0], [1], [0, 0, 1, 1], [], []>} : vector<1x128xbf16>, vector<128x128xbf16>, vector<1x128xf32> -> vector<1x128xf32>
    %282 = arith.addf %235, %281 : vector<1x128xf32>
    %283 = vector.extract_strided_slice %234 {offsets = [9, 0], sizes = [1, 128], strides = [1, 1]} : vector<16x128xbf16> to vector<1x128xbf16>
    %c1_271 = arith.constant 1 : index
    %c0_272 = arith.constant 0 : index
    %c0_273 = arith.constant 0 : index
    %284 = vector.load %arg6[%c1_271, %c0_272, %c0_273] : memref<8x128x128xbf16, #tpu.memory_space<vmem>>, vector<1x128x128xbf16>
    %285 = vector.shape_cast %284 : vector<1x128x128xbf16> to vector<128x128xbf16>
    %cst_274 = arith.constant dense<0.000000e+00> : vector<1x128xf32>
    %286 = tpu.matmul %283, %285, %cst_274 {dimension_numbers = #tpu.dot_dimension_numbers<[1], [0], [0], [1], [0, 0, 1, 1], [], []>} : vector<1x128xbf16>, vector<128x128xbf16>, vector<1x128xf32> -> vector<1x128xf32>
    %287 = arith.addf %282, %286 : vector<1x128xf32>
    %288 = vector.extract_strided_slice %234 {offsets = [10, 0], sizes = [1, 128], strides = [1, 1]} : vector<16x128xbf16> to vector<1x128xbf16>
    %c2_275 = arith.constant 2 : index
    %c0_276 = arith.constant 0 : index
    %c0_277 = arith.constant 0 : index
    %289 = vector.load %arg6[%c2_275, %c0_276, %c0_277] : memref<8x128x128xbf16, #tpu.memory_space<vmem>>, vector<1x128x128xbf16>
    %290 = vector.shape_cast %289 : vector<1x128x128xbf16> to vector<128x128xbf16>
    %cst_278 = arith.constant dense<0.000000e+00> : vector<1x128xf32>
    %291 = tpu.matmul %288, %290, %cst_278 {dimension_numbers = #tpu.dot_dimension_numbers<[1], [0], [0], [1], [0, 0, 1, 1], [], []>} : vector<1x128xbf16>, vector<128x128xbf16>, vector<1x128xf32> -> vector<1x128xf32>
    %292 = arith.addf %287, %291 : vector<1x128xf32>
    %293 = vector.extract_strided_slice %234 {offsets = [11, 0], sizes = [1, 128], strides = [1, 1]} : vector<16x128xbf16> to vector<1x128xbf16>
    %c3_279 = arith.constant 3 : index
    %c0_280 = arith.constant 0 : index
    %c0_281 = arith.constant 0 : index
    %294 = vector.load %arg6[%c3_279, %c0_280, %c0_281] : memref<8x128x128xbf16, #tpu.memory_space<vmem>>, vector<1x128x128xbf16>
    %295 = vector.shape_cast %294 : vector<1x128x128xbf16> to vector<128x128xbf16>
    %cst_282 = arith.constant dense<0.000000e+00> : vector<1x128xf32>
    %296 = tpu.matmul %293, %295, %cst_282 {dimension_numbers = #tpu.dot_dimension_numbers<[1], [0], [0], [1], [0, 0, 1, 1], [], []>} : vector<1x128xbf16>, vector<128x128xbf16>, vector<1x128xf32> -> vector<1x128xf32>
    %297 = arith.addf %292, %296 : vector<1x128xf32>
    %298 = vector.extract_strided_slice %234 {offsets = [12, 0], sizes = [1, 128], strides = [1, 1]} : vector<16x128xbf16> to vector<1x128xbf16>
    %c4_283 = arith.constant 4 : index
    %c0_284 = arith.constant 0 : index
    %c0_285 = arith.constant 0 : index
    %299 = vector.load %arg6[%c4_283, %c0_284, %c0_285] : memref<8x128x128xbf16, #tpu.memory_space<vmem>>, vector<1x128x128xbf16>
    %300 = vector.shape_cast %299 : vector<1x128x128xbf16> to vector<128x128xbf16>
    %cst_286 = arith.constant dense<0.000000e+00> : vector<1x128xf32>
    %301 = tpu.matmul %298, %300, %cst_286 {dimension_numbers = #tpu.dot_dimension_numbers<[1], [0], [0], [1], [0, 0, 1, 1], [], []>} : vector<1x128xbf16>, vector<128x128xbf16>, vector<1x128xf32> -> vector<1x128xf32>
    %302 = arith.addf %297, %301 : vector<1x128xf32>
    %303 = vector.extract_strided_slice %234 {offsets = [13, 0], sizes = [1, 128], strides = [1, 1]} : vector<16x128xbf16> to vector<1x128xbf16>
    %c5_287 = arith.constant 5 : index
    %c0_288 = arith.constant 0 : index
    %c0_289 = arith.constant 0 : index
    %304 = vector.load %arg6[%c5_287, %c0_288, %c0_289] : memref<8x128x128xbf16, #tpu.memory_space<vmem>>, vector<1x128x128xbf16>
    %305 = vector.shape_cast %304 : vector<1x128x128xbf16> to vector<128x128xbf16>
    %cst_290 = arith.constant dense<0.000000e+00> : vector<1x128xf32>
    %306 = tpu.matmul %303, %305, %cst_290 {dimension_numbers = #tpu.dot_dimension_numbers<[1], [0], [0], [1], [0, 0, 1, 1], [], []>} : vector<1x128xbf16>, vector<128x128xbf16>, vector<1x128xf32> -> vector<1x128xf32>
    %307 = arith.addf %302, %306 : vector<1x128xf32>
    %308 = vector.extract_strided_slice %234 {offsets = [14, 0], sizes = [1, 128], strides = [1, 1]} : vector<16x128xbf16> to vector<1x128xbf16>
    %c6_291 = arith.constant 6 : index
    %c0_292 = arith.constant 0 : index
    %c0_293 = arith.constant 0 : index
    %309 = vector.load %arg6[%c6_291, %c0_292, %c0_293] : memref<8x128x128xbf16, #tpu.memory_space<vmem>>, vector<1x128x128xbf16>
    %310 = vector.shape_cast %309 : vector<1x128x128xbf16> to vector<128x128xbf16>
    %cst_294 = arith.constant dense<0.000000e+00> : vector<1x128xf32>
    %311 = tpu.matmul %308, %310, %cst_294 {dimension_numbers = #tpu.dot_dimension_numbers<[1], [0], [0], [1], [0, 0, 1, 1], [], []>} : vector<1x128xbf16>, vector<128x128xbf16>, vector<1x128xf32> -> vector<1x128xf32>
    %312 = arith.addf %307, %311 : vector<1x128xf32>
    %313 = vector.extract_strided_slice %234 {offsets = [15, 0], sizes = [1, 128], strides = [1, 1]} : vector<16x128xbf16> to vector<1x128xbf16>
    %c7_295 = arith.constant 7 : index
    %c0_296 = arith.constant 0 : index
    %c0_297 = arith.constant 0 : index
    %314 = vector.load %arg6[%c7_295, %c0_296, %c0_297] : memref<8x128x128xbf16, #tpu.memory_space<vmem>>, vector<1x128x128xbf16>
    %315 = vector.shape_cast %314 : vector<1x128x128xbf16> to vector<128x128xbf16>
    %cst_298 = arith.constant dense<0.000000e+00> : vector<1x128xf32>
    %316 = tpu.matmul %313, %315, %cst_298 {dimension_numbers = #tpu.dot_dimension_numbers<[1], [0], [0], [1], [0, 0, 1, 1], [], []>} : vector<1x128xbf16>, vector<128x128xbf16>, vector<1x128xf32> -> vector<1x128xf32>
    %317 = arith.addf %312, %316 : vector<1x128xf32>
    %318 = vector.extract_strided_slice %317 {offsets = [0, 0], sizes = [1, 100], strides = [1, 1]} : vector<1x128xf32> to vector<1x100xf32>
    %c1_299 = arith.constant 1 : index
    %c0_300 = arith.constant 0 : index
    %319 = vector.load %arg12[%c1_299, %c0_300] : memref<2x100xf32, #tpu.memory_space<vmem>>, vector<1x100xf32>
    tpu.vector_store %arg12[%c1_299, %c0_300], %318 {strides = array<i32>} : memref<2x100xf32, #tpu.memory_space<vmem>>, vector<1x100xf32>,
    return
  }
  func.func @transform_0(%arg0: i32) -> (i32, i32, i32, i32) {
    %c0_i32 = arith.constant 0 : i32
    %c0_i32_0 = arith.constant 0 : i32
    %c0_i32_1 = arith.constant 0 : i32
    %c0_i32_2 = arith.constant 0 : i32
    %c0_i32_3 = arith.constant 0 : i32
    return %c0_i32, %c0_i32_0, %c0_i32_1, %c0_i32_2 : i32, i32, i32, i32
  }
  func.func @transform_1(%arg0: i32) -> (i32, i32, i32) {
    %c0_i32 = arith.constant 0 : i32
    %c0_i32_0 = arith.constant 0 : i32
    %c0_i32_1 = arith.constant 0 : i32
    %c0_i32_2 = arith.constant 0 : i32
    return %c0_i32, %c0_i32_0, %c0_i32_1 : i32, i32, i32
  }
  func.func @transform_2(%arg0: i32) -> (i32, i32, i32) {
    %c0_i32 = arith.constant 0 : i32
    %c0_i32_0 = arith.constant 0 : i32
    %c0_i32_1 = arith.constant 0 : i32
    %c0_i32_2 = arith.constant 0 : i32
    return %c0_i32, %c0_i32_0, %c0_i32_1 : i32, i32, i32
  }
  func.func @transform_3(%arg0: i32) -> (i32, i32, i32) {
    %c0_i32 = arith.constant 0 : i32
    %c0_i32_0 = arith.constant 0 : i32
    %c0_i32_1 = arith.constant 0 : i32
    %c0_i32_2 = arith.constant 0 : i32
    return %c0_i32, %c0_i32_0, %c0_i32_1 : i32, i32, i32
  }
  func.func @transform_4(%arg0: i32) -> (i32, i32, i32) {
    %c0_i32 = arith.constant 0 : i32
    %c0_i32_0 = arith.constant 0 : i32
    %c0_i32_1 = arith.constant 0 : i32
    %c0_i32_2 = arith.constant 0 : i32
    return %c0_i32, %c0_i32_0, %c0_i32_1 : i32, i32, i32
  }
  func.func @transform_5(%arg0: i32) -> (i32, i32, i32) {
    %c0_i32 = arith.constant 0 : i32
    %c0_i32_0 = arith.constant 0 : i32
    %c0_i32_1 = arith.constant 0 : i32
    %c0_i32_2 = arith.constant 0 : i32
    return %c0_i32, %c0_i32_0, %c0_i32_1 : i32, i32, i32
  }
  func.func @transform_6(%arg0: i32) -> (i32, i32) {
    %c0_i32 = arith.constant 0 : i32
    %c0_i32_0 = arith.constant 0 : i32
    %c0_i32_1 = arith.constant 0 : i32
    return %c0_i32, %c0_i32_0 : i32, i32
  }
  func.func @transform_7(%arg0: i32) -> (i32, i32) {
    %c0_i32 = arith.constant 0 : i32
    %c0_i32_0 = arith.constant 0 : i32
    %c0_i32_1 = arith.constant 0 : i32
    return %c0_i32, %c0_i32_0 : i32, i32
  }
  func.func @transform_8(%arg0: i32) -> (i32, i32) {
    %c0_i32 = arith.constant 0 : i32
    %c0_i32_0 = arith.constant 0 : i32
    %c0_i32_1 = arith.constant 0 : i32
    return %c0_i32, %c0_i32_0 : i32, i32
  }
  func.func @transform_9(%arg0: i32) -> (i32, i32) {
    %c0_i32 = arith.constant 0 : i32
    %c0_i32_0 = arith.constant 0 : i32
    %c0_i32_1 = arith.constant 0 : i32
    return %c0_i32, %c0_i32_0 : i32, i32
  }
  func.func @transform_10(%arg0: i32) -> (i32, i32) {
    %c0_i32 = arith.constant 0 : i32
    %c0_i32_0 = arith.constant 0 : i32
    %c0_i32_1 = arith.constant 0 : i32
    return %c0_i32, %c0_i32_0 : i32, i32
  }
  func.func @transform_11(%arg0: i32) -> (i32, i32) {
    %c0_i32 = arith.constant 0 : i32
    %c0_i32_0 = arith.constant 0 : i32
    %c0_i32_1 = arith.constant 0 : i32
    return %c0_i32, %c0_i32_0 : i32, i32
  }
  func.func @transform_12(%arg0: i32) -> (i32, i32, i32) {
    %c0_i32 = arith.constant 0 : i32
    %c0_i32_0 = arith.constant 0 : i32
    %c0_i32_1 = arith.constant 0 : i32
    %c0_i32_2 = arith.constant 0 : i32
    return %c0_i32, %c0_i32_0, %c0_i32_1 : i32, i32, i32
  }
}

</mosaic_0001>

<bundles_post_ra>
// kernel: lenet_forward.1
= control target key start
LH: loop header
LB: loop body
LE: loop exit
PB: predicated region body
PF: predicated region fallthrough
CT: control target
= control target key end

     0   :  { %18 = vsyncpa [#allocation6], 0  ;;  %s9597_s0 = inlined_call_operand.vmem [shape: bf16[4,2,9,128], index: 0, kind: input, shape index: {}]   ;;  %s9598_s1 = inlined_call_operand.vmem [shape: bf16[5,128,256], index: 1, kind: input, shape index: {}]   ;;  %s9599_s2 = inlined_call_operand.hbm [shape: bf16[5,256,128], index: 2, kind: input, shape index: {}]   ;;  %s9600_s3 = inlined_call_operand.vmem [shape: bf16[5,128,128], index: 3, kind: input, shape index: {}]   ;;  %s9601_s4 = inlined_call_operand.hbm [shape: bf16[5,128,128], index: 4, kind: input, shape index: {}]   ;;  %s9602_s5 = inlined_call_operand.hbm [shape: bf16[8,128,128], index: 5, kind: input, shape index: {}]   ;;  %s9603_s6 = inlined_call_operand.vmem [shape: f32[1,256], index: 6, kind: input, shape index: {}]   ;;  %s9604_s7 = inlined_call_operand.vmem [shape: f32[1,128], index: 7, kind: input, shape index: {}]   ;;  %s9605_s8 = inlined_call_operand.vmem [shape: f32[1,128], index: 8, kind: input, shape index: {}]   ;;  %s9606_s9 = inlined_call_operand.vmem [shape: f32[1,128], index: 9, kind: input, shape index: {}]   ;;  %s9607_s10 = inlined_call_operand.vmem [shape: f32[1,128], index: 10, kind: input, shape index: {}]   ;;  %s9608_s11 = inlined_call_operand.hbm [shape: f32[2,100], index: 11, kind: output, shape index: {0}]   ;;  %s9609_s12 = inlined_call_operand.vmem [shape: f32[2,8,128], index: 12, kind: output, shape index: {1}]  }
   0x1   :  { %19 = vsyncpa [#allocation9], 0 }
   0x2   :  { %20 = vsyncpa [#allocation7], 0  ;;  %s8204_s21 = smov [#allocation8]   ;;  %s8205_s23 = smov [#allocation5]  }
   0x3   :  { %s44_s22 = sshll.u32 %s8204_s21, 4  ;;  %s30_s24 = sshll.u32 %s8205_s23, 4  ;;  %s45_s22 = int_to_ptr.vmem [resolvable:$true] %s44_s22  ;;  %s31_s24 = int_to_ptr.vmem [resolvable:$true] %s30_s24 }
   0x4   :  { %s8126_s25 = scalar_lea.vmem %s45_s22, 5120  ;;  %p8131_p1 = scmp.lt.s32.totalorder %s45_s22, %s45_s22 }
   0x5   :  { %p8127_p0 = scmp.ne.s32.totalorder %s45_s22, %s8126_s25  ;;  %p8132_p2 = scmp.lt.s32.totalorder %s8126_s25, %s8126_s25 }
   0x7   :  { %p8133_p3 = por %p8132_p2, %p8131_p1 }
   0x9   :  { %p8134_p4 = pnand %p8133_p3, %p8127_p0 }
   0xb   :  { %8137 = shalt.err (!%p8134_p4)
}
   0xc   :  { %s8206_s26 = smov 64   ;;  %s8207_s27 = smov 4  }
   0xd   :  { %50 = dma.hbm_to_vmem [thread:$0]  %s9601_s4, 5120, %s45_s22, [#allocation9], %s8206_s26, %s8206_s26, %s8207_s27  }
   0xe   :  { %s8146_s30 = scalar_lea.vmem %s31_s24, 10240  ;;  %p8151_p6 = scmp.lt.s32.totalorder %s31_s24, %s31_s24 }
   0xf   :  { %p8147_p5 = scmp.ne.s32.totalorder %s31_s24, %s8146_s30  ;;  %p8152_p7 = scmp.lt.s32.totalorder %s8146_s30, %s8146_s30 }
  0x11   :  { %p8153_p8 = por %p8152_p7, %p8151_p6 }
  0x13   :  { %p8154_p9 = pnand %p8153_p8, %p8147_p5 }
  0x15   :  { %8157 = shalt.err (!%p8154_p9)
}
  0x16   :  { %36 = dma.hbm_to_vmem [thread:$0]  %s9599_s2, 10240, %s31_s24, [#allocation6], %s8206_s26, %s8206_s26, %s8207_s27  }
  0x17   :  { %s8208_s15 = smov [#allocation10]  }
  0x18   :  { %s56_s16 = sshll.u32 %s8208_s15, 4  ;;  %s57_s16 = int_to_ptr.vmem [resolvable:$true] %s56_s16 }
  0x19   :  { %s8166_s17 = scalar_lea.vmem %s57_s16, 8192  ;;  %p8171_p11 = scmp.lt.s32.totalorder %s57_s16, %s57_s16 }
  0x1a   :  { %p8167_p10 = scmp.ne.s32.totalorder %s57_s16, %s8166_s17  ;;  %p8172_p12 = scmp.lt.s32.totalorder %s8166_s17, %s8166_s17 }
  0x1c   :  { %p8173_p13 = por %p8172_p12, %p8171_p11 }
  0x1e   :  { %p8174_p0 = pnand %p8173_p13, %p8167_p10 }
  0x20   :  { %8177 = shalt.err (!%p8174_p0)
}
  0x21   :  { %62 = dma.hbm_to_vmem [thread:$0]  %s9602_s5, 8192, %s57_s16, [#allocation9], %s8206_s26, %s8206_s26, %s8207_s27  }
  0x22   :  { %8198 = dma.done.wait [#allocation6], 10240  }
  0x23   :  { %8199 = vsyncadd [#allocation6], 4294957056 }
  0x24   :  { %8200 = dma.done.wait [#allocation9], 13312  }
  0x25   :  { %8201 = vsyncadd [#allocation9], 4294953984  ;;  %v9610_v0 = vmov 0   ;;  %v8304_v1 = vld [vmem:[%s9598_s1 + $0x74] ss:$8 sps:$4 sm:$0xff]   ;;  %vm958_vm3 = vcmask 1043456  }
  0x26   :  { %247 = vmatprep.mubr.bf16.mxu0 %v9610_v0  ;;  %84 = vst [vmem:[#allocation2] sm:$0x11] %v9610_v0  ;;  %86 = vst [vmem:[#allocation2 + $0x10] sm:$0x11] %v9610_v0  ;;  %400 = vmatprep.mubr.bf16.mxu1 %v9610_v0  ;;  %v8309_v2 = vld [vmem:[%s9598_s1 + $0xf4] ss:$8 sps:$4 sm:$0xff]  }
  0x27   :  { %88 = vst [vmem:[#allocation2 + $0x20] sm:$0x11] %v9610_v0  ;;  %90 = vst [vmem:[#allocation2 + $0x38] sm:$0x11] %v9610_v0  ;;  %215 = vmatprep.subr.bf16.mxu0 %v8304_v1  ;;  %v8315_v3 = vld [vmem:[%s9598_s1 + $0x70] ss:$8 sps:$4 sm:$0xff]   ;;  %368 = vmatprep.subr.bf16.mxu1 %v8309_v2 }
  0x28   :  { %91 = vst [vmem:[#allocation3] sm:$0xf] %v9610_v0  ;;  %92 = vst [vmem:[#allocation3 + $0x4] sm:$0x3] %v9610_v0  ;;  %v8320_v4 = vld [vmem:[%s9598_s1 + $0xf0] ss:$8 sps:$4 sm:$0xff]   ;;  %216 = vmatpush1.bf16.msra.mxu0 %v8315_v3 }
  0x29   :  { %93 = vst [vmem:[#allocation3 + $0x8] sm:$0xf] %v9610_v0  ;;  %94 = vst [vmem:[#allocation3 + $0xc] sm:$0x3] %v9610_v0  ;;  %v8326_v5 = vld [vmem:[%s9598_s1 + $0x64] ss:$8 sps:$4 sm:$0xff]   ;;  %369 = vmatpush1.bf16.msra.mxu1 %v8320_v4 }
  0x2a   :  { %95 = vst [vmem:[#allocation4] sm:$0xf] %v9610_v0  ;;  %96 = vst [vmem:[#allocation4 + $0x4] sm:$0x3] %v9610_v0  ;;  %v8333_v6 = vld [vmem:[%s9598_s1 + $0xe4] ss:$8 sps:$4 sm:$0xff]   ;;  %217 = vmatprep.subr.bf16.mxu0 %v8326_v5 }
  0x2b   :  { %97 = vst [vmem:[#allocation4 + $0x8] sm:$0xf] %v9610_v0  ;;  %98 = vst [vmem:[#allocation4 + $0xc] sm:$0x3] %v9610_v0  ;;  %v8338_v7 = vld [vmem:[%s9598_s1 + $0x60] ss:$8 sps:$4 sm:$0xff]   ;;  %370 = vmatprep.subr.bf16.mxu1 %v8333_v6 }
  0x2c   :  { %v8344_v8 = vld [vmem:[%s9598_s1 + $0xe0] ss:$8 sps:$4 sm:$0xff]   ;;  %v8350_v9 = vld [vmem:[%s9598_s1 + $0x54] ss:$8 sps:$4 sm:$0xff]   ;;  %v8360_v11 = vld [vmem:[%s9598_s1 + $0x50] ss:$8 sps:$4 sm:$0xff]   ;;  %218 = vmatpush1.bf16.msra.mxu0 %v8338_v7 }
  0x2d   :  { %v8355_v10 = vld [vmem:[%s9598_s1 + $0xd4] ss:$8 sps:$4 sm:$0xff]   ;;  %v8365_v12 = vld [vmem:[%s9598_s1 + $0xd0] ss:$8 sps:$4 sm:$0xff]   ;;  %371 = vmatpush1.bf16.msra.mxu1 %v8344_v8  ;;  %v8372_v13 = vld [vmem:[%s9598_s1 + $0x44] ss:$8 sps:$4 sm:$0xff]   ;;  %219 = vmatprep.subr.bf16.mxu0 %v8350_v9 }
  0x2e   :  { %372 = vmatprep.subr.bf16.mxu1 %v8355_v10  ;;  %v8379_v14 = vld [vmem:[%s9598_s1 + $0xc4] ss:$8 sps:$4 sm:$0xff]   ;;  %v8384_v15 = vld [vmem:[%s9598_s1 + $0x40] ss:$8 sps:$4 sm:$0xff]   ;;  %v8396_v17 = vld [vmem:[%s9598_s1 + $0x34] ss:$8 sps:$4 sm:$0xff]  }
  0x2f   :  { %v8391_v16 = vld [vmem:[%s9598_s1 + $0xc0] ss:$8 sps:$4 sm:$0xff]   ;;  %v8403_v18 = vld [vmem:[%s9598_s1 + $0xb4] ss:$8 sps:$4 sm:$0xff]   ;;  %v8408_v19 = vld [vmem:[%s9598_s1 + $0x30] ss:$8 sps:$4 sm:$0xff]  }
  0x30   :  { %220 = vmatpush1.bf16.msra.mxu0 %v8360_v11  ;;  %v8413_v20 = vld [vmem:[%s9598_s1 + $0xb0] ss:$8 sps:$4 sm:$0xff]   ;;  %v8420_v21 = vld [vmem:[%s9598_s1 + $0x24] ss:$8 sps:$4 sm:$0xff]   ;;  %v8432_v23 = vld [vmem:[%s9598_s1 + $0x20] ss:$8 sps:$4 sm:$0xff]  }
  0x31   :  { %373 = vmatpush1.bf16.msra.mxu1 %v8365_v12  ;;  %221 = vmatprep.subr.bf16.mxu0 %v8372_v13  ;;  %v8427_v22 = vld [vmem:[%s9598_s1 + $0xa4] ss:$8 sps:$4 sm:$0xff]   ;;  %v8439_v24 = vld [vmem:[%s9598_s1 + $0xa0] ss:$8 sps:$4 sm:$0xff]   ;;  %v8444_v25 = vld [vmem:[%s9598_s1 + $0x14] ss:$8 sps:$4 sm:$0xff]  }
  0x32   :  { %374 = vmatprep.subr.bf16.mxu1 %v8379_v14  ;;  %9642 = vst [vmem:[#allocation15_spill] sm:$0xff] %v8439_v24  ;;  %v8451_v26 = vld [vmem:[%s9598_s1 + $0x94] ss:$8 sps:$4 sm:$0xff]   ;;  %v8458_v27 = vld [vmem:[%s9598_s1 + $0x10] ss:$8 sps:$4 sm:$0xff]   ;;  %vm961_vm5 = vcmask 1047556  }
  0x33   :  { %9643 = vst [vmem:[#allocation16_spill] sm:$0xff] %v8451_v26  ;;  %v8463_v28 = vld [vmem:[%s9598_s1 + $0x90] ss:$8 sps:$4 sm:$0xff]   ;;  %v8470_v29 = vld [vmem:[%s9598_s1 + $0x4] ss:$8 sps:$4 sm:$0xff]   ;;  %vm968_vm7 = vcmask 1040384  }
  0x34   :  { %222 = vmatpush1.bf16.msra.mxu0 %v8384_v15  ;;  %9644 = vst [vmem:[#allocation17_spill] sm:$0xff] %v8463_v28  ;;  %v8475_v30 = vld [vmem:[%s9598_s1 + $0x84] ss:$8 sps:$4 sm:$0xff]   ;;  %v8482_v31 = vld [vmem:[%s9598_s1] ss:$8 sps:$4 sm:$0xff]   ;;  %vm971_vm10 = vcmask 1044484  }
  0x35   :  { %375 = vmatpush1.bf16.msra.mxu1 %v8391_v16  ;;  %223 = vmatprep.subr.bf16.mxu0 %v8396_v17  ;;  %9645 = vst [vmem:[#allocation18_spill] sm:$0xff] %v8475_v30  ;;  %v8487_v32 = vld [vmem:[%s9598_s1 + $0x80] ss:$8 sps:$4 sm:$0xff]   ;;  %v8494_v33 = vld [vmem:[%s9598_s1 + $0x174] ss:$8 sps:$4 sm:$0xff]  }
  0x36   :  { %376 = vmatprep.subr.bf16.mxu1 %v8403_v18  ;;  %9646 = vst [vmem:[#allocation19_spill] sm:$0xff] %v8487_v32  ;;  %v8499_v34 = vld [vmem:[%s9598_s1 + $0x1f4] ss:$8 sps:$4 sm:$0xff]   ;;  %v7694_v35 = vld [vmem:[%s9597_s0] ss:$8 sps:$4 sm:$0xff]  }
  0x37   :  { %9647 = vst [vmem:[#allocation20_spill] sm:$0xff] %v8499_v34  ;;  %v7695_v36 = vld [vmem:[%s9597_s0 + $0x10] ss:$8 sps:$4 sm:$0xff]   ;;  %v8524_v39 = vld [vmem:[%s9598_s1 + $0x164] ss:$8 sps:$4 sm:$0xff]  }
  0x38   :  { %224 = vmatpush1.bf16.msra.mxu0 %v8408_v19  ;;  %v8512_v37 = vld [vmem:[%s9598_s1 + $0x170] ss:$8 sps:$4 sm:$0xff]   ;;  %v8529_v40 = vld [vmem:[%s9598_s1 + $0x1e4] ss:$8 sps:$4 sm:$0xff]   ;;  %v8536_v41 = vld [vmem:[%s9598_s1 + $0x160] ss:$8 sps:$4 sm:$0xff]  }
  0x39   :  { %377 = vmatpush1.bf16.msra.mxu1 %v8413_v20  ;;  %225 = vmatprep.subr.bf16.mxu0 %v8420_v21  ;;  %v8517_v38 = vld [vmem:[%s9598_s1 + $0x1f0] ss:$8 sps:$4 sm:$0xff]   ;;  %9649 = vst [vmem:[#allocation22_spill] sm:$0xff] %v8529_v40  ;;  %v8541_v42 = vld [vmem:[%s9598_s1 + $0x1e0] ss:$8 sps:$4 sm:$0xff]  }
  0x3a   :  { %378 = vmatprep.subr.bf16.mxu1 %v8427_v22  ;;  %9648 = vst [vmem:[#allocation21_spill] sm:$0xff] %v8517_v38  ;;  %9650 = vst [vmem:[#allocation23_spill] sm:$0xff] %v8541_v42  ;;  %v8548_v43 = vld [vmem:[%s9598_s1 + $0x154] ss:$8 sps:$4 sm:$0xff]   ;;  %v8562_v45 = vld [vmem:[%s9598_s1 + $0x150] ss:$8 sps:$4 sm:$0xff]  }
  0x3b   :  { %v8553_v44 = vld [vmem:[%s9598_s1 + $0x1d4] ss:$8 sps:$4 sm:$0xff]   ;;  %v8567_v46 = vld [vmem:[%s9598_s1 + $0x1d0] ss:$8 sps:$4 sm:$0xff]   ;;  %v8574_v47 = vld [vmem:[%s9598_s1 + $0x144] ss:$8 sps:$4 sm:$0xff]  }
  0x3c   :  { %226 = vmatpush1.bf16.msra.mxu0 %v8432_v23  ;;  %9651 = vst [vmem:[#allocation24_spill] sm:$0xff] %v8553_v44  ;;  %9652 = vst [vmem:[#allocation25_spill] sm:$0xff] %v8567_v46  ;;  %v8579_v48 = vld [vmem:[%s9598_s1 + $0x1c4] ss:$8 sps:$4 sm:$0xff]   ;;  %v8584_v49 = vld [vmem:[%s9598_s1 + $0x140] ss:$8 sps:$4 sm:$0xff]  }
  0x3d   :  { %379 = vmatpush1.bf16.msra.mxu1 %v8439_v24  ;;  %227 = vmatprep.subr.bf16.mxu0 %v8444_v25  ;;  %9653 = vst [vmem:[#allocation26_spill] sm:$0xff] %v8579_v48  ;;  %v8591_v50 = vld [vmem:[%s9598_s1 + $0x1c0] ss:$8 sps:$4 sm:$0xff]   ;;  %v8596_v51 = vld [vmem:[%s9598_s1 + $0x134] ss:$8 sps:$4 sm:$0xff]  }
  0x3e   :  { %380 = vmatprep.subr.bf16.mxu1 %v8451_v26  ;;  %9654 = vst [vmem:[#allocation27_spill] sm:$0xff] %v8591_v50  ;;  %v8603_v52 = vld [vmem:[%s9598_s1 + $0x1b4] ss:$8 sps:$4 sm:$0xff]   ;;  %v8608_v53 = vld [vmem:[%s9598_s1 + $0x130] ss:$8 sps:$4 sm:$0xff]   ;;  %v9672_v26 = vmov 0  }
  0x3f   :  { %9655 = vst [vmem:[#allocation28_spill] sm:$0xff] %v8603_v52  ;;  %v8613_v54 = vld [vmem:[%s9598_s1 + $0x1b0] ss:$8 sps:$4 sm:$0xff]   ;;  %v8620_v55 = vld [vmem:[%s9598_s1 + $0x124] ss:$8 sps:$4 sm:$0xff]  }
  0x40   :  { %228 = vmatpush1.bf16.msra.mxu0 %v8458_v27  ;;  %9656 = vst [vmem:[#allocation29_spill] sm:$0xff] %v8613_v54  ;;  %9657 = vst [vmem:[#allocation30_spill] sm:$0xff] %v8620_v55  ;;  %v8627_v56 = vld [vmem:[%s9598_s1 + $0x1a4] ss:$8 sps:$4 sm:$0xff]   ;;  %v8632_v57 = vld [vmem:[%s9598_s1 + $0x120] ss:$8 sps:$4 sm:$0xff]  }
  0x41   :  { %381 = vmatpush1.bf16.msra.mxu1 %v8463_v28  ;;  %229 = vmatprep.subr.bf16.mxu0 %v8470_v29  ;;  %9658 = vst [vmem:[#allocation31_spill] sm:$0xff] %v8627_v56  ;;  %9659 = vst [vmem:[#allocation32_spill] sm:$0xff] %v8632_v57  ;;  %v8637_v58 = vld [vmem:[%s9598_s1 + $0x1a0] ss:$8 sps:$4 sm:$0xff]   ;;  %v8644_v59 = vld [vmem:[%s9598_s1 + $0x114] ss:$8 sps:$4 sm:$0xff]  }
  0x42   :  { %382 = vmatprep.subr.bf16.mxu1 %v8475_v30  ;;  %9660 = vst [vmem:[#allocation33_spill] sm:$0xff] %v8637_v58  ;;  %9661 = vst [vmem:[#allocation34_spill] sm:$0xff] %v8644_v59  ;;  %v8651_v60 = vld [vmem:[%s9598_s1 + $0x194] ss:$8 sps:$4 sm:$0xff]   ;;  %v8656_v61 = vld [vmem:[%s9598_s1 + $0x110] ss:$8 sps:$4 sm:$0xff]  }
  0x43   :  { %9662 = vst [vmem:[#allocation35_spill] sm:$0xff] %v8651_v60  ;;  %9663 = vst [vmem:[#allocation36_spill] sm:$0xff] %v8656_v61  ;;  %v8661_v62 = vld [vmem:[%s9598_s1 + $0x190] ss:$8 sps:$4 sm:$0xff]   ;;  %v8668_v63 = vld [vmem:[%s9598_s1 + $0x104] ss:$8 sps:$4 sm:$0xff]  }
  0x44   :  { %230 = vmatpush1.bf16.msra.mxu0 %v8482_v31  ;;  %9664 = vst [vmem:[#allocation37_spill] sm:$0xff] %v8661_v62  ;;  %9665 = vst [vmem:[#allocation38_spill] sm:$0xff] %v8668_v63  ;;  %v6300_v30 = vld [vmem:[%s9597_s0 + $0x10] sm:$0xf]  ;;  %vm725_vm0 = vsmask.f32 3328 }
  0x45   :  { %383 = vmatpush1.bf16.msra.mxu1 %v8487_v32  ;;  %521 = vmatprep.subr.bf16.mxu0 %v8494_v33  ;;  %vm726_vm1 = vsmask.f32 7440  ;;  %vm959_vm4 = vsmask.f32 7938  ;;  %vm962_vm6 = vsmask.f32 7954 }
  0x46   :  { %674 = vmatprep.subr.bf16.mxu1 %v8499_v34  ;;  %vm8850_vm2 = vmor %vm725_vm0, %vm726_vm1  ;;  %vm969_vm8 = vsmask.f32 256  ;;  %vm972_vm11 = vsmask.f32 4352  ;;  %vm2706_vm1 = vcmask 1042432  }
  0x47   :  { %248 = vmatmul.mubr.bf16.vlgmr.msra.gmra.mxu0 %v7694_v35  ;;  %v8675_v35 = vld [vmem:[%s9598_s1 + $0x184] ss:$8 sps:$4 sm:$0xff]   ;;  %vm960_vm9 = vmand %vm958_vm3, %vm959_vm4  ;;  %vm2707_vm3 = vcmask 1046532  }
  0x48   :  { %401 = vmatmul.mubr.bf16.vlgmr.msra.gmra.mxu1 %v7695_v36  ;;  %522 = vmatpush1.bf16.msra.mxu0 %v8512_v37  ;;  %9666 = vst [vmem:[#allocation39_spill] sm:$0xff] %v8675_v35  ;;  %v721_v36 = vld [vmem:[%s9597_s0] sm:$0xf]  ;;  %vm963_vm12 = vmand %vm961_vm5, %vm962_vm6  ;;  %vm8211_vm5 = vmmov 0   ;;  %vm3321_vm6 = vsmask.f32 2304 }
  0x49   :  { %675 = vmatpush1.bf16.msra.mxu1 %v8517_v38  ;;  %523 = vmatprep.subr.bf16.mxu0 %v8524_v39  ;;  %vm970_vm13 = vmand %vm968_vm7, %vm969_vm8  ;;  %vm3322_vm7 = vsmask.f32 6416 }
  0x4a   :  { %676 = vmatprep.subr.bf16.mxu1 %v8529_v40  ;;  %553 = vmatprep.mubr.bf16.mxu0 %v9610_v0  ;;  %vm973_vm14 = vmand %vm971_vm10, %vm972_vm11  ;;  %vm3479_vm10 = vcmask 1045508  }
  0x4b   :  { %706 = vmatprep.mubr.bf16.mxu1 %v9610_v0  ;;  %v722_v0 = vld [vmem:[%s9597_s0 + $0x4] sm:$0x1]  ;;  %vm9018_vm15 = vmor %vm963_vm12, %vm960_vm9  ;;  %vm3478_vm9 = vcmask 1041408  }
  0x4c   :  { %524 = vmatpush1.bf16.msra.mxu0 %v8536_v41  ;;  %vm9022_vm0 = vmor %vm973_vm14, %vm970_vm13 }
  0x4d   :  { %677 = vmatpush1.bf16.msra.mxu1 %v8541_v42  ;;  %525 = vmatprep.subr.bf16.mxu0 %v8548_v43  ;;  %vm9060_vm4 = vmor %vm2706_vm1, %vm2707_vm3 }
  0x4e   :  { %678 = vmatprep.subr.bf16.mxu1 %v8553_v44  ;;  %vm9263_vm8 = vmor %vm3321_vm6, %vm3322_vm7 }
  0x4f   :  { %vm9300_vm11 = vmor %vm3478_vm9, %vm3479_vm10 }
  0x50   :  { %526 = vmatpush1.bf16.msra.mxu0 %v8562_v45 }
  0x51   :  { %679 = vmatpush1.bf16.msra.mxu1 %v8567_v46  ;;  %527 = vmatprep.subr.bf16.mxu0 %v8574_v47  ;;  %v8699_v46 = vld [vmem:[%s9598_s1 + $0x180] ss:$8 sps:$4 sm:$0xff]  }
  0x52   :  { %680 = vmatprep.subr.bf16.mxu1 %v8579_v48  ;;  %9668 = vst [vmem:[#allocation41_spill] sm:$0xff] %v8699_v46 }
  0x54   :  { %528 = vmatpush1.bf16.msra.mxu0 %v8584_v49 }
  0x55   :  { %681 = vmatpush1.bf16.msra.mxu1 %v8591_v50  ;;  %529 = vmatprep.subr.bf16.mxu0 %v8596_v51 }
  0x56   :  { %682 = vmatprep.subr.bf16.mxu1 %v8603_v52  ;;  %v8692_v52 = vld [vmem:[%s9598_s1 + $0x100] ss:$8 sps:$4 sm:$0xff]  }
  0x57   :  { %9667 = vst [vmem:[#allocation40_spill] sm:$0xff] %v8692_v52 }
  0x58   :  { %530 = vmatpush1.bf16.msra.mxu0 %v8608_v53 }
  0x59   :  { %683 = vmatpush1.bf16.msra.mxu1 %v8613_v54  ;;  %531 = vmatprep.subr.bf16.mxu0 %v8620_v55  ;;  %v732_v54 = vshll.u32 %v721_v36, 16 }
  0x5a   :  { %684 = vmatprep.subr.bf16.mxu1 %v8627_v56  ;;  %v729_v56 = vshrl.u32 %v721_v36, 16  ;;  %v7744_v36 = vld [vmem:[%s9597_s0 + $0x20] ss:$8 sps:$4 sm:$0xff]  }
  0x5b   :  { %v734_v42 = vrot.slane %v732_v54, 5  ;;  %v1298_v54 = vld [vmem:[%s9597_s0] sm:$0xf] }
  0x5c   :  { %532 = vmatpush1.bf16.msra.mxu0 %v8632_v57  ;;  %v731_v44 = vrot.slane %v729_v56, 4  ;;  %v7745_v56 = vld [vmem:[%s9597_s0 + $0x30] ss:$8 sps:$4 sm:$0xff]  }
  0x5d   :  { %685 = vmatpush1.bf16.msra.mxu1 %v8637_v58  ;;  %533 = vmatprep.subr.bf16.mxu0 %v8644_v59  ;;  %v723_v58 = vld [vmem:[%s9597_s0 + $0x8] sm:$0xf] }
  0x5e   :  { %686 = vmatprep.subr.bf16.mxu1 %v8651_v60  ;;  %v724_v60 = vld [vmem:[%s9597_s0 + $0xc] sm:$0x1]  ;;  %v743_v50 = vshrl.u32 %v723_v58, 16  ;;  %v746_v48 = vshll.u32 %v723_v58, 16  ;;  %v8709_v58 = vld [vmem:[%s9598_s1 + $0x274] ss:$8 sps:$4 sm:$0xff]   ;;  %v735_v32 = vor.u32 %v734_v42, %v731_v44 }
  0x5f   :  { %9669 = vst [vmem:[#allocation42_spill] sm:$0xff] %v8709_v58  ;;  %v752_v40 = vshll.u32 %v724_v60, 16  ;;  %v1303_v60 = vshrl.u32 %v1298_v54, 16 }
  0x60   :  { %534 = vmatpush1.bf16.msra.mxu0 %v8656_v61  ;;  %v745_v38 = vrot.slane %v743_v50, 4  ;;  %v748_v34 = vrot.slane %v746_v48, 5  ;;  %v8730_v48 = vld [vmem:[%s9598_s1 + $0x264] ss:$8 sps:$4 sm:$0xff]   ;;  %v8747_v61 = vld [vmem:[%s9598_s1 + $0x260] ss:$8 sps:$4 sm:$0xff]  }
  0x61   :  { %687 = vmatpush1.bf16.msra.mxu1 %v8661_v62  ;;  %535 = vmatprep.subr.bf16.mxu0 %v8668_v63  ;;  %v738_v62 = vshll.u32 %v722_v0, 16  ;;  %v1300_v0 = vld [vmem:[%s9597_s0 + $0x8] sm:$0xf]  ;;  %9671 = vst [vmem:[#allocation44_spill] sm:$0xff] %v8730_v48  ;;  %v1299_v50 = vld [vmem:[%s9597_s0 + $0x4] sm:$0x1] }
  0x62   :  { %688 = vmatprep.subr.bf16.mxu1 %v8675_v35  ;;  %v8720_v35 = vld [vmem:[%s9598_s1 + $0x270] ss:$8 sps:$4 sm:$0xff]   ;;  %v1306_v63 = vshll.u32 %v1298_v54, 16  ;;  %v8739_v44 = vrot.slane %v752_v40, 5  ;;  %v749_v54 = vor.u32 %v748_v34, %v745_v38  ;;  %v8760_v28 = vrot.slane %v735_v32, 4 }
  0x63   :  { %9670 = vst [vmem:[#allocation43_spill] sm:$0xff] %v8720_v35  ;;  %v8737_v42 = vrot.slane %v738_v62, 5  ;;  %v1305_v62 = vrot.slane %v1303_v60, 4  ;;  %v6302_v40 = vld [vmem:[%s9597_s0 + $0x18] sm:$0xf]  ;;  %v1312_v34 = vshll.u32 %v1299_v50, 16 }
  0x64   :  { %536 = vmatpush1.bf16.msra.mxu0 %v8692_v52  ;;  %v1320_v52 = vshll.u32 %v1300_v0, 16  ;;  %v1485_v60 = vshll.u32 %v6300_v30, 16  ;;  %v1499_v50 = vshll.u32 %v6302_v40, 16 }
  0x65   :  { %689 = vmatpush1.bf16.msra.mxu1 %v8699_v46  ;;  %857 = vmatprep.subr.bf16.mxu0 %v8709_v58  ;;  %v1317_v46 = vshrl.u32 %v1300_v0, 16  ;;  %v1308_v58 = vrot.slane %v1306_v63, 5  ;;  %v8758_v0 = vld [vmem:[%s9598_s1 + $0x254] ss:$8 sps:$4 sm:$0xff]  }
  0x66   :  { %1100 = vmatprep.subr.bf16.mxu1 %v8304_v1  ;;  %v1301_v1 = vld [vmem:[%s9597_s0 + $0xc] sm:$0x1]  ;;  %v1322_v59 = vrot.slane %v1320_v52, 5  ;;  %v6301_v63 = vld [vmem:[%s9597_s0 + $0x14] sm:$0x1]  ;;  %v1496_v52 = vshrl.u32 %v6302_v40, 16 }
  0x67   :  { %554 = vmatmul.mubr.bf16.vlgmr.msra.gmra.mxu0 %v7744_v36  ;;  %v1319_v38 = vrot.slane %v1317_v46, 4  ;;  %v6303_v36 = vld [vmem:[%s9597_s0 + $0x1c] sm:$0x1]  ;;  %v1309_v32 = vor.u32 %v1308_v58, %v1305_v62  ;;  %v1326_v46 = vshll.u32 %v1301_v1, 16  ;;  %v1487_v1 = vrot.slane %v1485_v60, 5 }
  0x68   :  { %707 = vmatmul.mubr.bf16.vlgmr.msra.gmra.mxu1 %v7745_v56  ;;  %858 = vmatpush1.bf16.msra.mxu0 %v8720_v35  ;;  %v1482_v56 = vshrl.u32 %v6300_v30, 16  ;;  %v8778_v35 = vld [vmem:[%s9598_s1 + $0x250] ss:$8 sps:$4 sm:$0xff]   ;;  %v6338_v62 = vld [vmem:[%s9597_s0 + $0x24] sm:$0x1]  ;;  %v1498_v57 = vrot.slane %v1496_v52, 4 }
  0x69   :  { %1101 = vmatpush1.bf16.msra.mxu1 %v8315_v3  ;;  %859 = vmatprep.subr.bf16.mxu0 %v8730_v48  ;;  %v6337_v3 = vld [vmem:[%s9597_s0 + $0x20] sm:$0xf]  ;;  %v1323_v30 = vor.u32 %v1322_v59, %v1319_v38  ;;  %v8790_v40 = vld [vmem:[%s9598_s1 + $0x244] ss:$8 sps:$4 sm:$0xff]   ;;  %v1491_v48 = vshll.u32 %v6301_v63, 16  ;;  %v1501_v24 = vrot.slane %v1499_v50, 5 }
  0x6a   :  { %1102 = vmatprep.subr.bf16.mxu1 %v8326_v5  ;;  %889 = vmatprep.mubr.bf16.mxu0 %v9672_v26  ;;  %v8782_v5 = vrot.slane %v749_v54, 4  ;;  %v1484_v58 = vrot.slane %v1482_v56, 4  ;;  %v1505_v55 = vshll.u32 %v6303_v36, 16  ;;  %v6339_v54 = vld [vmem:[%s9597_s0 + $0x28] sm:$0xf]  ;;  %v8797_v59 = vrot.slane %v1312_v34, 5 }
  0x6b   :  { %1132 = vmatprep.mubr.bf16.mxu1 %v9672_v26  ;;  %v1661_v56 = vshrl.u32 %v6337_v3, 16  ;;  %v8801_v63 = vrot.slane %v1309_v32, 4  ;;  %v8803_v60 = vrot.slane %v1326_v46, 5  ;;  %v8808_v36 = vld [vmem:[%s9598_s1 + $0x240] ss:$8 sps:$4 sm:$0xff]   ;;  %v8810_v52 = vrot.slane %v1323_v30, 4 }
  0x6c   :  { %860 = vmatpush1.bf16.msra.mxu0 %v8747_v61  ;;  %v1488_v38 = vor.u32 %v1487_v1, %v1484_v58  ;;  %v6340_v34 = vld [vmem:[%s9597_s0 + $0x2c] sm:$0x1]  ;;  %v1664_v50 = vshll.u32 %v6337_v3, 16  ;;  %v8820_v32 = vrot.slane %v1491_v48, 5  ;;  %v8822_v46 = vrot.slane %v1505_v55, 5 }
  0x6d   :  { %1103 = vmatpush1.bf16.msra.mxu1 %v8338_v7  ;;  %861 = vmatprep.subr.bf16.mxu0 %v8758_v0  ;;  %v1502_v7 = vor.u32 %v1501_v24, %v1498_v57  ;;  %v1670_v58 = vshll.u32 %v6338_v62, 16  ;;  %v1675_v1 = vshrl.u32 %v6339_v54, 16  ;;  %v1663_v57 = vrot.slane %v1661_v56, 4  ;;  %v8833_v55 = vld [vmem:[%s9598_s1 + $0x230] ss:$8 sps:$4 sm:$0xff]  }
  0x6e   :  { %1104 = vmatprep.subr.bf16.mxu1 %v8350_v9  ;;  %v8818_v9 = vld [vmem:[%s9598_s1 + $0x234] ss:$8 sps:$4 sm:$0xff]   ;;  %v8826_v24 = vrot.slane %v1488_v38, 4  ;;  %v1678_v3 = vshll.u32 %v6339_v54, 16  ;;  %v1684_v30 = vshll.u32 %v6340_v34, 16  ;;  %v1666_v62 = vrot.slane %v1664_v50, 5 }
  0x6f   :  { %v8835_v48 = vrot.slane %v1502_v7, 4  ;;  %v8842_v38 = vrot.slane %v1670_v58, 5  ;;  %v1677_v56 = vrot.slane %v1675_v1, 4  ;;  %v8859_v34 = vld [vmem:[%s9598_s1 + $0x220] ss:$8 sps:$4 sm:$0xff]  }
  0x70   :  { %862 = vmatpush1.bf16.msra.mxu0 %v8778_v35  ;;  %v1680_v54 = vrot.slane %v1678_v3, 5  ;;  %v8854_v7 = vrot.slane %v1684_v30, 5  ;;  %v8878_v50 = vld [vmem:[%s9598_s1 + $0x204] ss:$8 sps:$4 sm:$0xff]   ;;  %v1667_v58 = vor.u32 %v1666_v62, %v1663_v57  ;;  %v9704_v3 = vld [vmem:[#allocation41_spill] sm:$0xff] }
  0x71   :  { %1105 = vmatpush1.bf16.msra.mxu1 %v8360_v11  ;;  %863 = vmatprep.subr.bf16.mxu0 %v8790_v40  ;;  %v8840_v11 = vld [vmem:[%s9598_s1 + $0x224] ss:$8 sps:$4 sm:$0xff]   ;;  %v7773_v30 = vld [vmem:[#allocation5 + $0x38] sm:$0xff]  }
  0x72   :  { %1106 = vmatprep.subr.bf16.mxu1 %v8372_v13  ;;  %v7776_v62 = vld [vmem:[#allocation5 + $0x68] sm:$0xff]  }
  0x73   :  { %v7917_v13 = vld [vmem:[#allocation8 + $0xe8] sm:$0xff]  }
  0x74   :  { %864 = vmatpush1.bf16.msra.mxu0 %v8808_v36 }
  0x75   :  { %1107 = vmatpush1.bf16.msra.mxu1 %v8384_v15  ;;  %865 = vmatprep.subr.bf16.mxu0 %v8818_v9  ;;  %v8864_v15 = vld [vmem:[%s9598_s1 + $0x214] ss:$8 sps:$4 sm:$0xff]  }
  0x76   :  { %1108 = vmatprep.subr.bf16.mxu1 %v8396_v17  ;;  %v8873_v17 = vld [vmem:[%s9598_s1 + $0x210] ss:$8 sps:$4 sm:$0xff]  }
  0x78   :  { %866 = vmatpush1.bf16.msra.mxu0 %v8833_v55 }
  0x79   :  { %1109 = vmatpush1.bf16.msra.mxu1 %v8408_v19  ;;  %867 = vmatprep.subr.bf16.mxu0 %v8840_v11  ;;  %v8887_v19 = vld [vmem:[%s9598_s1 + $0x200] ss:$8 sps:$4 sm:$0xff]  }
  0x7a   :  { %1110 = vmatprep.subr.bf16.mxu1 %v8420_v21  ;;  %v741_v21 = vsel %vm8850_vm2, %v8760_v28, %v8737_v42  ;;  %v8908_v28 = vrot.slane %v1667_v58, 4  ;;  %v7807_v58 = vld [vmem:[#allocation5 + $0xb8] sm:$0xff]  }
  0x7c   :  { %868 = vmatpush1.bf16.msra.mxu0 %v8859_v34 }
  0x7d   :  { %1111 = vmatpush1.bf16.msra.mxu1 %v8432_v23  ;;  %869 = vmatprep.subr.bf16.mxu0 %v8864_v15  ;;  %v755_v23 = vsel %vm8850_vm2, %v8782_v5, %v8739_v44  ;;  %v9694_v44 = vld [vmem:[#allocation25_spill] sm:$0xff]  ;;  %v9695_v5 = vld [vmem:[#allocation26_spill] sm:$0xff] }
  0x7e   :  { %1112 = vmatprep.subr.bf16.mxu1 %v8444_v25  ;;  %v7770_v25 = vld [vmem:[%s9597_s0 + $0x20] ss:$8 sps:$4 sm:$0xff]   ;;  %v6194_v1 = vcombine.low %v741_v21, %v755_v23  ;;  %v7788_v23 = vld [vmem:[#allocation5 + $0x178] sm:$0xff]  }
  0x7f   :  { %v7787_v21 = vld [vmem:[#allocation5] sm:$0xff]  }
  0x80   :  { %870 = vmatpush1.bf16.msra.mxu0 %v8873_v17 }
  0x81   :  { %1113 = vmatpush1.bf16.msra.mxu1 %v8458_v27  ;;  %871 = vmatprep.subr.bf16.mxu0 %v8878_v50  ;;  %v1681_v27 = vor.u32 %v1680_v54, %v1677_v56  ;;  %v7779_v56 = vld [vmem:[#allocation5 + $0x20] sm:$0xff]   ;;  %v7780_v54 = vld [vmem:[#allocation5 + $0x58] sm:$0xff]  }
  0x82   :  { %1114 = vmatprep.subr.bf16.mxu1 %v8470_v29  ;;  %v7771_v29 = vld [vmem:[%s9597_s0 + $0x30] ss:$8 sps:$4 sm:$0xff]  }
  0x83   :  { %v8910_v42 = vrot.slane %v1681_v27, 4  ;;  %v7810_v27 = vld [vmem:[#allocation5 + $0xf0] sm:$0xff]  }
  0x84   :  { %872 = vmatpush1.bf16.msra.mxu0 %v8887_v19 }
  0x85   :  { %1115 = vmatpush1.bf16.msra.mxu1 %v8482_v31  ;;  %1251 = vmatprep.subr.bf16.mxu0 %v8309_v2  ;;  %v9675_v2 = vld [vmem:[#allocation30_spill] sm:$0xff] }
  0x86   :  { %1430 = vmatprep.subr.bf16.mxu1 %v8494_v33  ;;  %v9684_v33 = vld [vmem:[#allocation19_spill] sm:$0xff] }
  0x87   :  { %890 = vmatmul.mubr.bf16.vlgmr.msra.gmra.mxu0 %v6194_v1  ;;  %v7811_v1 = vld [vmem:[#allocation5 + $0xb0] sm:$0xff]  }
  0x88   :  { %1133 = vmatmul.mubr.bf16.vlgmr.msra.gmra.mxu1 %v7770_v25  ;;  %1252 = vmatpush1.bf16.msra.mxu0 %v8320_v4  ;;  %v9676_v4 = vld [vmem:[#allocation15_spill] sm:$0xff]  ;;  %v7806_v25 = vld [vmem:[#allocation5 + $0xf8] sm:$0xff]  }
  0x89   :  { %1431 = vmatpush1.bf16.msra.mxu1 %v8512_v37  ;;  %1253 = vmatprep.subr.bf16.mxu0 %v8333_v6  ;;  %v9677_v6 = vld [vmem:[#allocation32_spill] sm:$0xff] }
  0x8a   :  { %1432 = vmatprep.subr.bf16.mxu1 %v8524_v39  ;;  %1283 = vmatprep.mubr.bf16.mxu0 %v9672_v26  ;;  %v9685_v37 = vld [vmem:[#allocation40_spill] sm:$0xff] }
  0x8b   :  { %1462 = vmatprep.mubr.bf16.mxu1 %v9672_v26  ;;  %v9686_v39 = vld [vmem:[#allocation20_spill] sm:$0xff] }
  0x8c   :  { %1254 = vmatpush1.bf16.msra.mxu0 %v8344_v8  ;;  %v9678_v8 = vld [vmem:[#allocation16_spill] sm:$0xff] }
  0x8d   :  { %1433 = vmatpush1.bf16.msra.mxu1 %v8536_v41  ;;  %1255 = vmatprep.subr.bf16.mxu0 %v8355_v10  ;;  %v9679_v10 = vld [vmem:[#allocation34_spill] sm:$0xff] }
  0x8e   :  { %1434 = vmatprep.subr.bf16.mxu1 %v8548_v43  ;;  %v9687_v41 = vld [vmem:[#allocation42_spill] sm:$0xff]  ;;  %v9688_v43 = vld [vmem:[#allocation21_spill] sm:$0xff] }
  0x90   :  { %1256 = vmatpush1.bf16.msra.mxu0 %v8365_v12  ;;  %v9680_v12 = vld [vmem:[#allocation17_spill] sm:$0xff] }
  0x91   :  { %1435 = vmatpush1.bf16.msra.mxu1 %v8562_v45  ;;  %1257 = vmatprep.subr.bf16.mxu0 %v8379_v14  ;;  %v9681_v14 = vld [vmem:[#allocation36_spill] sm:$0xff]  ;;  %v9689_v45 = vld [vmem:[#allocation43_spill] sm:$0xff] }
  0x92   :  { %1436 = vmatprep.subr.bf16.mxu1 %v8574_v47  ;;  %v9690_v47 = vld [vmem:[#allocation22_spill] sm:$0xff] }
  0x94   :  { %1258 = vmatpush1.bf16.msra.mxu0 %v8391_v16  ;;  %v1315_v16 = vsel %vm8850_vm2, %v8801_v63, %v8797_v59  ;;  %v9696_v59 = vld [vmem:[#allocation27_spill] sm:$0xff]  ;;  %v1494_v63 = vsel %vm8850_vm2, %v8826_v24, %v8820_v32 }
  0x95   :  { %1437 = vmatpush1.bf16.msra.mxu1 %v8584_v49  ;;  %1259 = vmatprep.subr.bf16.mxu0 %v8403_v18  ;;  %v1329_v18 = vsel %vm8850_vm2, %v8810_v52, %v8803_v60  ;;  %v9691_v49 = vld [vmem:[#allocation44_spill] sm:$0xff]  ;;  %v9702_v60 = vld [vmem:[#allocation37_spill] sm:$0xff]  ;;  %v1673_v52 = vsel %vm8850_vm2, %v8908_v28, %v8842_v38  ;;  %v9703_v32 = vld [vmem:[#allocation39_spill] sm:$0xff] }
  0x96   :  { %1438 = vmatprep.subr.bf16.mxu1 %v8596_v51  ;;  %v6283_v31 = vcombine.low %v1315_v16, %v1329_v18  ;;  %v9692_v51 = vld [vmem:[#allocation23_spill] sm:$0xff] }
  0x97   :  { %v7778_v38 = vld [vmem:[#allocation5 + $0x60] sm:$0xff]   ;;  %v7814_v28 = vld [vmem:[#allocation5 + $0xe8] sm:$0xff]  }
  0x98   :  { %1260 = vmatpush1.bf16.msra.mxu0 %v8413_v20  ;;  %v9682_v20 = vld [vmem:[#allocation18_spill] sm:$0xff] }
  0x99   :  { %1439 = vmatpush1.bf16.msra.mxu1 %v8608_v53  ;;  %1261 = vmatprep.subr.bf16.mxu0 %v8427_v22  ;;  %v9683_v22 = vld [vmem:[#allocation38_spill] sm:$0xff]  ;;  %v9693_v53 = vld [vmem:[#allocation24_spill] sm:$0xff] }
  0x9a   :  { %1440 = vmatprep.subr.bf16.mxu1 %v9675_v2  ;;  %v7818_v2 = vld [vmem:[#allocation5 + $0xe0] sm:$0xff]  }
  0x9c   :  { %1262 = vmatpush1.bf16.msra.mxu0 %v9676_v4 }
  0x9d   :  { %1441 = vmatpush1.bf16.msra.mxu1 %v9677_v6  ;;  %1263 = vmatprep.subr.bf16.mxu0 %v9678_v8  ;;  %v7819_v6 = vld [vmem:[#allocation5 + $0xa0] sm:$0xff]   ;;  %v101_v8 = vlaneseq }
  0x9e   :  { %1442 = vmatprep.subr.bf16.mxu1 %v9679_v10  ;;  %v7822_v10 = vld [vmem:[#allocation5 + $0xd8] sm:$0xff]  }
  0x9f   :  { %v9005_v16 = vshrl.u32 %v101_v8, 7 }
  0xa0   :  { %1264 = vmatpush1.bf16.msra.mxu0 %v9680_v12 }
  0xa1   :  { %1443 = vmatpush1.bf16.msra.mxu1 %v9681_v14  ;;  %1265 = vmatprep.subr.bf16.mxu0 %v9682_v20  ;;  %v7823_v14 = vld [vmem:[#allocation5 + $0x98] sm:$0xff]   ;;  %v7826_v20 = vld [vmem:[#allocation5 + $0xd0] sm:$0xff]  }
  0xa2   :  { %1444 = vmatprep.subr.bf16.mxu1 %v9683_v22 }
  0xa4   :  { %1266 = vmatpush1.bf16.msra.mxu0 %v9684_v33  ;;  %v99_v33 = vld [vmem:[%s9603_s6] sm:$0x3] }
  0xa5   :  { %1445 = vmatpush1.bf16.msra.mxu1 %v9685_v37  ;;  %1609 = vmatprep.subr.bf16.mxu0 %v9686_v39  ;;  %v107_v39 = vsub.s32 1, %v9005_v16 }
  0xa6   :  { %1788 = vmatprep.subr.bf16.mxu1 %v9687_v41  ;;  %v7830_v41 = vld [vmem:[#allocation5 + $0xc8] sm:$0xff]  }
  0xa7   :  { %1284 = vmatmul.mubr.bf16.vlgmr.msra.gmra.mxu0 %v7771_v29  ;;  %v7827_v29 = vld [vmem:[#allocation5 + $0x90] sm:$0xff]  }
  0xa8   :  { %1463 = vmatmul.mubr.bf16.vlgmr.msra.gmra.mxu1 %v6283_v31  ;;  %1610 = vmatpush1.bf16.msra.mxu0 %v9688_v43  ;;  %v103_v31 = vsub.s32 0, %v9005_v16 }
  0xa9   :  { %1789 = vmatpush1.bf16.msra.mxu1 %v9689_v45  ;;  %1611 = vmatprep.subr.bf16.mxu0 %v9690_v47  ;;  %v7831_v45 = vld [vmem:[#allocation5 + $0x88] sm:$0xff]  }
  0xaa   :  { %1790 = vmatprep.subr.bf16.mxu1 %v9691_v49  ;;  %1641 = vmatprep.mubr.bf16.mxu0 %v9672_v26  ;;  %v104_v47 = vrot.slane %v99_v33, %v103_v31 }
  0xab   :  { %1820 = vmatprep.mubr.bf16.mxu1 %v9672_v26  ;;  %v9697_v26 = vld [vmem:[#allocation28_spill] sm:$0xff] }
  0xac   :  { %1612 = vmatpush1.bf16.msra.mxu0 %v9692_v51 }
  0xad   :  { %1791 = vmatpush1.bf16.msra.mxu1 %v8747_v61  ;;  %1613 = vmatprep.subr.bf16.mxu0 %v9693_v53  ;;  %v9698_v61 = vld [vmem:[#allocation29_spill] sm:$0xff]  ;;  %v108_v53 = vrot.slane %v99_v33, %v107_v39 }
  0xae   :  { %1792 = vmatprep.subr.bf16.mxu1 %v8758_v0  ;;  %v9699_v0 = vld [vmem:[#allocation31_spill] sm:$0xff] }
  0xb0   :  { %1614 = vmatpush1.bf16.msra.mxu0 %v9694_v44  ;;  %v7834_v44 = vld [vmem:[#allocation5 + $0xc0] sm:$0xff]  }
  0xb1   :  { %1793 = vmatpush1.bf16.msra.mxu1 %v8778_v35  ;;  %1615 = vmatprep.subr.bf16.mxu0 %v9695_v5  ;;  %v9700_v35 = vld [vmem:[#allocation33_spill] sm:$0xff]  ;;  %v7835_v5 = vld [vmem:[#allocation5 + $0x80] sm:$0xff]  }
  0xb2   :  { %1794 = vmatprep.subr.bf16.mxu1 %v8790_v40  ;;  %v9701_v40 = vld [vmem:[#allocation35_spill] sm:$0xff] }
  0xb4   :  { %1616 = vmatpush1.bf16.msra.mxu0 %v9696_v59 }
  0xb5   :  { %1795 = vmatpush1.bf16.msra.mxu1 %v8808_v36  ;;  %1617 = vmatprep.subr.bf16.mxu0 %v9697_v26  ;;  %v1508_v36 = vsel %vm8850_vm2, %v8835_v48, %v8822_v46  ;;  %v7772_v46 = vld [vmem:[#allocation5 + $0x78] sm:$0xff]   ;;  %v7775_v48 = vld [vmem:[#allocation5 + $0x30] sm:$0xff]  }
  0xb6   :  { %1796 = vmatprep.subr.bf16.mxu1 %v8818_v9  ;;  %v1687_v9 = vsel %vm8850_vm2, %v8910_v42, %v8854_v7  ;;  %v6320_v24 = vcombine.low %v1494_v63, %v1508_v36  ;;  %v7781_v7 = vld [vmem:[#allocation5 + $0x18] sm:$0xff]   ;;  %v7815_v42 = vld [vmem:[#allocation5 + $0xa8] sm:$0xff]  }
  0xb7   :  { %v6357_v57 = vcombine.low %v1673_v52, %v1687_v9 }
  0xb8   :  { %1618 = vmatpush1.bf16.msra.mxu0 %v9698_v61 }
  0xb9   :  { %1797 = vmatpush1.bf16.msra.mxu1 %v8833_v55  ;;  %1619 = vmatprep.subr.bf16.mxu0 %v9699_v0  ;;  %v7774_v55 = vld [vmem:[#allocation5 + $0x70] sm:$0xff]  }
  0xba   :  { %1798 = vmatprep.subr.bf16.mxu1 %v8840_v11  ;;  %v7777_v11 = vld [vmem:[#allocation5 + $0x28] sm:$0xff]  }
  0xbc   :  { %1620 = vmatpush1.bf16.msra.mxu0 %v9700_v35  ;;  %v7836_v35 = vld [vmem:[#allocation5 + $0x1f8] sm:$0xff]  }
  0xbd   :  { %1799 = vmatpush1.bf16.msra.mxu1 %v8859_v34  ;;  %1621 = vmatprep.subr.bf16.mxu0 %v9701_v40  ;;  %v7782_v34 = vld [vmem:[#allocation5 + $0x50] sm:$0xff]  }
  0xbe   :  { %1800 = vmatprep.subr.bf16.mxu1 %v8864_v15  ;;  %v7783_v15 = vld [vmem:[#allocation5 + $0x10] sm:$0xff]  }
  0xc0   :  { %1622 = vmatpush1.bf16.msra.mxu0 %v9702_v60 }
  0xc1   :  { %1801 = vmatpush1.bf16.msra.mxu1 %v8873_v17  ;;  %1623 = vmatprep.subr.bf16.mxu0 %v9703_v32  ;;  %v7784_v17 = vld [vmem:[#allocation5 + $0x48] sm:$0xff]  }
  0xc2   :  { %1802 = vmatprep.subr.bf16.mxu1 %v8878_v50  ;;  %v7785_v50 = vld [vmem:[#allocation5 + $0x8] sm:$0xff]  }
  0xc4   :  { %1624 = vmatpush1.bf16.msra.mxu0 %v9704_v3 }
  0xc5   :  { %1803 = vmatpush1.bf16.msra.mxu1 %v8887_v19  ;;  %6773 = vmatprep.subr.bf16.mxu0 %v7772_v46  ;;  %v7786_v19 = vld [vmem:[#allocation5 + $0x40] sm:$0xff]  }
  0xc6   :  { %6795 = vmatprep.subr.bf16.mxu1 %v7806_v25 }
  0xc7   :  { %1642 = vmatmul.mubr.bf16.vlgmr.msra.gmra.mxu0 %v6320_v24 }
  0xc8   :  { %1821 = vmatmul.mubr.bf16.vlgmr.msra.gmra.mxu1 %v6357_v57  ;;  %6774 = vmatpush3.bf16.msra.mxu0 %v7773_v30 }
  0xc9   :  { %6775 = vmatprep.subr.bf16.mxu0 %v7774_v55  ;;  %6796 = vmatpush3.bf16.msra.mxu1 %v7807_v58 }
  0xca   :  { %6797 = vmatprep.subr.bf16.mxu1 %v7810_v27 }
  0xcc   :  { %6776 = vmatpush3.bf16.msra.mxu0 %v7775_v48 }
  0xcd   :  { %6777 = vmatprep.subr.bf16.mxu0 %v7776_v62  ;;  %6798 = vmatpush3.bf16.msra.mxu1 %v7811_v1 }
  0xce   :  { %6799 = vmatprep.subr.bf16.mxu1 %v7814_v28 }
  0xd0   :  { %6778 = vmatpush3.bf16.msra.mxu0 %v7777_v11 }
  0xd1   :  { %6779 = vmatprep.subr.bf16.mxu0 %v7778_v38  ;;  %6800 = vmatpush3.bf16.msra.mxu1 %v7815_v42 }
  0xd2   :  { %6801 = vmatprep.subr.bf16.mxu1 %v7818_v2 }
  0xd4   :  { %6780 = vmatpush3.bf16.msra.mxu0 %v7779_v56 }
  0xd5   :  { %6781 = vmatprep.subr.bf16.mxu0 %v7780_v54  ;;  %6802 = vmatpush3.bf16.msra.mxu1 %v7819_v6 }
  0xd6   :  { %6803 = vmatprep.subr.bf16.mxu1 %v7822_v10 }
  0xd8   :  { %6782 = vmatpush3.bf16.msra.mxu0 %v7781_v7 }
  0xd9   :  { %6783 = vmatprep.subr.bf16.mxu0 %v7782_v34  ;;  %6804 = vmatpush3.bf16.msra.mxu1 %v7823_v14 }
  0xda   :  { %6805 = vmatprep.subr.bf16.mxu1 %v7826_v20 }
  0xdc   :  { %6784 = vmatpush3.bf16.msra.mxu0 %v7783_v15 }
  0xdd   :  { %6785 = vmatprep.subr.bf16.mxu0 %v7784_v17  ;;  %6806 = vmatpush3.bf16.msra.mxu1 %v7827_v29 }
  0xde   :  { %6807 = vmatprep.subr.bf16.mxu1 %v7830_v41 }
  0xe0   :  { %6786 = vmatpush3.bf16.msra.mxu0 %v7785_v50 }
  0xe1   :  { %6787 = vmatprep.subr.bf16.mxu0 %v7786_v19  ;;  %6808 = vmatpush3.bf16.msra.mxu1 %v7831_v45 }
  0xe2   :  { %6809 = vmatprep.subr.bf16.mxu1 %v7834_v44 }
  0xe4   :  { %6788 = vmatpush3.bf16.msra.mxu0 %v7787_v21 }
  0xe5   :  { %6817 = vmatprep.subr.bf16.mxu0 %v7788_v23  ;;  %6810 = vmatpush3.bf16.msra.mxu1 %v7835_v5 }
  0xe6   :  { %6839 = vmatprep.subr.bf16.mxu1 %v7836_v35 }
 0x107   :  { %v249_v4 = vpop.f32.mrf.mxu0 }
 0x108   :  { %v402_v18 = vpop.f32.mrf.mxu1  ;;  %v258_v59 = vadd.f32 %v249_v4, %v104_v47 }
 0x109   :  { %v251_v12 = vpop.f32.mrf.mxu0 }
 0x10a   :  { %v404_v37 = vpop.f32.mrf.mxu1  ;;  %v259_v0 = vadd.f32 %v251_v12, %v108_v53  ;;  %v411_v63 = vadd.f32 %v402_v18, %v258_v59 }
 0x10b   :  { %v253_v22 = vpop.f32.mrf.mxu0 }
 0x10c   :  { %v406_v49 = vpop.f32.mrf.mxu1  ;;  %v260_v60 = vadd.f32 %v253_v22, %v104_v47  ;;  %v412_v52 = vadd.f32 %v404_v37, %v259_v0 }
 0x10d   :  { %v255_v43 = vpop.f32.mrf.mxu0 }
 0x10e   :  { %v408_v26 = vpop.f32.mrf.mxu1  ;;  %v261_v9 = vadd.f32 %v255_v43, %v108_v53  ;;  %v413_v57 = vadd.f32 %v406_v49, %v260_v60 }
 0x110   :  { %v414_v30 = vadd.f32 %v408_v26, %v261_v9  ;;  %v7839_v26 = vld [vmem:[#allocation5 + $0x1b0] sm:$0xff]  }
 0x127   :  { %v555_v51 = vpop.f32.mrf.mxu0 }
 0x128   :  { %v708_v40 = vpop.f32.mrf.mxu1  ;;  %v564_v32 = vadd.f32 %v555_v51, %v411_v63 }
 0x129   :  { %v557_v61 = vpop.f32.mrf.mxu0 }
 0x12a   :  { %v710_v24 = vpop.f32.mrf.mxu1  ;;  %v565_v3 = vadd.f32 %v557_v61, %v412_v52  ;;  %v717_v55 = vadd.f32 %v708_v40, %v564_v32  ;;  %v975_v61 = vld [vmem:[#allocation2] sm:$0x11]  ;;  %v981_v32 = vld [vmem:[#allocation2 + $0x10] sm:$0x11] }
 0x12b   :  { %v559_v36 = vpop.f32.mrf.mxu0 }
 0x12c   :  { %v566_v48 = vadd.f32 %v559_v36, %v413_v57  ;;  %v712_v62 = vpop.f32.mrf.mxu1  ;;  %v718_v38 = vadd.f32 %v710_v24, %v565_v3 }
 0x12d   :  { %v561_v46 = vpop.f32.mrf.mxu0 }
 0x12e   :  { %v567_v56 = vadd.f32 %v561_v46, %v414_v30  ;;  %v719_v34 = vadd.f32 %v712_v62, %v566_v48  ;;  %v714_v50 = vpop.f32.mrf.mxu1  ;;  %v984_v46 = vld [vmem:[%s9603_s6] sm:$0x3] }
 0x130   :  { %v720_v21 = vadd.f32 %v714_v50, %v567_v56 }
 0x147   :  { %v891_v11 = vpop.f32.mrf.mxu0 }
 0x148   :  { %v900_v54 = vadd.f32 %v891_v11, %v717_v55  ;;  %v9016_v33 = vpop.f32.mrf.mxu1 }
 0x149   :  { %v893_v7 = vpop.f32.mrf.mxu0 }
 0x14a   :  { %v904_v15 = vsub.f32 0.0, %v900_v54  ;;  %v901_v17 = vadd.f32 %v893_v7, %v718_v38  ;;  %v1136_v45 = vpop.f32.mrf.mxu1  ;;  %v7789_v7 = vld [vmem:[#allocation5 + $0x138] sm:$0xff]  }
 0x14b   :  { %v895_v19 = vpop.f32.mrf.mxu0 }
 0x14c   :  { %v908_v23 = vmul.f32 1.442695, %v904_v15  ;;  %v905_v25 = vsub.f32 0.0, %v901_v17  ;;  %v902_v58 = vadd.f32 %v895_v19, %v719_v34  ;;  %v1138_v0 = vpop.f32.mrf.mxu1  ;;  %v989_v15 = vrot.slane %v984_v46, %v103_v31  ;;  %v7790_v17 = vld [vmem:[#allocation5 + $0x170] sm:$0xff]  }
 0x14d   :  { %v897_v27 = vpop.f32.mrf.mxu0 }
 0x14e   :  { %8062 = vpow2.f32 %v908_v23  ;;  %v910_v1 = vmul.f32 1.442695, %v905_v25  ;;  %v906_v28 = vsub.f32 0.0, %v902_v58  ;;  %v903_v42 = vadd.f32 %v897_v27, %v720_v21  ;;  %v1140_v24 = vpop.f32.mrf.mxu1 }
 0x14f   :  { %v993_v27 = vrot.slane %v984_v46, %v107_v39  ;;  %v1143_v31 = vadd.f32 %v9016_v33, %v989_v15  ;;  %v7793_v39 = vld [vmem:[#allocation5 + $0x128] sm:$0xff]  }
 0x150   :  { %8064 = vpow2.f32 %v910_v1  ;;  %v912_v2 = vmul.f32 1.442695, %v906_v28  ;;  %v907_v4 = vsub.f32 0.0, %v903_v42  ;;  %v7791_v42 = vld [vmem:[#allocation5 + $0x130] sm:$0xff]  }
 0x152   :  { %8066 = vpow2.f32 %v912_v2  ;;  %v914_v6 = vmul.f32 1.442695, %v907_v4  ;;  %v7792_v4 = vld [vmem:[#allocation5 + $0x168] sm:$0xff]  }
 0x154   :  { %8068 = vpow2.f32 %v914_v6 }
 0x15b   :  { %v8063_v8 = vpop.eup %8062 }
 0x15c   :  { %v916_v10 = vadd.f32 1.0, %v8063_v8 }
 0x15d   :  { %v8065_v12 = vpop.eup %8064 }
 0x15e   :  { %v917_v14 = vadd.f32 1.0, %v8065_v12  ;;  %8070 = vrcp.f32 %v916_v10 }
 0x15f   :  { %v8067_v18 = vpop.eup %8066 }
 0x160   :  { %8072 = vrcp.f32 %v917_v14  ;;  %v918_v20 = vadd.f32 1.0, %v8067_v18  ;;  %v1144_v14 = vadd.f32 %v1136_v45, %v993_v27 }
 0x161   :  { %v8069_v22 = vpop.eup %8068 }
 0x162   :  { %v919_v29 = vadd.f32 1.0, %v8069_v22  ;;  %8074 = vrcp.f32 %v918_v20 }
 0x164   :  { %8076 = vrcp.f32 %v919_v29  ;;  %v1145_v29 = vadd.f32 %v1138_v0, %v989_v15 }
 0x167   :  { %v1285_v30 = vpop.f32.mrf.mxu0 }
 0x168   :  { %v1464_v55 = vpop.f32.mrf.mxu1  ;;  %v1294_v18 = vadd.f32 %v1285_v30, %v1143_v31 }
 0x169   :  { %v1287_v19 = vpop.f32.mrf.mxu0 }
 0x16a   :  { %v1466_v21 = vpop.f32.mrf.mxu1 }
 0x16b   :  { %v8071_v37 = vpop.eup %8070  ;;  %v1289_v6 = vpop.f32.mrf.mxu0 }
 0x16c   :  { %v1468_v8 = vpop.f32.mrf.mxu1  ;;  %v1296_v45 = vadd.f32 %v1289_v6, %v1145_v29  ;;  %v7802_v6 = vld [vmem:[#allocation5 + $0x140] sm:$0xff]  }
 0x16d   :  { %v8073_v41 = vpop.eup %8072  ;;  %v1291_v33 = vpop.f32.mrf.mxu0 }
 0x16e   :  { %v6765_v43 = vpack.c.bf16 %v8073_v41, %v8071_v37  ;;  %v1295_v37 = vadd.f32 %v1287_v19, %v1144_v14  ;;  %v7794_v41 = vld [vmem:[#allocation5 + $0x160] sm:$0xff]  }
 0x16f   :  { %v8075_v47 = vpop.eup %8074  ;;  %v7803_v14 = vld [vmem:[#allocation5 + $0x100] sm:$0xff]  }
 0x170   :  { %v939_v49 = vshrl.u32 %v6765_v43, 16  ;;  %v942_v44 = vshll.u32 %v6765_v43, 16  ;;  %v1470_v43 = vpop.f32.mrf.mxu1 }
 0x171   :  { %v8077_v51 = vpop.eup %8076 }
 0x172   :  { %v941_v53 = vrot.slane %v939_v49, 7  ;;  %v6766_v59 = vpack.c.bf16 %v8077_v51, %v8075_v47 }
 0x174   :  { %v944_v35 = vor.u32 %v942_v44, %v941_v53  ;;  %v945_v40 = vrot.slane %v941_v53, 4  ;;  %v947_v63 = vshrl.u32 %v6766_v59, 16  ;;  %v950_v9 = vshll.u32 %v6766_v59, 16 }
 0x175   :  { %v1146_v53 = vadd.f32 %v1140_v24, %v993_v27  ;;  %v1473_v44 = vadd.f32 %v1464_v55, %v1294_v18  ;;  %v7800_v27 = vld [vmem:[#allocation5 + $0x148] sm:$0xff]   ;;  %v7804_v18 = vld [vmem:[#allocation5 + $0x278] sm:$0xff]  }
 0x176   :  { %v966_v60 = vsel %vm9018_vm15, %v944_v35, 0  ;;  %v976_v36 = vsel %vm9022_vm0, %v945_v40, %v975_v61  ;;  %v949_v52 = vrot.slane %v947_v63, 7  ;;  %v7795_v40 = vld [vmem:[#allocation5 + $0x120] sm:$0xff]   ;;  %v1474_v63 = vadd.f32 %v1466_v21, %v1295_v37  ;;  %v7799_v21 = vld [vmem:[#allocation5 + $0x110] sm:$0xff]   ;;  %v7805_v37 = vld [vmem:[#allocation5 + $0x238] sm:$0xff]  }
 0x177   :  { %967 = vst [vmem:[#allocation2 + $0x30] sm:$0xff] %v966_v60  ;;  %977 = vst [vmem:[#allocation2] sm:$0x11] %v976_v36  ;;  %v2281_v48 = vshrl.u32 %v966_v60, 16  ;;  %v2284_v62 = vshll.u32 %v966_v60, 16 }
 0x178   :  { %v952_v57 = vor.u32 %v950_v9, %v949_v52  ;;  %v953_v3 = vrot.slane %v949_v52, 4  ;;  %v7796_v9 = vld [vmem:[#allocation5 + $0x158] sm:$0xff]  }
 0x179   :  { %v2283_v23 = vrot.slane %v2281_v48, 4  ;;  %v2286_v25 = vrot.slane %v2284_v62, 5  ;;  %v7797_v48 = vld [vmem:[#allocation5 + $0x118] sm:$0xff]  }
 0x17a   :  { %v979_v11 = vsel %vm9018_vm15, %v952_v57, 0  ;;  %v982_v38 = vsel %vm9022_vm0, %v953_v3, %v981_v32  ;;  %v1475_v57 = vadd.f32 %v1468_v8, %v1296_v45 }
 0x17b   :  { %980 = vst [vmem:[#allocation2 + $0x18] sm:$0xff] %v979_v11  ;;  %983 = vst [vmem:[#allocation2 + $0x10] sm:$0x11] %v982_v38  ;;  %v6377_v56 = vcombine.low %v966_v60, %v979_v11  ;;  %v6378_v54 = vcombine.high %v966_v60, %v979_v11  ;;  %v2295_v34 = vshrl.u32 %v979_v11, 16  ;;  %v2298_v50 = vshll.u32 %v979_v11, 16 }
 0x17c   :  { %v2287_v10 = vor.u32 %v2286_v25, %v2283_v23  ;;  %v1297_v60 = vadd.f32 %v1291_v33, %v1146_v53  ;;  %v7808_v33 = vld [vmem:[#allocation5 + $0x270] sm:$0xff]  }
 0x17d   :  { %2081 = vmatprep.mubr.bf16.mxu0 %v6378_v54  ;;  %v2297_v58 = vrot.slane %v2295_v34, 4  ;;  %v2300_v28 = vrot.slane %v2298_v50, 5  ;;  %v7798_v54 = vld [vmem:[#allocation5 + $0x150] sm:$0xff]  }
 0x17e   :  { %2082 = vmatmul.mubr.bf16.vlgmr.msra.gmra.mxu0 %v6377_v56  ;;  %v9041_v1 = vld [vmem:[#allocation2] sm:$0x11]  ;;  %v2288_v47 = vrot.slane %v2287_v10, 4  ;;  %v1476_v62 = vadd.f32 %v1470_v43, %v1297_v60  ;;  %v2700_v8 = vld [vmem:[#allocation2 + $0x30] sm:$0xee]  ;;  %v7820_v60 = vld [vmem:[#allocation5 + $0x258] sm:$0xff]  }
 0x17f   :  { %6818 = vmatpush3.bf16.msra.mxu0 %v7789_v7  ;;  %v2290_v2 = vshll.u32 %v9041_v1, 16  ;;  %v2301_v12 = vor.u32 %v2300_v28, %v2297_v58 }
 0x180   :  { %6819 = vmatprep.subr.bf16.mxu0 %v7790_v17 }
 0x181   :  { %v2292_v20 = vrot.slane %v2290_v2, 5  ;;  %v2302_v49 = vrot.slane %v2301_v12, 4  ;;  %v7801_v2 = vld [vmem:[#allocation5 + $0x108] sm:$0xff]  }
 0x182   :  { %v9045_v16 = vld [vmem:[#allocation2 + $0x10] sm:$0x11]  ;;  %v2701_v31 = vld [vmem:[#allocation2 + $0x18] sm:$0xee] }
 0x183   :  { %6820 = vmatpush3.bf16.msra.mxu0 %v7791_v42  ;;  %v2304_v22 = vshll.u32 %v9045_v16, 16  ;;  %v9050_v35 = vsel %vm8850_vm2, %v2288_v47, %v2292_v20  ;;  %v6450_v10 = vrot.slane %v2701_v31, 9  ;;  %v2715_v12 = vrot.slane %v9045_v16, 5 }
 0x184   :  { %6821 = vmatprep.subr.bf16.mxu0 %v7792_v4  ;;  %v2711_v20 = vrot.slane %v9041_v1, 5 }
 0x185   :  { %v2306_v51 = vrot.slane %v2304_v22, 5  ;;  %v9066_v29 = vsel %vm9060_vm4, %v6450_v10, %v2715_v12  ;;  %v7837_v10 = vld [vmem:[#allocation5 + $0x1b8] sm:$0xff]  }
 0x187   :  { %v1643_v59 = vpop.f32.mrf.mxu0  ;;  %6822 = vmatpush3.bf16.msra.mxu0 %v7793_v39  ;;  %v9054_v0 = vsel %vm8850_vm2, %v2302_v49, %v2306_v51  ;;  %v6449_v39 = vrot.slane %v2700_v8, 9  ;;  %v7809_v51 = vld [vmem:[#allocation5 + $0x230] sm:$0xff]  }
 0x188   :  { %v1822_v61 = vpop.f32.mrf.mxu1  ;;  %v1652_v36 = vadd.f32 %v1643_v59, %v1473_v44  ;;  %v6414_v52 = vcombine.high %v9050_v35, %v9054_v0  ;;  %6823 = vmatprep.subr.bf16.mxu0 %v7794_v41  ;;  %v6413_v16 = vcombine.low %v9050_v35, %v9054_v0  ;;  %v7812_v44 = vld [vmem:[#allocation5 + $0x268] sm:$0xff]  }
 0x189   :  { %v1645_v32 = vpop.f32.mrf.mxu0  ;;  %v9072_v41 = vsel %vm9060_vm4, %v6449_v39, %v2711_v20  ;;  %v7813_v35 = vld [vmem:[#allocation5 + $0x228] sm:$0xff]  }
 0x18a   :  { %v1824_v24 = vpop.f32.mrf.mxu1  ;;  %v1831_v3 = vadd.f32 %v1822_v61, %v1652_v36  ;;  %v1653_v46 = vadd.f32 %v1645_v32, %v1474_v63  ;;  %2477 = vmatprep.mubr.bf16.mxu0 %v6414_v52  ;;  %v6452_v43 = vcombine.high %v9072_v41, %v9066_v29  ;;  %v7817_v63 = vld [vmem:[#allocation5 + $0x220] sm:$0xff]   ;;  %v7821_v36 = vld [vmem:[#allocation5 + $0x218] sm:$0xff]   ;;  %v7824_v52 = vld [vmem:[#allocation5 + $0x250] sm:$0xff]  }
 0x18b   :  { %v1647_v30 = vpop.f32.mrf.mxu0  ;;  %6824 = vmatpush3.bf16.msra.mxu0 %v7795_v40  ;;  %v7816_v40 = vld [vmem:[#allocation5 + $0x260] sm:$0xff]  }
 0x18c   :  { %v1826_v55 = vpop.f32.mrf.mxu1  ;;  %v1835_v11 = vsub.f32 0.0, %v1831_v3  ;;  %v1832_v38 = vadd.f32 %v1824_v24, %v1653_v46  ;;  %v1654_v56 = vadd.f32 %v1647_v30, %v1475_v57  ;;  %6825 = vmatprep.subr.bf16.mxu0 %v7796_v9  ;;  %v7825_v24 = vld [vmem:[#allocation5 + $0x210] sm:$0xff]   ;;  %v7828_v3 = vld [vmem:[#allocation5 + $0x248] sm:$0xff]  }
 0x18d   :  { %v1649_v7 = vpop.f32.mrf.mxu0 }
 0x18e   :  { %v1839_v34 = vmul.f32 1.442695, %v1835_v11  ;;  %v1836_v15 = vsub.f32 0.0, %v1832_v38  ;;  %v1833_v17 = vadd.f32 %v1826_v55, %v1654_v56  ;;  %v1655_v50 = vadd.f32 %v1649_v7, %v1476_v62  ;;  %v1828_v19 = vpop.f32.mrf.mxu1  ;;  %v7832_v56 = vld [vmem:[#allocation5 + $0x240] sm:$0xff]  }
 0x18f   :  { %6826 = vmatpush3.bf16.msra.mxu0 %v7797_v48  ;;  %v7829_v48 = vld [vmem:[#allocation5 + $0x208] sm:$0xff]  }
 0x190   :  { %8078 = vpow2.f32 %v1839_v34  ;;  %v1841_v23 = vmul.f32 1.442695, %v1836_v15  ;;  %v1837_v25 = vsub.f32 0.0, %v1833_v17  ;;  %v1834_v58 = vadd.f32 %v1828_v19, %v1655_v50  ;;  %6827 = vmatprep.subr.bf16.mxu0 %v7798_v54  ;;  %v1893_v54 = vld [vmem:[#allocation2 + $0x20] sm:$0x11] }
 0x191   :  { %v7833_v17 = vld [vmem:[#allocation5 + $0x200] sm:$0xff]  }
 0x192   :  { %8080 = vpow2.f32 %v1841_v23  ;;  %v1843_v28 = vmul.f32 1.442695, %v1837_v25  ;;  %v1838_v42 = vsub.f32 0.0, %v1834_v58  ;;  %v1899_v25 = vld [vmem:[#allocation2 + $0x38] sm:$0x11] }
 0x193   :  { %6828 = vmatpush3.bf16.msra.mxu0 %v7799_v21 }
 0x194   :  { %8082 = vpow2.f32 %v1843_v28  ;;  %v1845_v4 = vmul.f32 1.442695, %v1838_v42  ;;  %6829 = vmatprep.subr.bf16.mxu0 %v7800_v27 }
 0x196   :  { %8084 = vpow2.f32 %v1845_v4  ;;  %v6451_v4 = vcombine.low %v9072_v41, %v9066_v29  ;;  %v7840_v29 = vld [vmem:[#allocation5 + $0x1e8] sm:$0xff]  }
 0x197   :  { %6830 = vmatpush3.bf16.msra.mxu0 %v7801_v2 }
 0x198   :  { %6831 = vmatprep.subr.bf16.mxu0 %v7802_v6 }
 0x19b   :  { %6832 = vmatpush3.bf16.msra.mxu0 %v7803_v14  ;;  %v7838_v14 = vld [vmem:[#allocation5 + $0x1f0] sm:$0xff]  }
 0x19c   :  { %6861 = vmatprep.subr.bf16.mxu0 %v7804_v18 }
 0x19d   :  { %v8079_v1 = vpop.eup %8078 }
 0x19e   :  { %v1847_v47 = vadd.f32 1.0, %v8079_v1  ;;  %2478 = vmatmul.mubr.bf16.vlgmr.msra.gmra.mxu0 %v6413_v16 }
 0x19f   :  { %v8081_v49 = vpop.eup %8080  ;;  %6862 = vmatpush3.bf16.msra.mxu0 %v7805_v37  ;;  %2886 = vmatprep.mubr.bf16.mxu0 %v6452_v43 }
 0x1a0   :  { %v1848_v53 = vadd.f32 1.0, %v8081_v49  ;;  %6863 = vmatprep.subr.bf16.mxu0 %v7808_v33  ;;  %8086 = vrcp.f32 %v1847_v47  ;;  %v7841_v47 = vld [vmem:[#allocation5 + $0x1a8] sm:$0xff]  }
 0x1a1   :  { %v8083_v45 = vpop.eup %8082 }
 0x1a2   :  { %8088 = vrcp.f32 %v1848_v53  ;;  %v1849_v59 = vadd.f32 1.0, %v8083_v45  ;;  %v7842_v53 = vld [vmem:[#allocation5 + $0x1e0] sm:$0xff]  }
 0x1a3   :  { %v8085_v61 = vpop.eup %8084  ;;  %6864 = vmatpush3.bf16.msra.mxu0 %v7809_v51 }
 0x1a4   :  { %v1850_v0 = vadd.f32 1.0, %v8085_v61  ;;  %6865 = vmatprep.subr.bf16.mxu0 %v7812_v44  ;;  %8090 = vrcp.f32 %v1849_v59 }
 0x1a6   :  { %8092 = vrcp.f32 %v1850_v0  ;;  %v7843_v0 = vld [vmem:[#allocation5 + $0x1a0] sm:$0xff]  }
 0x1a7   :  { %6866 = vmatpush3.bf16.msra.mxu0 %v7813_v35 }
 0x1a8   :  { %6867 = vmatprep.subr.bf16.mxu0 %v7816_v40 }
 0x1ab   :  { %6868 = vmatpush3.bf16.msra.mxu0 %v7817_v63  ;;  %v7844_v63 = vld [vmem:[#allocation5 + $0x1d8] sm:$0xff]  }
 0x1ac   :  { %6869 = vmatprep.subr.bf16.mxu0 %v7820_v60  ;;  %v7845_v60 = vld [vmem:[#allocation5 + $0x198] sm:$0xff]  }
 0x1ad   :  { %v8087_v9 = vpop.eup %8086 }
 0x1af   :  { %v8089_v32 = vpop.eup %8088  ;;  %6870 = vmatpush3.bf16.msra.mxu0 %v7821_v36  ;;  %v7846_v36 = vld [vmem:[#allocation5 + $0x1d0] sm:$0xff]  }
 0x1b0   :  { %v6767_v57 = vpack.c.bf16 %v8089_v32, %v8087_v9  ;;  %6871 = vmatprep.subr.bf16.mxu0 %v7824_v52  ;;  %v7847_v52 = vld [vmem:[#allocation5 + $0x190] sm:$0xff]   ;;  %v7848_v9 = vld [vmem:[#allocation5 + $0x1c8] sm:$0xff]  }
 0x1b1   :  { %v8091_v46 = vpop.eup %8090  ;;  %v7849_v32 = vld [vmem:[#allocation5 + $0x188] sm:$0xff]  }
 0x1b2   :  { %v1870_v30 = vshrl.u32 %v6767_v57, 16  ;;  %v1873_v11 = vshll.u32 %v6767_v57, 16  ;;  %v7851_v57 = vld [vmem:[#allocation5 + $0x180] sm:$0xff]  }
 0x1b3   :  { %v8093_v55 = vpop.eup %8092  ;;  %6872 = vmatpush3.bf16.msra.mxu0 %v7825_v24  ;;  %v7850_v24 = vld [vmem:[#allocation5 + $0x1c0] sm:$0xff]  }
 0x1b4   :  { %v1872_v62 = vrot.slane %v1870_v30, 7  ;;  %v6768_v38 = vpack.c.bf16 %v8093_v55, %v8091_v46  ;;  %6873 = vmatprep.subr.bf16.mxu0 %v7828_v3  ;;  %v7852_v46 = vld [vmem:[%s9600_s3 + $0x38] sm:$0xff]   ;;  %v8210_v30 = vmov 0.0   ;;  %v7853_v55 = vld [vmem:[%s9600_s3 + $0x30] sm:$0xff]  }
 0x1b6   :  { %v1875_v7 = vor.u32 %v1873_v11, %v1872_v62  ;;  %v1876_v34 = vrot.slane %v1872_v62, 4  ;;  %v1878_v15 = vshrl.u32 %v6768_v38, 16  ;;  %v1881_v23 = vshll.u32 %v6768_v38, 16  ;;  %v7855_v62 = vld [vmem:[%s9600_s3 + $0x78] sm:$0xff]   ;;  %v7856_v11 = vld [vmem:[%s9600_s3 + $0x20] sm:$0xff]   ;;  %v7857_v38 = vld [vmem:[%s9600_s3 + $0x70] sm:$0xff]  }
 0x1b7   :  { %6874 = vmatpush3.bf16.msra.mxu0 %v7829_v48  ;;  %v7854_v48 = vld [vmem:[%s9600_s3 + $0x28] sm:$0xff]  }
 0x1b8   :  { %v1891_v50 = vsel %vm9018_vm15, %v1875_v7, 0  ;;  %v1894_v19 = vsel %vm9022_vm0, %v1876_v34, %v1893_v54  ;;  %v1880_v21 = vrot.slane %v1878_v15, 7  ;;  %6875 = vmatprep.subr.bf16.mxu0 %v7832_v56  ;;  %v7858_v56 = vld [vmem:[%s9600_s3 + $0x18] sm:$0xff]   ;;  %v7859_v54 = vld [vmem:[%s9600_s3 + $0x68] sm:$0xff]   ;;  %v7860_v7 = vld [vmem:[%s9600_s3 + $0x10] sm:$0xff]  }
 0x1b9   :  { %1895 = vst [vmem:[#allocation2 + $0x20] sm:$0x11] %v1894_v19  ;;  %v2493_v28 = vshrl.u32 %v1891_v50, 16  ;;  %v2496_v42 = vshll.u32 %v1891_v50, 16  ;;  %v7861_v34 = vld [vmem:[%s9600_s3 + $0x60] sm:$0xff]   ;;  %v7862_v15 = vld [vmem:[%s9600_s3 + $0x8] sm:$0xff]  }
 0x1ba   :  { %v1883_v58 = vor.u32 %v1881_v23, %v1880_v21  ;;  %v1884_v27 = vrot.slane %v1880_v21, 4  ;;  %v7865_v19 = vld [vmem:[%s9600_s3 + $0x50] sm:$0xff]   ;;  %v7868_v21 = vld [vmem:[%s9600_s3 + $0x48] sm:$0xff]   ;;  %v7870_v23 = vld [vmem:[%s9600_s3 + $0x40] sm:$0xff]  }
 0x1bb   :  { %6876 = vmatpush3.bf16.msra.mxu0 %v7833_v17  ;;  %v2495_v39 = vrot.slane %v2493_v28, 4  ;;  %v2498_v20 = vrot.slane %v2496_v42, 5  ;;  %v7863_v17 = vld [vmem:[%s9600_s3 + $0x58] sm:$0xff]  }
 0x1bc   :  { %v1897_v2 = vsel %vm9018_vm15, %v1883_v58, 0  ;;  %v1900_v31 = vsel %vm9022_vm0, %v1884_v27, %v1899_v25  ;;  %7137 = vmatprep.subr.bf16.mxu0 %v8210_v30 }
 0x1bd   :  { %1901 = vst [vmem:[#allocation2 + $0x38] sm:$0x11] %v1900_v31  ;;  %v6395_v6 = vcombine.low %v1891_v50, %v1897_v2  ;;  %v6396_v8 = vcombine.high %v1891_v50, %v1897_v2  ;;  %v2507_v12 = vshrl.u32 %v1897_v2, 16  ;;  %v2510_v18 = vshll.u32 %v1897_v2, 16  ;;  %v7864_v50 = vld [vmem:[%s9600_s3] sm:$0xff]  }
 0x1be   :  { %2887 = vmatmul.mubr.bf16.vlgmr.msra.gmra.mxu0 %v6451_v4  ;;  %v2499_v41 = vor.u32 %v2498_v20, %v2495_v39 }
 0x1bf   :  { %2265 = vmatprep.mubr.bf16.mxu1 %v6396_v8  ;;  %v2509_v37 = vrot.slane %v2507_v12, 4  ;;  %v2512_v16 = vrot.slane %v2510_v18, 5  ;;  %7138 = vmatpush3.bf16.msra.mxu0 %v7855_v62 }
 0x1c0   :  { %2266 = vmatmul.mubr.bf16.vlgmr.msra.gmra.mxu1 %v6395_v6  ;;  %v2489_v5 = vld [vmem:[#allocation2 + $0x20] sm:$0x11]  ;;  %v2500_v44 = vrot.slane %v2499_v41, 4  ;;  %7139 = vmatprep.subr.bf16.mxu0 %v8210_v30 }
 0x1c1   :  { %6840 = vmatpush3.bf16.msra.mxu1 %v7837_v10  ;;  %v2502_v33 = vshll.u32 %v2489_v5, 16  ;;  %v2513_v1 = vor.u32 %v2512_v16, %v2509_v37  ;;  %7153 = vmatprep.mubr.msk.bf16.mxu0 %vm8211_vm5, %v8210_v30 }
 0x1c2   :  { %6841 = vmatprep.subr.bf16.mxu1 %v7838_v14  ;;  %v6376_v14 = vld [vmem:[%s9604_s7] ss:$0 sm:$0xff] }
 0x1c3   :  { %v2504_v49 = vrot.slane %v2502_v33, 5  ;;  %v2514_v45 = vrot.slane %v2513_v1, 4  ;;  %7140 = vmatpush3.bf16.msra.mxu0 %v7857_v38 }
 0x1c4   :  { %v2491_v43 = vld [vmem:[#allocation2 + $0x38] sm:$0x11]  ;;  %7141 = vmatprep.subr.bf16.mxu0 %v8210_v30 }
 0x1c5   :  { %6842 = vmatpush3.bf16.msra.mxu1 %v7839_v26  ;;  %v2516_v51 = vshll.u32 %v2491_v43, 16  ;;  %v2505_v61 = vsel %vm8850_vm2, %v2500_v44, %v2504_v49 }
 0x1c6   :  { %6843 = vmatprep.subr.bf16.mxu1 %v7840_v29 }
 0x1c7   :  { %v2518_v59 = vrot.slane %v2516_v51, 5  ;;  %7142 = vmatpush3.bf16.msra.mxu0 %v7859_v54 }
 0x1c8   :  { %7143 = vmatprep.subr.bf16.mxu0 %v8210_v30 }
 0x1c9   :  { %6844 = vmatpush3.bf16.msra.mxu1 %v7841_v47  ;;  %v2519_v35 = vsel %vm8850_vm2, %v2514_v45, %v2518_v59 }
 0x1ca   :  { %v6432_v40 = vcombine.high %v2505_v61, %v2519_v35  ;;  %6845 = vmatprep.subr.bf16.mxu1 %v7842_v53  ;;  %v6431_v3 = vcombine.low %v2505_v61, %v2519_v35 }
 0x1cb   :  { %7144 = vmatpush3.bf16.msra.mxu0 %v7861_v34 }
 0x1cc   :  { %2689 = vmatprep.mubr.bf16.mxu1 %v6432_v40  ;;  %7145 = vmatprep.subr.bf16.mxu0 %v8210_v30 }
 0x1cd   :  { %6846 = vmatpush3.bf16.msra.mxu1 %v7843_v0 }
 0x1ce   :  { %6847 = vmatprep.subr.bf16.mxu1 %v7844_v63 }
 0x1cf   :  { %7146 = vmatpush3.bf16.msra.mxu0 %v7863_v17 }
 0x1d0   :  { %7147 = vmatprep.subr.bf16.mxu0 %v8210_v30 }
 0x1d1   :  { %6848 = vmatpush3.bf16.msra.mxu1 %v7845_v60 }
 0x1d2   :  { %6849 = vmatprep.subr.bf16.mxu1 %v7846_v36 }
 0x1d3   :  { %7148 = vmatpush3.bf16.msra.mxu0 %v7865_v19 }
 0x1d4   :  { %7149 = vmatprep.subr.bf16.mxu0 %v8210_v30 }
 0x1d5   :  { %6850 = vmatpush3.bf16.msra.mxu1 %v7847_v52 }
 0x1d6   :  { %6851 = vmatprep.subr.bf16.mxu1 %v7848_v9 }
 0x1d7   :  { %7150 = vmatpush3.bf16.msra.mxu0 %v7868_v21 }
 0x1d8   :  { %7151 = vmatprep.subr.bf16.mxu0 %v8210_v30 }
 0x1d9   :  { %6852 = vmatpush3.bf16.msra.mxu1 %v7849_v32 }
 0x1da   :  { %6853 = vmatprep.subr.bf16.mxu1 %v7850_v24 }
 0x1db   :  { %7152 = vmatpush3.bf16.msra.mxu0 %v7870_v23  ;;  %v7867_v23 = vld [vmem:[%s9600_s3 + $0xb8] sm:$0xff]  }
 0x1dc   :  { %7177 = vmatprep.subr.bf16.mxu0 %v8210_v30 }
 0x1dd   :  { %6854 = vmatpush3.bf16.msra.mxu1 %v7851_v57 }
 0x1de   :  { %7117 = vmatprep.subr.bf16.mxu1 %v8210_v30 }
 0x1e0   :  { %2690 = vmatmul.mubr.bf16.vlgmr.msra.gmra.mxu1 %v6431_v3 }
 0x1e1   :  { %7118 = vmatpush3.bf16.msra.mxu1 %v7852_v46  ;;  %7133 = vmatprep.mubr.msk.bf16.mxu1 %vm8211_vm5, %v8210_v30 }
 0x1e2   :  { %7119 = vmatprep.subr.bf16.mxu1 %v8210_v30 }
 0x1e5   :  { %7120 = vmatpush3.bf16.msra.mxu1 %v7853_v55 }
 0x1e6   :  { %7121 = vmatprep.subr.bf16.mxu1 %v8210_v30 }
 0x1e9   :  { %7122 = vmatpush3.bf16.msra.mxu1 %v7854_v48 }
 0x1ea   :  { %7123 = vmatprep.subr.bf16.mxu1 %v8210_v30 }
 0x1ed   :  { %7124 = vmatpush3.bf16.msra.mxu1 %v7856_v11 }
 0x1ee   :  { %7125 = vmatprep.subr.bf16.mxu1 %v8210_v30 }
 0x1f1   :  { %7126 = vmatpush3.bf16.msra.mxu1 %v7858_v56 }
 0x1f2   :  { %7127 = vmatprep.subr.bf16.mxu1 %v8210_v30 }
 0x1f5   :  { %7128 = vmatpush3.bf16.msra.mxu1 %v7860_v7 }
 0x1f6   :  { %7129 = vmatprep.subr.bf16.mxu1 %v8210_v30 }
 0x1f9   :  { %7130 = vmatpush3.bf16.msra.mxu1 %v7862_v15 }
 0x1fa   :  { %7131 = vmatprep.subr.bf16.mxu1 %v8210_v30 }
 0x1fd   :  { %7132 = vmatpush3.bf16.msra.mxu1 %v7864_v50 }
 0x1fe   :  { %7157 = vmatprep.subr.bf16.mxu1 %v8210_v30 }
 0x23e   :  { %v6789_v25 = vpop.f32.mrf.mxu0 }
 0x240   :  { %v6790_v58 = vpop.f32.mrf.mxu0 }
 0x241   :  { %v6791_v12 = vadd.f32 %v6790_v58, %v6789_v25 }
 0x242   :  { %v6792_v27 = vpop.f32.mrf.mxu0 }
 0x243   :  { %v2090_v37 = vadd.f32 %v6791_v12, %v6376_v14 }
 0x244   :  { %v6793_v28 = vpop.f32.mrf.mxu0 }
 0x245   :  { %v6794_v5 = vadd.f32 %v6793_v28, %v6792_v27 }
 0x247   :  { %v2091_v41 = vadd.f32 %v6794_v5, %v6376_v14 }
 0x25e   :  { %v6833_v42 = vpop.f32.mrf.mxu0 }
 0x260   :  { %v6834_v2 = vpop.f32.mrf.mxu0 }
 0x261   :  { %v6835_v1 = vadd.f32 %v6834_v2, %v6833_v42 }
 0x262   :  { %v6836_v4 = vpop.f32.mrf.mxu0 }
 0x264   :  { %v6837_v8 = vpop.f32.mrf.mxu0 }
 0x265   :  { %v6838_v45 = vadd.f32 %v6837_v8, %v6836_v4  ;;  %v7869_v8 = vld [vmem:[%s9600_s3 + $0xb0] sm:$0xff]  }
 0x27e   :  { %v6877_v18 = vpop.f32.mrf.mxu0 }
 0x280   :  { %v6811_v31 = vpop.f32.mrf.mxu1  ;;  %v6878_v16 = vpop.f32.mrf.mxu0 }
 0x281   :  { %v6879_v59 = vadd.f32 %v6878_v16, %v6877_v18 }
 0x282   :  { %v6812_v6 = vpop.f32.mrf.mxu1  ;;  %v6880_v43 = vpop.f32.mrf.mxu0 }
 0x283   :  { %v6813_v39 = vadd.f32 %v6812_v6, %v6811_v31 }
 0x284   :  { %v6814_v10 = vpop.f32.mrf.mxu1  ;;  %v6881_v35 = vpop.f32.mrf.mxu0 }
 0x285   :  { %v2274_v26 = vadd.f32 %v6813_v39, %v2090_v37  ;;  %v6882_v36 = vadd.f32 %v6881_v35, %v6880_v43  ;;  %v7871_v37 = vld [vmem:[%s9600_s3 + $0xa8] sm:$0xff]   ;;  %v7873_v43 = vld [vmem:[%s9600_s3 + $0xa0] sm:$0xff]  }
 0x286   :  { %v6815_v20 = vpop.f32.mrf.mxu1 }
 0x287   :  { %v6816_v33 = vadd.f32 %v6815_v20, %v6814_v10  ;;  %v2486_v51 = vadd.f32 %v6835_v1, %v2274_v26 }
 0x289   :  { %v2275_v49 = vadd.f32 %v6816_v33, %v2091_v41  ;;  %v7872_v41 = vld [vmem:[%s9600_s3 + $0xf8] sm:$0xff]  }
 0x28b   :  { %v2487_v63 = vadd.f32 %v6838_v45, %v2275_v49  ;;  %v7875_v49 = vld [vmem:[%s9600_s3 + $0x98] sm:$0xff]   ;;  %v7878_v45 = vld [vmem:[%s9600_s3 + $0xe0] sm:$0xff]  }
 0x2a0   :  { %v6855_v29 = vpop.f32.mrf.mxu1 }
 0x2a2   :  { %v6856_v47 = vpop.f32.mrf.mxu1 }
 0x2a3   :  { %v6857_v53 = vadd.f32 %v6856_v47, %v6855_v29  ;;  %v7874_v47 = vld [vmem:[%s9600_s3 + $0xf0] sm:$0xff]  }
 0x2a4   :  { %v6858_v44 = vpop.f32.mrf.mxu1 }
 0x2a5   :  { %v2698_v61 = vadd.f32 %v6857_v53, %v2486_v51  ;;  %v7876_v51 = vld [vmem:[%s9600_s3 + $0xe8] sm:$0xff]   ;;  %v7877_v53 = vld [vmem:[%s9600_s3 + $0x90] sm:$0xff]  }
 0x2a6   :  { %v6859_v0 = vpop.f32.mrf.mxu1 }
 0x2a7   :  { %v2895_v40 = vadd.f32 %v6879_v59, %v2698_v61  ;;  %v6860_v60 = vadd.f32 %v6859_v0, %v6858_v44  ;;  %v7879_v61 = vld [vmem:[%s9600_s3 + $0x88] sm:$0xff]  }
 0x2a9   :  { %v2897_v52 = vsub.f32 0.0, %v2895_v40  ;;  %v2699_v9 = vadd.f32 %v6860_v60, %v2487_v63  ;;  %v7880_v60 = vld [vmem:[%s9600_s3 + $0xd8] sm:$0xff]  }
 0x2ab   :  { %v2899_v32 = vmul.f32 1.442695, %v2897_v52  ;;  %v2896_v24 = vadd.f32 %v6882_v36, %v2699_v9 }
 0x2ad   :  { %8094 = vpow2.f32 %v2899_v32  ;;  %v2898_v57 = vsub.f32 0.0, %v2896_v24 }
 0x2af   :  { %v2901_v3 = vmul.f32 1.442695, %v2898_v57  ;;  %v7881_v57 = vld [vmem:[%s9600_s3 + $0x80] sm:$0xff]  }
 0x2b1   :  { %8096 = vpow2.f32 %v2901_v3 }
 0x2ba   :  { %v8095_v46 = vpop.eup %8094 }
 0x2bb   :  { %v2903_v55 = vadd.f32 1.0, %v8095_v46 }
 0x2bd   :  { %8098 = vrcp.f32 %v2903_v55 }
 0x2be   :  { %v8097_v48 = vpop.eup %8096 }
 0x2bf   :  { %v2904_v62 = vadd.f32 1.0, %v8097_v48 }
 0x2c1   :  { %8100 = vrcp.f32 %v2904_v62 }
 0x2ca   :  { %v8099_v11 = vpop.eup %8098 }
 0x2cb   :  { %v6769_v38 = vpack.c.bf16 %v8099_v11, %v8099_v11 }
 0x2cd   :  { %v2915_v56 = vrot.slane %v6769_v38, 7  ;;  %v7882_v38 = vld [vmem:[%s9600_s3 + $0xd0] sm:$0xff]  }
 0x2ce   :  { %v8101_v54 = vpop.eup %8100 }
 0x2cf   :  { %v2916_v7 = vrot.slane %v2915_v56, 4  ;;  %2923 = vst [vmem:[#allocation3] sm:$0xe] %v2915_v56  ;;  %v6770_v34 = vpack.c.bf16 %v8101_v54, %v8101_v54 }
 0x2d1   :  { %2924 = vst [vmem:[#allocation3 + $0x4] sm:$0x1] %v2916_v7  ;;  %v2917_v15 = vrot.slane %v6770_v34, 7 }
 0x2d3   :  { %v2918_v17 = vrot.slane %v2917_v15, 4  ;;  %2925 = vst [vmem:[#allocation3 + $0x8] sm:$0xe] %v2917_v15 }
 0x2d5   :  { %2926 = vst [vmem:[#allocation3 + $0xc] sm:$0x1] %v2918_v17  ;;  %v7883_v17 = vld [vmem:[%s9600_s3 + $0x138] sm:$0xff]  }
 0x2d6   :  { %v3049_v50 = vld [vmem:[#allocation3] sm:$0xf] }
 0x2d7   :  { %v3054_v19 = vshrl.u32 %v3049_v50, 16  ;;  %v3057_v21 = vshll.u32 %v3049_v50, 16  ;;  %v3193_v59 = vld [vmem:[#allocation3] sm:$0xe] }
 0x2d8   :  { %v9166_v25 = vld [vmem:[#allocation3 + $0x4] sm:$0x1]  ;;  %v3325_v63 = vshrl.u32 %v3193_v59, 16  ;;  %v3328_v52 = vshll.u32 %v3193_v59, 16  ;;  %v6506_v62 = vrot.slane %v3193_v59, 9  ;;  %v7894_v59 = vld [vmem:[#allocation8 + $0x30] sm:$0xff]  }
 0x2d9   :  { %v3056_v58 = vrot.slane %v3054_v19, 4  ;;  %v3059_v27 = vrot.slane %v3057_v21, 5  ;;  %v3063_v10 = vshll.u32 %v9166_v25, 16  ;;  %v3201_v9 = vrot.slane %v9166_v25, 5  ;;  %v9227_v24 = vld [vmem:[#allocation3 + $0x4] sm:$0x3] }
 0x2da   :  { %v7866_v28 = vld [vmem:[#allocation3] ss:$8 sps:$4 sm:$0xff]   ;;  %v3327_v11 = vrot.slane %v3325_v63, 5  ;;  %v3330_v54 = vrot.slane %v3328_v52, 6  ;;  %v3334_v7 = vshrl.u32 %v9227_v24, 16  ;;  %v3337_v34 = vshll.u32 %v9227_v24, 16 }
 0x2db   :  { %v3051_v42 = vld [vmem:[#allocation3 + $0x8] sm:$0xf]  ;;  %v3060_v2 = vor.u32 %v3059_v27, %v3056_v58  ;;  %7134 = vmatmul.mubr.bf16.vlgmr.msra.gmra.mxu1 %v7866_v28  ;;  %v3065_v5 = vrot.slane %v3063_v10, 5  ;;  %v3202_v15 = vsel %vm9060_vm4, %v6506_v62, %v3201_v9  ;;  %v7899_v63 = vld [vmem:[#allocation8 + $0x18] sm:$0xff]   ;;  %v7902_v52 = vld [vmem:[#allocation8 + $0x60] sm:$0xff]  }
 0x2dc   :  { %v3068_v31 = vshrl.u32 %v3051_v42, 16  ;;  %v3071_v4 = vshll.u32 %v3051_v42, 16  ;;  %v9168_v6 = vld [vmem:[#allocation3 + $0xc] sm:$0x1]  ;;  %7158 = vmatpush3.bf16.msra.mxu1 %v7867_v23  ;;  %7173 = vmatprep.mubr.msk.bf16.mxu1 %vm8211_vm5, %v8210_v30  ;;  %v3194_v44 = vld [vmem:[#allocation3 + $0x8] sm:$0xe]  ;;  %v3331_v58 = vor.u32 %v3330_v54, %v3327_v11 }
 0x2dd   :  { %v3077_v18 = vshll.u32 %v9168_v6, 16  ;;  %7159 = vmatprep.subr.bf16.mxu1 %v8210_v30  ;;  %v3061_v39 = vrot.slane %v3060_v2, 4  ;;  %v3343_v35 = vshrl.u32 %v3194_v44, 16  ;;  %v3346_v0 = vshll.u32 %v3194_v44, 16  ;;  %v9219_v40 = vld [vmem:[#allocation3 + $0xc] sm:$0x3] }
 0x2de   :  { %v3070_v12 = vrot.slane %v3068_v31, 4  ;;  %v3073_v14 = vrot.slane %v3071_v4, 5  ;;  %v3205_v36 = vrot.slane %v9168_v6, 5  ;;  %v6507_v32 = vrot.slane %v3194_v44, 9  ;;  %v7884_v25 = vld [vmem:[%s9600_s3 + $0xc8] sm:$0xff]   ;;  %v7885_v42 = vld [vmem:[%s9600_s3 + $0x130] sm:$0xff]  }
 0x2df   :  { %v3079_v26 = vrot.slane %v3077_v18, 5  ;;  %v3066_v33 = vsel %vm8850_vm2, %v3061_v39, %v3065_v5  ;;  %v3345_v3 = vrot.slane %v3343_v35, 5  ;;  %v3348_v46 = vrot.slane %v3346_v0, 6  ;;  %v7886_v4 = vld [vmem:[%s9600_s3 + $0xc0] sm:$0xff]   ;;  %v7890_v5 = vld [vmem:[%s9600_s3 + $0x110] sm:$0xff]   ;;  %v7896_v35 = vld [vmem:[#allocation8 + $0x78] sm:$0xff]  }
 0x2e0   :  { %v3074_v20 = vor.u32 %v3073_v14, %v3070_v12  ;;  %7160 = vmatpush3.bf16.msra.mxu1 %v7869_v8  ;;  %v3352_v55 = vshrl.u32 %v9219_v40, 16  ;;  %v3355_v48 = vshll.u32 %v9219_v40, 16  ;;  %v3206_v56 = vsel %vm9060_vm4, %v6507_v32, %v3205_v36  ;;  %v7887_v14 = vld [vmem:[%s9600_s3 + $0x128] sm:$0xff]   ;;  %v7897_v0 = vld [vmem:[#allocation8 + $0x20] sm:$0xff]   ;;  %v7901_v36 = vld [vmem:[#allocation8 + $0x10] sm:$0xff]  }
 0x2e1   :  { %7161 = vmatprep.subr.bf16.mxu1 %v8210_v30  ;;  %v3349_v50 = vor.u32 %v3348_v46, %v3345_v3  ;;  %v6524_v23 = vcombine.low %v3202_v15, %v3206_v56  ;;  %v3336_v27 = vrot.slane %v3334_v7, 5  ;;  %v3339_v28 = vrot.slane %v3337_v34, 6  ;;  %v7903_v9 = vld [vmem:[#allocation8 + $0x8] sm:$0xff]   ;;  %v7904_v32 = vld [vmem:[#allocation8 + $0x58] sm:$0xff]  }
 0x2e2   :  { %v3075_v16 = vrot.slane %v3074_v20, 4  ;;  %v3354_v19 = vrot.slane %v3352_v55, 5  ;;  %v3357_v21 = vrot.slane %v3355_v48, 6  ;;  %v3332_v6 = vrot.slane %v3331_v58, 4  ;;  %v7888_v20 = vld [vmem:[%s9600_s3 + $0x120] sm:$0xff]   ;;  %v7909_v3 = vld [vmem:[#allocation8 + $0x48] sm:$0xff]  }
 0x2e3   :  { %v3350_v2 = vrot.slane %v3349_v50, 4  ;;  %v3340_v8 = vor.u32 %v3339_v28, %v3336_v27  ;;  %v7911_v55 = vld [vmem:[#allocation8 + $0x40] sm:$0xff]   ;;  %v7932_v10 = vld [vmem:[#allocation8 + $0x108] sm:$0xff]  }
 0x2e4   :  { %v3080_v29 = vsel %vm8850_vm2, %v3075_v16, %v3079_v26  ;;  %7162 = vmatpush3.bf16.msra.mxu1 %v7871_v37  ;;  %v3358_v31 = vor.u32 %v3357_v21, %v3354_v19  ;;  %v7889_v37 = vld [vmem:[%s9600_s3 + $0x118] sm:$0xff]   ;;  %v7891_v16 = vld [vmem:[%s9600_s3 + $0x108] sm:$0xff]   ;;  %v6471_v58 = vld [vmem:[%s9605_s8] ss:$0 sm:$0xff] }
 0x2e5   :  { %v6497_v1 = vcombine.low %v3066_v33, %v3080_v29  ;;  %7163 = vmatprep.subr.bf16.mxu1 %v8210_v30  ;;  %v3341_v18 = vsel %vm9263_vm8, %v3332_v6, %v3340_v8  ;;  %v3473_v26 = vld [vmem:[#allocation3 + $0x8] sm:$0xc]  ;;  %v3487_v33 = vrot.slane %v9219_v40, 6  ;;  %v3472_v29 = vld [vmem:[#allocation3] sm:$0xc]  ;;  %v7898_v40 = vld [vmem:[#allocation8 + $0x70] sm:$0xff]  }
 0x2e6   :  { %v3359_v12 = vsel %vm9263_vm8, %v3350_v2, %v3358_v31 }
 0x2e7   :  { %7154 = vmatmul.mubr.bf16.vlgmr.msra.gmra.mxu0 %v6497_v1  ;;  %v6549_v39 = vcombine.low %v3341_v18, %v3359_v12  ;;  %v3483_v1 = vrot.slane %v9227_v24, 6  ;;  %v7905_v24 = vld [vmem:[#allocation8] sm:$0xff]  }
 0x2e8   :  { %7178 = vmatpush3.bf16.msra.mxu0 %v7872_v41  ;;  %7193 = vmatprep.mubr.msk.bf16.mxu0 %vm8211_vm5, %v8210_v30  ;;  %v7892_v41 = vld [vmem:[%s9600_s3 + $0x100] sm:$0xff]  }
 0x2e9   :  { %7179 = vmatprep.subr.bf16.mxu0 %v8210_v30  ;;  %7164 = vmatpush3.bf16.msra.mxu1 %v7873_v43  ;;  %v6559_v43 = vrot.slane %v3473_v26, 10 }
 0x2ea   :  { %7165 = vmatprep.subr.bf16.mxu1 %v8210_v30 }
 0x2ec   :  { %7180 = vmatpush3.bf16.msra.mxu0 %v7874_v47  ;;  %v7938_v47 = vld [vmem:[#allocation10 + $0x28] sm:$0xff]  }
 0x2ed   :  { %7181 = vmatprep.subr.bf16.mxu0 %v8210_v30  ;;  %7166 = vmatpush3.bf16.msra.mxu1 %v7875_v49  ;;  %v6558_v49 = vrot.slane %v3472_v29, 10 }
 0x2ee   :  { %7167 = vmatprep.subr.bf16.mxu1 %v8210_v30 }
 0x2f0   :  { %7182 = vmatpush3.bf16.msra.mxu0 %v7876_v51  ;;  %v3488_v51 = vsel %vm9300_vm11, %v6559_v43, %v3487_v33 }
 0x2f1   :  { %7183 = vmatprep.subr.bf16.mxu0 %v8210_v30  ;;  %7168 = vmatpush3.bf16.msra.mxu1 %v7877_v53  ;;  %v3484_v53 = vsel %vm9300_vm11, %v6558_v49, %v3483_v1 }
 0x2f2   :  { %7169 = vmatprep.subr.bf16.mxu1 %v8210_v30  ;;  %v6576_v44 = vcombine.low %v3484_v53, %v3488_v51 }
 0x2f4   :  { %7184 = vmatpush3.bf16.msra.mxu0 %v7878_v45  ;;  %v7893_v45 = vld [vmem:[#allocation8 + $0x38] sm:$0xff]  }
 0x2f5   :  { %7185 = vmatprep.subr.bf16.mxu0 %v8210_v30  ;;  %7170 = vmatpush3.bf16.msra.mxu1 %v7879_v61  ;;  %v7895_v61 = vld [vmem:[#allocation8 + $0x28] sm:$0xff]  }
 0x2f6   :  { %7171 = vmatprep.subr.bf16.mxu1 %v8210_v30 }
 0x2f8   :  { %7186 = vmatpush3.bf16.msra.mxu0 %v7880_v60  ;;  %v7900_v60 = vld [vmem:[#allocation8 + $0x68] sm:$0xff]  }
 0x2f9   :  { %7187 = vmatprep.subr.bf16.mxu0 %v8210_v30  ;;  %7172 = vmatpush3.bf16.msra.mxu1 %v7881_v57  ;;  %v7906_v57 = vld [vmem:[#allocation8 + $0x50] sm:$0xff]  }
 0x2fa   :  { %7197 = vmatprep.subr.bf16.mxu1 %v8210_v30 }
 0x2fc   :  { %7188 = vmatpush3.bf16.msra.mxu0 %v7882_v38  ;;  %7174 = vmatmul.mubr.bf16.vlgmr.msra.gmra.mxu1 %v6524_v23 }
 0x2fd   :  { %7189 = vmatprep.subr.bf16.mxu0 %v8210_v30  ;;  %7198 = vmatpush3.bf16.msra.mxu1 %v7883_v17 }
 0x2fe   :  { %7213 = vmatprep.mubr.msk.bf16.mxu1 %vm8211_vm5, %v8210_v30  ;;  %7199 = vmatprep.subr.bf16.mxu1 %v8210_v30 }
 0x300   :  { %7190 = vmatpush3.bf16.msra.mxu0 %v7884_v25 }
 0x301   :  { %7191 = vmatprep.subr.bf16.mxu0 %v8210_v30  ;;  %7200 = vmatpush3.bf16.msra.mxu1 %v7885_v42 }
 0x302   :  { %7201 = vmatprep.subr.bf16.mxu1 %v8210_v30 }
 0x304   :  { %7192 = vmatpush3.bf16.msra.mxu0 %v7886_v4 }
 0x305   :  { %7217 = vmatprep.subr.bf16.mxu0 %v8210_v30  ;;  %7202 = vmatpush3.bf16.msra.mxu1 %v7887_v14 }
 0x306   :  { %7203 = vmatprep.subr.bf16.mxu1 %v8210_v30 }
 0x307   :  { %7194 = vmatmul.mubr.bf16.vlgmr.msra.gmra.mxu0 %v6549_v39 }
 0x308   :  { %7233 = vmatprep.mubr.msk.bf16.mxu0 %vm8211_vm5, %v8210_v30  ;;  %7218 = vmatpush3.bf16.msra.mxu0 %v7893_v45 }
 0x309   :  { %7204 = vmatpush3.bf16.msra.mxu1 %v7888_v20  ;;  %7219 = vmatprep.subr.bf16.mxu0 %v8210_v30 }
 0x30a   :  { %7205 = vmatprep.subr.bf16.mxu1 %v8210_v30 }
 0x30c   :  { %7220 = vmatpush3.bf16.msra.mxu0 %v7894_v59 }
 0x30d   :  { %7206 = vmatpush3.bf16.msra.mxu1 %v7889_v37  ;;  %7221 = vmatprep.subr.bf16.mxu0 %v8210_v30 }
 0x30e   :  { %7207 = vmatprep.subr.bf16.mxu1 %v8210_v30 }
 0x310   :  { %7222 = vmatpush3.bf16.msra.mxu0 %v7895_v61 }
 0x311   :  { %7208 = vmatpush3.bf16.msra.mxu1 %v7890_v5  ;;  %7223 = vmatprep.subr.bf16.mxu0 %v8210_v30 }
 0x312   :  { %7209 = vmatprep.subr.bf16.mxu1 %v8210_v30 }
 0x314   :  { %7224 = vmatpush3.bf16.msra.mxu0 %v7897_v0 }
 0x315   :  { %7210 = vmatpush3.bf16.msra.mxu1 %v7891_v16  ;;  %7225 = vmatprep.subr.bf16.mxu0 %v8210_v30 }
 0x316   :  { %7211 = vmatprep.subr.bf16.mxu1 %v8210_v30 }
 0x318   :  { %7226 = vmatpush3.bf16.msra.mxu0 %v7899_v63 }
 0x319   :  { %7212 = vmatpush3.bf16.msra.mxu1 %v7892_v41  ;;  %7227 = vmatprep.subr.bf16.mxu0 %v8210_v30 }
 0x31a   :  { %7237 = vmatprep.subr.bf16.mxu1 %v8210_v30 }
 0x31c   :  { %7214 = vmatmul.mubr.bf16.vlgmr.msra.gmra.mxu1 %v6576_v44  ;;  %7228 = vmatpush3.bf16.msra.mxu0 %v7901_v36 }
 0x31d   :  { %7253 = vmatprep.mubr.msk.bf16.mxu1 %vm8211_vm5, %v8210_v30  ;;  %7238 = vmatpush3.bf16.msra.mxu1 %v7896_v35 }
 0x31e   :  { %7239 = vmatprep.subr.bf16.mxu1 %v8210_v30  ;;  %7229 = vmatprep.subr.bf16.mxu0 %v8210_v30 }
 0x320   :  { %7230 = vmatpush3.bf16.msra.mxu0 %v7903_v9 }
 0x321   :  { %7240 = vmatpush3.bf16.msra.mxu1 %v7898_v40  ;;  %7231 = vmatprep.subr.bf16.mxu0 %v8210_v30 }
 0x322   :  { %7241 = vmatprep.subr.bf16.mxu1 %v8210_v30 }
 0x324   :  { %7232 = vmatpush3.bf16.msra.mxu0 %v7905_v24 }
 0x325   :  { %7242 = vmatpush3.bf16.msra.mxu1 %v7900_v60  ;;  %7257 = vmatprep.subr.bf16.mxu0 %v8210_v30  ;;  %v7908_v60 = vld [vmem:[#allocation8 + $0xb8] sm:$0xff]  }
 0x326   :  { %7243 = vmatprep.subr.bf16.mxu1 %v8210_v30 }
 0x329   :  { %7244 = vmatpush3.bf16.msra.mxu1 %v7902_v52 }
 0x32a   :  { %7245 = vmatprep.subr.bf16.mxu1 %v8210_v30 }
 0x32d   :  { %7246 = vmatpush3.bf16.msra.mxu1 %v7904_v32 }
 0x32e   :  { %7247 = vmatprep.subr.bf16.mxu1 %v8210_v30 }
 0x331   :  { %7248 = vmatpush3.bf16.msra.mxu1 %v7906_v57 }
 0x332   :  { %7249 = vmatprep.subr.bf16.mxu1 %v8210_v30 }
 0x335   :  { %7250 = vmatpush3.bf16.msra.mxu1 %v7909_v3 }
 0x336   :  { %7251 = vmatprep.subr.bf16.mxu1 %v8210_v30 }
 0x339   :  { %7252 = vmatpush3.bf16.msra.mxu1 %v7911_v55 }
 0x33a   :  { %7277 = vmatprep.subr.bf16.mxu1 %v8210_v30 }
 0x39b   :  { %v3040_v46 = vpop.f32.mrf.mxu1 }
 0x39c   :  { %v3047_v27 = vadd.f32 %v6471_v58, %v3040_v46 }
 0x39d   :  { %v7135_v48 = vpop.f32.mrf.mxu1 }
 0x39e   :  { %v7910_v48 = vld [vmem:[#allocation8 + $0xb0] sm:$0xff]  }
 0x39f   :  { %v3043_v62 = vpop.f32.mrf.mxu1 }
 0x3a0   :  { %v3048_v42 = vadd.f32 %v6471_v58, %v3043_v62  ;;  %v7914_v58 = vld [vmem:[#allocation8 + $0xa0] sm:$0xff]  }
 0x3a1   :  { %v7136_v11 = vpop.f32.mrf.mxu1 }
 0x3a7   :  { %v3184_v38 = vpop.f32.mrf.mxu0 }
 0x3a8   :  { %v3191_v28 = vadd.f32 %v3184_v38, %v3047_v27  ;;  %v7915_v27 = vld [vmem:[#allocation8 + $0xf0] sm:$0xff]  }
 0x3a9   :  { %v7155_v56 = vpop.f32.mrf.mxu0 }
 0x3ab   :  { %v3187_v54 = vpop.f32.mrf.mxu0 }
 0x3ac   :  { %v3192_v31 = vadd.f32 %v3187_v54, %v3048_v42  ;;  %v7918_v42 = vld [vmem:[#allocation8 + $0x90] sm:$0xff]  }
 0x3ad   :  { %v7156_v7 = vpop.f32.mrf.mxu0 }
 0x3bc   :  { %v3310_v34 = vpop.f32.mrf.mxu1 }
 0x3bd   :  { %v3317_v2 = vadd.f32 %v3310_v34, %v3191_v28  ;;  %v7912_v34 = vld [vmem:[#allocation8 + $0xa8] sm:$0xff]   ;;  %v7916_v28 = vld [vmem:[#allocation8 + $0x98] sm:$0xff]  }
 0x3be   :  { %v7175_v15 = vpop.f32.mrf.mxu1 }
 0x3c0   :  { %v3313_v17 = vpop.f32.mrf.mxu1 }
 0x3c1   :  { %v3318_v8 = vadd.f32 %v3313_v17, %v3192_v31  ;;  %v7919_v31 = vld [vmem:[#allocation8 + $0xe0] sm:$0xff]  }
 0x3c2   :  { %v7176_v50 = vpop.f32.mrf.mxu1 }
 0x3c7   :  { %v3463_v19 = vpop.f32.mrf.mxu0 }
 0x3c8   :  { %v3470_v4 = vadd.f32 %v3463_v19, %v3317_v2 }
 0x3c9   :  { %v7195_v21 = vpop.f32.mrf.mxu0 }
 0x3cb   :  { %v3466_v23 = vpop.f32.mrf.mxu0 }
 0x3cc   :  { %v3471_v18 = vadd.f32 %v3466_v23, %v3318_v8  ;;  %v7913_v23 = vld [vmem:[#allocation8 + $0xf8] sm:$0xff]  }
 0x3cd   :  { %v7196_v25 = vpop.f32.mrf.mxu0 }
 0x3dc   :  { %v3592_v6 = vpop.f32.mrf.mxu1 }
 0x3dd   :  { %v3599_v12 = vadd.f32 %v3592_v6, %v3470_v4  ;;  %v7920_v6 = vld [vmem:[#allocation8 + $0x88] sm:$0xff]  }
 0x3de   :  { %v7215_v14 = vpop.f32.mrf.mxu1 }
 0x3df   :  { %v3601_v39 = vsub.f32 0.0, %v3599_v12 }
 0x3e0   :  { %v3595_v20 = vpop.f32.mrf.mxu1 }
 0x3e1   :  { %v3603_v37 = vmul.f32 1.442695, %v3601_v39  ;;  %v3600_v5 = vadd.f32 %v3595_v20, %v3471_v18  ;;  %v7921_v39 = vld [vmem:[#allocation8 + $0xd8] sm:$0xff]  }
 0x3e2   :  { %v7216_v16 = vpop.f32.mrf.mxu1 }
 0x3e3   :  { %8102 = vpow2.f32 %v3603_v37  ;;  %v3602_v26 = vsub.f32 0.0, %v3600_v5 }
 0x3e5   :  { %v3605_v33 = vmul.f32 1.442695, %v3602_v26 }
 0x3e7   :  { %8104 = vpow2.f32 %v3605_v33  ;;  %v7922_v33 = vld [vmem:[#allocation8 + $0x80] sm:$0xff]  }
 0x3f0   :  { %v8103_v29 = vpop.eup %8102 }
 0x3f1   :  { %v3607_v41 = vadd.f32 1.0, %v8103_v29 }
 0x3f3   :  { %8106 = vrcp.f32 %v3607_v41 }
 0x3f4   :  { %v8105_v1 = vpop.eup %8104 }
 0x3f5   :  { %v3608_v43 = vadd.f32 1.0, %v8105_v1 }
 0x3f7   :  { %8108 = vrcp.f32 %v3608_v43 }
 0x400   :  { %v8107_v49 = vpop.eup %8106 }
 0x401   :  { %v6771_v51 = vpack.c.bf16 %v8107_v49, %v8107_v49 }
 0x403   :  { %v3619_v53 = vrot.slane %v6771_v51, 7 }
 0x404   :  { %v8109_v44 = vpop.eup %8108 }
 0x405   :  { %v3620_v45 = vrot.slane %v3619_v53, 4  ;;  %3627 = vst [vmem:[#allocation4] sm:$0xe] %v3619_v53  ;;  %v6772_v59 = vpack.c.bf16 %v8109_v44, %v8109_v44  ;;  %v7923_v53 = vld [vmem:[#allocation8 + $0xd0] sm:$0xff]  }
 0x407   :  { %3628 = vst [vmem:[#allocation4 + $0x4] sm:$0x1] %v3620_v45  ;;  %v3621_v61 = vrot.slane %v6772_v59, 7 }
 0x409   :  { %v3622_v35 = vrot.slane %v3621_v61, 4  ;;  %3629 = vst [vmem:[#allocation4 + $0x8] sm:$0xe] %v3621_v61 }
 0x40b   :  { %3630 = vst [vmem:[#allocation4 + $0xc] sm:$0x1] %v3622_v35 }
 0x40c   :  { %v3753_v0 = vld [vmem:[#allocation4] sm:$0xf] }
 0x40d   :  { %v3758_v40 = vshrl.u32 %v3753_v0, 16  ;;  %v3761_v63 = vshll.u32 %v3753_v0, 16  ;;  %v3897_v4 = vld [vmem:[#allocation4] sm:$0xe]  ;;  %v7924_v0 = vld [vmem:[#allocation8 + $0x138] sm:$0xff]  }
 0x40e   :  { %v9330_v36 = vld [vmem:[#allocation4 + $0x4] sm:$0x1]  ;;  %v4026_v18 = vshrl.u32 %v3897_v4, 16  ;;  %v4029_v37 = vshll.u32 %v3897_v4, 16  ;;  %v6606_v49 = vrot.slane %v3897_v4, 9  ;;  %v7939_v4 = vld [vmem:[#allocation10 + $0x68] sm:$0xff]  }
 0x40f   :  { %v3760_v52 = vrot.slane %v3758_v40, 4  ;;  %v3763_v9 = vrot.slane %v3761_v63, 5  ;;  %v3767_v62 = vshll.u32 %v9330_v36, 16  ;;  %v3905_v5 = vrot.slane %v9330_v36, 5  ;;  %v9358_v26 = vld [vmem:[#allocation4 + $0x4] sm:$0x3] }
 0x410   :  { %v7907_v32 = vld [vmem:[#allocation4] ss:$8 sps:$4 sm:$0xff]   ;;  %v4028_v51 = vrot.slane %v4026_v18, 5  ;;  %v4031_v45 = vrot.slane %v4029_v37, 6  ;;  %v4035_v59 = vshrl.u32 %v9358_v26, 16  ;;  %v4038_v61 = vshll.u32 %v9358_v26, 16 }
 0x411   :  { %v3755_v24 = vld [vmem:[#allocation4 + $0x8] sm:$0xf]  ;;  %v3764_v57 = vor.u32 %v3763_v9, %v3760_v52  ;;  %7234 = vmatmul.mubr.bf16.vlgmr.msra.gmra.mxu0 %v7907_v32  ;;  %v3769_v15 = vrot.slane %v3767_v62, 5  ;;  %v3906_v35 = vsel %vm9060_vm4, %v6606_v49, %v3905_v5  ;;  %v7925_v52 = vld [vmem:[#allocation8 + $0xc8] sm:$0xff]   ;;  %v7944_v18 = vld [vmem:[#allocation10 + $0x10] sm:$0xff]  }
 0x412   :  { %v3772_v3 = vshrl.u32 %v3755_v24, 16  ;;  %v3775_v46 = vshll.u32 %v3755_v24, 16  ;;  %v9332_v55 = vld [vmem:[#allocation4 + $0xc] sm:$0x1]  ;;  %7258 = vmatpush3.bf16.msra.mxu0 %v7908_v60  ;;  %7273 = vmatprep.mubr.msk.bf16.mxu0 %vm8211_vm5, %v8210_v30  ;;  %v3898_v2 = vld [vmem:[#allocation4 + $0x8] sm:$0xe]  ;;  %v4032_v9 = vor.u32 %v4031_v45, %v4028_v51 }
 0x413   :  { %v3781_v56 = vshll.u32 %v9332_v55, 16  ;;  %7259 = vmatprep.subr.bf16.mxu0 %v8210_v30  ;;  %v3765_v54 = vrot.slane %v3764_v57, 4  ;;  %v4044_v8 = vshrl.u32 %v3898_v2, 16  ;;  %v4047_v12 = vshll.u32 %v3898_v2, 16  ;;  %v9353_v14 = vld [vmem:[#allocation4 + $0xc] sm:$0x3] }
 0x414   :  { %v3774_v11 = vrot.slane %v3772_v3, 4  ;;  %v3777_v38 = vrot.slane %v3775_v46, 5  ;;  %v3909_v20 = vrot.slane %v9332_v55, 5  ;;  %v6607_v16 = vrot.slane %v3898_v2, 9  ;;  %v7926_v57 = vld [vmem:[#allocation8 + $0x130] sm:$0xff]   ;;  %v7927_v46 = vld [vmem:[#allocation8 + $0xc0] sm:$0xff]  }
 0x415   :  { %v3783_v50 = vrot.slane %v3781_v56, 5  ;;  %v3770_v19 = vsel %vm8850_vm2, %v3765_v54, %v3769_v15  ;;  %v4046_v29 = vrot.slane %v4044_v8, 5  ;;  %v4049_v41 = vrot.slane %v4047_v12, 6  ;;  %v7929_v54 = vld [vmem:[#allocation8 + $0x120] sm:$0xff]   ;;  %v4174_v15 = vld [vmem:[#allocation4 + $0x8] sm:$0xc] }
 0x416   :  { %v3778_v7 = vor.u32 %v3777_v38, %v3774_v11  ;;  %7260 = vmatpush3.bf16.msra.mxu0 %v7910_v48  ;;  %v4053_v1 = vshrl.u32 %v9353_v14, 16  ;;  %v4056_v43 = vshll.u32 %v9353_v14, 16  ;;  %v3910_v44 = vsel %vm9060_vm4, %v6607_v16, %v3909_v20  ;;  %v7928_v11 = vld [vmem:[#allocation8 + $0x128] sm:$0xff]   ;;  %v7936_v2 = vld [vmem:[#allocation10 + $0x30] sm:$0xff]   ;;  %v7941_v8 = vld [vmem:[#allocation10 + $0x60] sm:$0xff]  }
 0x417   :  { %7261 = vmatprep.subr.bf16.mxu0 %v8210_v30  ;;  %v4050_v40 = vor.u32 %v4049_v41, %v4046_v29  ;;  %v6608_v36 = vcombine.low %v3906_v35, %v3910_v44  ;;  %v4037_v32 = vrot.slane %v4035_v59, 5  ;;  %v4040_v24 = vrot.slane %v4038_v61, 6  ;;  %v7942_v12 = vld [vmem:[#allocation10 + $0x18] sm:$0xff]   ;;  %v7946_v20 = vld [vmem:[#allocation10 + $0x8] sm:$0xff]   ;;  %v7948_v5 = vld [vmem:[#allocation10] sm:$0xff]  }
 0x418   :  { %v3779_v17 = vrot.slane %v3778_v7, 4  ;;  %v4055_v63 = vrot.slane %v4053_v1, 5  ;;  %v4058_v60 = vrot.slane %v4056_v43, 6  ;;  %v4033_v55 = vrot.slane %v4032_v9, 4  ;;  %v7930_v7 = vld [vmem:[#allocation8 + $0x118] sm:$0xff]   ;;  %v7947_v37 = vld [vmem:[#allocation10 + $0x48] sm:$0xff]  }
 0x419   :  { %v4051_v3 = vrot.slane %v4050_v40, 4  ;;  %v4041_v48 = vor.u32 %v4040_v24, %v4037_v32  ;;  %v7949_v16 = vld [vmem:[#allocation10 + $0x40] sm:$0xff]  }
 0x41a   :  { %v3784_v21 = vsel %vm8850_vm2, %v3779_v17, %v3783_v50  ;;  %7262 = vmatpush3.bf16.msra.mxu0 %v7912_v34  ;;  %v4059_v22 = vor.u32 %v4058_v60, %v4055_v63  ;;  %v7931_v34 = vld [vmem:[#allocation8 + $0x110] sm:$0xff]   ;;  %v4185_v17 = vrot.slane %v9353_v14, 6  ;;  %v7943_v14 = vld [vmem:[#allocation10 + $0x58] sm:$0xff]   ;;  %v6587_v63 = vld [vmem:[%s9606_s9] ss:$0 sm:$0xff]  ;;  %vm5177_vm2 = vcmask 811008  }
 0x41b   :  { %v6597_v25 = vcombine.low %v3770_v19, %v3784_v21  ;;  %7263 = vmatprep.subr.bf16.mxu0 %v8210_v30  ;;  %v4042_v38 = vsel %vm9263_vm8, %v4033_v55, %v4041_v48  ;;  %v4173_v50 = vld [vmem:[#allocation4] sm:$0xc]  ;;  %v7933_v19 = vld [vmem:[#allocation8 + $0x100] sm:$0xff]   ;;  %v4181_v21 = vrot.slane %v9358_v26, 6 }
 0x41c   :  { %v4060_v62 = vsel %vm9263_vm8, %v4051_v3, %v4059_v22 }
 0x41d   :  { %7254 = vmatmul.mubr.bf16.vlgmr.msra.gmra.mxu1 %v6597_v25  ;;  %v6617_v56 = vcombine.low %v4042_v38, %v4060_v62  ;;  %v6626_v25 = vrot.slane %v4173_v50, 10 }
 0x41e   :  { %7278 = vmatpush3.bf16.msra.mxu1 %v7913_v23  ;;  %7293 = vmatprep.mubr.msk.bf16.mxu1 %vm8211_vm5, %v8210_v30  ;;  %v6627_v23 = vrot.slane %v4174_v15, 10 }
 0x41f   :  { %7279 = vmatprep.subr.bf16.mxu1 %v8210_v30  ;;  %7264 = vmatpush3.bf16.msra.mxu0 %v7914_v58 }
 0x420   :  { %7265 = vmatprep.subr.bf16.mxu0 %v8210_v30  ;;  %v4186_v58 = vsel %vm9300_vm11, %v6627_v23, %v4185_v17 }
 0x422   :  { %7280 = vmatpush3.bf16.msra.mxu1 %v7915_v27  ;;  %v4182_v27 = vsel %vm9300_vm11, %v6626_v25, %v4181_v21  ;;  %v7950_v21 = vld [vmem:[#allocation10 + $0xb8] sm:$0xff]  }
 0x423   :  { %7281 = vmatprep.subr.bf16.mxu1 %v8210_v30  ;;  %7266 = vmatpush3.bf16.msra.mxu0 %v7916_v28  ;;  %v6628_v28 = vcombine.low %v4182_v27, %v4186_v58  ;;  %v7951_v25 = vld [vmem:[#allocation10 + $0xf8] sm:$0xff]   ;;  %v7952_v27 = vld [vmem:[#allocation10 + $0xb0] sm:$0xff]  }
 0x424   :  { %7267 = vmatprep.subr.bf16.mxu0 %v8210_v30 }
 0x426   :  { %7282 = vmatpush3.bf16.msra.mxu1 %v7917_v13  ;;  %v7934_v13 = vld [vmem:[#allocation10 + $0x38] sm:$0xff]  }
 0x427   :  { %7283 = vmatprep.subr.bf16.mxu1 %v8210_v30  ;;  %7268 = vmatpush3.bf16.msra.mxu0 %v7918_v42  ;;  %v7935_v42 = vld [vmem:[#allocation10 + $0x78] sm:$0xff]  }
 0x428   :  { %7269 = vmatprep.subr.bf16.mxu0 %v8210_v30 }
 0x42a   :  { %7284 = vmatpush3.bf16.msra.mxu1 %v7919_v31  ;;  %v7937_v31 = vld [vmem:[#allocation10 + $0x70] sm:$0xff]  }
 0x42b   :  { %7285 = vmatprep.subr.bf16.mxu1 %v8210_v30  ;;  %7270 = vmatpush3.bf16.msra.mxu0 %v7920_v6  ;;  %v7940_v6 = vld [vmem:[#allocation10 + $0x20] sm:$0xff]  }
 0x42c   :  { %7271 = vmatprep.subr.bf16.mxu0 %v8210_v30 }
 0x42e   :  { %7286 = vmatpush3.bf16.msra.mxu1 %v7921_v39  ;;  %v7945_v39 = vld [vmem:[#allocation10 + $0x50] sm:$0xff]  }
 0x42f   :  { %7287 = vmatprep.subr.bf16.mxu1 %v8210_v30  ;;  %7272 = vmatpush3.bf16.msra.mxu0 %v7922_v33 }
 0x430   :  { %7297 = vmatprep.subr.bf16.mxu0 %v8210_v30 }
 0x432   :  { %7288 = vmatpush3.bf16.msra.mxu1 %v7923_v53  ;;  %7274 = vmatmul.mubr.bf16.vlgmr.msra.gmra.mxu0 %v6608_v36 }
 0x433   :  { %7289 = vmatprep.subr.bf16.mxu1 %v8210_v30  ;;  %7298 = vmatpush3.bf16.msra.mxu0 %v7924_v0 }
 0x434   :  { %7313 = vmatprep.mubr.msk.bf16.mxu0 %vm8211_vm5, %v8210_v30  ;;  %7299 = vmatprep.subr.bf16.mxu0 %v8210_v30 }
 0x436   :  { %7290 = vmatpush3.bf16.msra.mxu1 %v7925_v52 }
 0x437   :  { %7291 = vmatprep.subr.bf16.mxu1 %v8210_v30  ;;  %7300 = vmatpush3.bf16.msra.mxu0 %v7926_v57 }
 0x438   :  { %7301 = vmatprep.subr.bf16.mxu0 %v8210_v30 }
 0x43a   :  { %7292 = vmatpush3.bf16.msra.mxu1 %v7927_v46 }
 0x43b   :  { %7317 = vmatprep.subr.bf16.mxu1 %v8210_v30  ;;  %7302 = vmatpush3.bf16.msra.mxu0 %v7928_v11 }
 0x43c   :  { %7303 = vmatprep.subr.bf16.mxu0 %v8210_v30 }
 0x43d   :  { %7294 = vmatmul.mubr.bf16.vlgmr.msra.gmra.mxu1 %v6617_v56 }
 0x43e   :  { %7333 = vmatprep.mubr.msk.bf16.mxu1 %vm8211_vm5, %v8210_v30  ;;  %7318 = vmatpush3.bf16.msra.mxu1 %v7934_v13  ;;  %v7954_v13 = vld [vmem:[#allocation10 + $0xa8] sm:$0xff]  }
 0x43f   :  { %7304 = vmatpush3.bf16.msra.mxu0 %v7929_v54  ;;  %7319 = vmatprep.subr.bf16.mxu1 %v8210_v30 }
 0x440   :  { %7305 = vmatprep.subr.bf16.mxu0 %v8210_v30 }
 0x442   :  { %7320 = vmatpush3.bf16.msra.mxu1 %v7936_v2  ;;  %v7956_v2 = vld [vmem:[#allocation10 + $0xa0] sm:$0xff]  }
 0x443   :  { %7306 = vmatpush3.bf16.msra.mxu0 %v7930_v7  ;;  %7321 = vmatprep.subr.bf16.mxu1 %v8210_v30 }
 0x444   :  { %7307 = vmatprep.subr.bf16.mxu0 %v8210_v30 }
 0x446   :  { %7322 = vmatpush3.bf16.msra.mxu1 %v7938_v47  ;;  %v7958_v47 = vld [vmem:[#allocation10 + $0x98] sm:$0xff]  }
 0x447   :  { %7308 = vmatpush3.bf16.msra.mxu0 %v7931_v34  ;;  %7323 = vmatprep.subr.bf16.mxu1 %v8210_v30 }
 0x448   :  { %7309 = vmatprep.subr.bf16.mxu0 %v8210_v30 }
 0x44a   :  { %7324 = vmatpush3.bf16.msra.mxu1 %v7940_v6  ;;  %v7960_v6 = vld [vmem:[#allocation10 + $0x90] sm:$0xff]  }
 0x44b   :  { %7310 = vmatpush3.bf16.msra.mxu0 %v7932_v10  ;;  %7325 = vmatprep.subr.bf16.mxu1 %v8210_v30 }
 0x44c   :  { %7311 = vmatprep.subr.bf16.mxu0 %v8210_v30 }
 0x44e   :  { %7326 = vmatpush3.bf16.msra.mxu1 %v7942_v12  ;;  %v7962_v12 = vld [vmem:[#allocation10 + $0x88] sm:$0xff]  }
 0x44f   :  { %7312 = vmatpush3.bf16.msra.mxu0 %v7933_v19  ;;  %7327 = vmatprep.subr.bf16.mxu1 %v8210_v30 }
 0x450   :  { %7337 = vmatprep.subr.bf16.mxu0 %v8210_v30 }
 0x452   :  { %7314 = vmatmul.mubr.bf16.vlgmr.msra.gmra.mxu0 %v6628_v28  ;;  %7328 = vmatpush3.bf16.msra.mxu1 %v7944_v18  ;;  %v7953_v28 = vld [vmem:[#allocation10 + $0xf0] sm:$0xff]   ;;  %v7964_v18 = vld [vmem:[#allocation10 + $0x80] sm:$0xff]  }
 0x453   :  { %7353 = vmatprep.mubr.msk.bf16.mxu0 %vm8211_vm5, %v8210_v30  ;;  %7338 = vmatpush3.bf16.msra.mxu0 %v7935_v42  ;;  %v7955_v42 = vld [vmem:[#allocation10 + $0xe8] sm:$0xff]  }
 0x454   :  { %7339 = vmatprep.subr.bf16.mxu0 %v8210_v30  ;;  %7329 = vmatprep.subr.bf16.mxu1 %v8210_v30 }
 0x456   :  { %7330 = vmatpush3.bf16.msra.mxu1 %v7946_v20  ;;  %v7966_v20 = vld [vmem:[#allocation10 + $0x138] sm:$0xff]  }
 0x457   :  { %7340 = vmatpush3.bf16.msra.mxu0 %v7937_v31  ;;  %7331 = vmatprep.subr.bf16.mxu1 %v8210_v30  ;;  %v7957_v31 = vld [vmem:[#allocation10 + $0xe0] sm:$0xff]  }
 0x458   :  { %7341 = vmatprep.subr.bf16.mxu0 %v8210_v30 }
 0x45a   :  { %7332 = vmatpush3.bf16.msra.mxu1 %v7948_v5  ;;  %v7967_v5 = vld [vmem:[#allocation10 + $0x178] sm:$0xff]  }
 0x45b   :  { %7342 = vmatpush3.bf16.msra.mxu0 %v7939_v4  ;;  %7357 = vmatprep.subr.bf16.mxu1 %v8210_v30  ;;  %v7959_v4 = vld [vmem:[#allocation10 + $0xd8] sm:$0xff]  }
 0x45c   :  { %7343 = vmatprep.subr.bf16.mxu0 %v8210_v30 }
 0x45f   :  { %7344 = vmatpush3.bf16.msra.mxu0 %v7941_v8  ;;  %v7961_v8 = vld [vmem:[#allocation10 + $0xd0] sm:$0xff]  }
 0x460   :  { %7345 = vmatprep.subr.bf16.mxu0 %v8210_v30 }
 0x463   :  { %7346 = vmatpush3.bf16.msra.mxu0 %v7943_v14  ;;  %v7963_v14 = vld [vmem:[#allocation10 + $0xc8] sm:$0xff]  }
 0x464   :  { %7347 = vmatprep.subr.bf16.mxu0 %v8210_v30 }
 0x467   :  { %7348 = vmatpush3.bf16.msra.mxu0 %v7945_v39  ;;  %v7965_v39 = vld [vmem:[#allocation10 + $0xc0] sm:$0xff]  }
 0x468   :  { %7349 = vmatprep.subr.bf16.mxu0 %v8210_v30 }
 0x46b   :  { %7350 = vmatpush3.bf16.msra.mxu0 %v7947_v37 }
 0x46c   :  { %7351 = vmatprep.subr.bf16.mxu0 %v8210_v30 }
 0x46f   :  { %7352 = vmatpush3.bf16.msra.mxu0 %v7949_v16 }
 0x470   :  { %7377 = vmatprep.subr.bf16.mxu0 %v8210_v30 }
 0x4d1   :  { %v3744_v26 = vpop.f32.mrf.mxu0 }
 0x4d2   :  { %v3751_v60 = vadd.f32 %v6587_v63, %v3744_v26  ;;  %v7968_v26 = vld [vmem:[#allocation10 + $0x130] sm:$0xff]  }
 0x4d3   :  { %v7235_v33 = vpop.f32.mrf.mxu0 }
 0x4d4   :  { %v7969_v33 = vld [vmem:[#allocation10 + $0x170] sm:$0xff]  }
 0x4d5   :  { %v3747_v29 = vpop.f32.mrf.mxu0 }
 0x4d6   :  { %v3752_v52 = vadd.f32 %v6587_v63, %v3747_v29  ;;  %v7970_v29 = vld [vmem:[#allocation10 + $0x128] sm:$0xff]   ;;  %v7983_v63 = vld [vmem:[#allocation10 + $0x1f8] sm:$0xff]  }
 0x4d7   :  { %v7236_v41 = vpop.f32.mrf.mxu0 }
 0x4d8   :  { %v7971_v41 = vld [vmem:[#allocation10 + $0x168] sm:$0xff]  }
 0x4dd   :  { %v3888_v1 = vpop.f32.mrf.mxu1 }
 0x4de   :  { %v3895_v36 = vadd.f32 %v3888_v1, %v3751_v60  ;;  %v7972_v1 = vld [vmem:[#allocation10 + $0x120] sm:$0xff]  }
 0x4df   :  { %v7255_v43 = vpop.f32.mrf.mxu1 }
 0x4e0   :  { %v7973_v43 = vld [vmem:[#allocation10 + $0x160] sm:$0xff]  }
 0x4e1   :  { %v3891_v49 = vpop.f32.mrf.mxu1 }
 0x4e2   :  { %v3896_v32 = vadd.f32 %v3891_v49, %v3752_v52  ;;  %v7974_v49 = vld [vmem:[#allocation10 + $0x118] sm:$0xff]   ;;  %v7985_v52 = vld [vmem:[#allocation10 + $0x1f0] sm:$0xff]  }
 0x4e3   :  { %v7256_v51 = vpop.f32.mrf.mxu1 }
 0x4e4   :  { %v7975_v51 = vld [vmem:[#allocation10 + $0x158] sm:$0xff]  }
 0x4f2   :  { %v4014_v53 = vpop.f32.mrf.mxu0 }
 0x4f3   :  { %v4021_v9 = vadd.f32 %v4014_v53, %v3895_v36  ;;  %v7976_v53 = vld [vmem:[#allocation10 + $0x110] sm:$0xff]  }
 0x4f4   :  { %v7275_v44 = vpop.f32.mrf.mxu0  ;;  %v7984_v36 = vld [vmem:[#allocation10 + $0x1b0] sm:$0xff]  }
 0x4f5   :  { %v7977_v44 = vld [vmem:[#allocation10 + $0x150] sm:$0xff]  }
 0x4f6   :  { %v4017_v45 = vpop.f32.mrf.mxu0 }
 0x4f7   :  { %v4022_v3 = vadd.f32 %v4017_v45, %v3896_v32  ;;  %v7978_v45 = vld [vmem:[#allocation10 + $0x108] sm:$0xff]  }
 0x4f8   :  { %v7276_v59 = vpop.f32.mrf.mxu0  ;;  %v7987_v32 = vld [vmem:[#allocation10 + $0x1e8] sm:$0xff]  }
 0x4f9   :  { %v7979_v59 = vld [vmem:[#allocation10 + $0x148] sm:$0xff]  }
 0x4fd   :  { %v4164_v61 = vpop.f32.mrf.mxu1 }
 0x4fe   :  { %v4171_v24 = vadd.f32 %v4164_v61, %v4021_v9  ;;  %v7980_v61 = vld [vmem:[#allocation10 + $0x100] sm:$0xff]   ;;  %v7986_v9 = vld [vmem:[#allocation10 + $0x1a8] sm:$0xff]  }
 0x4ff   :  { %v7295_v35 = vpop.f32.mrf.mxu1 }
 0x500   :  { %v7981_v35 = vld [vmem:[#allocation10 + $0x140] sm:$0xff]  }
 0x501   :  { %v4167_v0 = vpop.f32.mrf.mxu1 }
 0x502   :  { %v4172_v55 = vadd.f32 %v4167_v0, %v4022_v3  ;;  %v7982_v0 = vld [vmem:[#allocation10 + $0x1b8] sm:$0xff]  }
 0x503   :  { %v7296_v40 = vpop.f32.mrf.mxu1  ;;  %v7990_v3 = vld [vmem:[#allocation10 + $0x198] sm:$0xff]  }
 0x512   :  { %v4290_v57 = vpop.f32.mrf.mxu0 }
 0x513   :  { %v4297_v22 = vadd.f32 %v4290_v57, %v4171_v24  ;;  %v7988_v24 = vld [vmem:[#allocation10 + $0x1a0] sm:$0xff]  }
 0x514   :  { %v7315_v46 = vpop.f32.mrf.mxu0  ;;  %v7989_v57 = vld [vmem:[#allocation10 + $0x1e0] sm:$0xff]  }
 0x515   :  { %v4299_v48 = vsub.f32 0.0, %v4297_v22  ;;  %v7991_v22 = vld [vmem:[#allocation10 + $0x1d8] sm:$0xff]   ;;  %v7992_v46 = vld [vmem:[#allocation10 + $0x190] sm:$0xff]  }
 0x516   :  { %v4293_v62 = vpop.f32.mrf.mxu0 }
 0x517   :  { %v4301_v11 = vmul.f32 1.442695, %v4299_v48  ;;  %v4298_v38 = vadd.f32 %v4293_v62, %v4172_v55  ;;  %v7993_v55 = vld [vmem:[#allocation10 + $0x1d0] sm:$0xff]   ;;  %v7994_v48 = vld [vmem:[#allocation10 + $0x188] sm:$0xff]  }
 0x518   :  { %v7316_v56 = vpop.f32.mrf.mxu0  ;;  %v7995_v62 = vld [vmem:[#allocation10 + $0x1c8] sm:$0xff]  }
 0x519   :  { %8110 = vpow2.f32 %v4301_v11  ;;  %v4300_v54 = vsub.f32 0.0, %v4298_v38  ;;  %v7996_v11 = vld [vmem:[#allocation10 + $0x180] sm:$0xff]   ;;  %v7998_v56 = vld [vmem:[#allocation10 + $0x38] sm:$0xff]  }
 0x51a   :  { %v7997_v38 = vld [vmem:[#allocation10 + $0x1c0] sm:$0xff]  }
 0x51b   :  { %v4303_v7 = vmul.f32 1.442695, %v4300_v54 }
 0x51d   :  { %8112 = vpow2.f32 %v4303_v7  ;;  %v7999_v7 = vld [vmem:[#allocation10 + $0x78] sm:$0xff]  }
 0x526   :  { %v8111_v34 = vpop.eup %8110 }
 0x527   :  { %v4305_v10 = vadd.f32 1.0, %v8111_v34 }
 0x529   :  { %8114 = vrcp.f32 %v4305_v10  ;;  %v8000_v10 = vld [vmem:[#allocation10 + $0x30] sm:$0xff]  }
 0x52a   :  { %v8113_v15 = vpop.eup %8112 }
 0x52b   :  { %v4306_v17 = vadd.f32 1.0, %v8113_v15  ;;  %v8001_v15 = vld [vmem:[#allocation10 + $0x70] sm:$0xff]  }
 0x52d   :  { %8116 = vrcp.f32 %v4306_v17  ;;  %v8002_v17 = vld [vmem:[#allocation10 + $0x28] sm:$0xff]  }
 0x536   :  { %v8115_v50 = vpop.eup %8114 }
 0x537   :  { %4309 = vst [vmem:[%s9609_s12] sm:$0xff] %v8115_v50 }
 0x53a   :  { %v8117_v19 = vpop.eup %8116 }
 0x53b   :  { %4310 = vst [vmem:[%s9609_s12 + $0x8] sm:$0xff] %v8117_v19  ;;  %v9423_v23 = vpack.c.bf16 %v8117_v19, %v8115_v50  ;;  %v8003_v50 = vld [vmem:[#allocation10 + $0x68] sm:$0xff]   ;;  %v8004_v19 = vld [vmem:[#allocation10 + $0x20] sm:$0xff]  }
 0x53d   :  { %7334 = vmatmul.mubr.bf16.vlgmr.msra.gmra.mxu1 %v9423_v23  ;;  %v9427_v58 = vshrl.u32 %v9423_v23, 16  ;;  %v4546_v37 = vrot.slane %v9423_v23, 1  ;;  %v4762_v40 = vrot.slane %v9423_v23, 2  ;;  %v4978_v54 = vrot.slane %v9423_v23, 3 }
 0x53e   :  { %7358 = vmatpush3.bf16.msra.mxu1 %v7950_v21  ;;  %7373 = vmatprep.mubr.msk.bf16.mxu1 %vm8211_vm5, %v8210_v30  ;;  %v8005_v21 = vld [vmem:[#allocation10 + $0x60] sm:$0xff]  }
 0x53f   :  { %7354 = vmatmul.mubr.bf16.vlgmr.msra.gmra.mxu0 %v9427_v58  ;;  %7359 = vmatprep.subr.bf16.mxu1 %v8210_v30  ;;  %v4654_v16 = vrot.slane %v9427_v58, 1  ;;  %v4870_v60 = vrot.slane %v9427_v58, 2  ;;  %v5086_v34 = vrot.slane %v9427_v58, 3 }
 0x540   :  { %7378 = vmatpush3.bf16.msra.mxu0 %v7951_v25  ;;  %7393 = vmatprep.mubr.msk.bf16.mxu0 %vm8211_vm5, %v8210_v30  ;;  %v8006_v25 = vld [vmem:[#allocation10 + $0x18] sm:$0xff]  }
 0x541   :  { %7379 = vmatprep.subr.bf16.mxu0 %v8210_v30 }
 0x542   :  { %7360 = vmatpush3.bf16.msra.mxu1 %v7952_v27  ;;  %v8007_v27 = vld [vmem:[#allocation10 + $0x58] sm:$0xff]  }
 0x543   :  { %7361 = vmatprep.subr.bf16.mxu1 %v8210_v30 }
 0x544   :  { %7380 = vmatpush3.bf16.msra.mxu0 %v7953_v28  ;;  %v8008_v28 = vld [vmem:[#allocation10 + $0x10] sm:$0xff]  }
 0x545   :  { %7381 = vmatprep.subr.bf16.mxu0 %v8210_v30 }
 0x546   :  { %7362 = vmatpush3.bf16.msra.mxu1 %v7954_v13  ;;  %v8009_v13 = vld [vmem:[#allocation10 + $0x50] sm:$0xff]  }
 0x547   :  { %7363 = vmatprep.subr.bf16.mxu1 %v8210_v30 }
 0x548   :  { %7382 = vmatpush3.bf16.msra.mxu0 %v7955_v42  ;;  %v8010_v42 = vld [vmem:[#allocation10 + $0x8] sm:$0xff]  }
 0x549   :  { %7383 = vmatprep.subr.bf16.mxu0 %v8210_v30 }
 0x54a   :  { %7364 = vmatpush3.bf16.msra.mxu1 %v7956_v2  ;;  %v8011_v2 = vld [vmem:[#allocation10 + $0x48] sm:$0xff]  }
 0x54b   :  { %7365 = vmatprep.subr.bf16.mxu1 %v8210_v30 }
 0x54c   :  { %7384 = vmatpush3.bf16.msra.mxu0 %v7957_v31  ;;  %v8012_v31 = vld [vmem:[#allocation10] sm:$0xff]  }
 0x54d   :  { %7385 = vmatprep.subr.bf16.mxu0 %v8210_v30 }
 0x54e   :  { %7366 = vmatpush3.bf16.msra.mxu1 %v7958_v47  ;;  %v8013_v47 = vld [vmem:[#allocation10 + $0x40] sm:$0xff]  }
 0x54f   :  { %7367 = vmatprep.subr.bf16.mxu1 %v8210_v30 }
 0x550   :  { %7386 = vmatpush3.bf16.msra.mxu0 %v7959_v4  ;;  %v8014_v4 = vld [vmem:[#allocation10 + $0xb8] sm:$0xff]  }
 0x551   :  { %7387 = vmatprep.subr.bf16.mxu0 %v8210_v30 }
 0x552   :  { %7368 = vmatpush3.bf16.msra.mxu1 %v7960_v6  ;;  %v5195_v6 = vrot.slane %v9423_v23, 4 }
 0x553   :  { %7369 = vmatprep.subr.bf16.mxu1 %v8210_v30 }
 0x554   :  { %7388 = vmatpush3.bf16.msra.mxu0 %v7961_v8  ;;  %v8015_v8 = vld [vmem:[#allocation10 + $0xf8] sm:$0xff]  }
 0x555   :  { %7389 = vmatprep.subr.bf16.mxu0 %v8210_v30 }
 0x556   :  { %7370 = vmatpush3.bf16.msra.mxu1 %v7962_v12  ;;  %v5302_v12 = vrot.slane %v9427_v58, 4 }
 0x557   :  { %7371 = vmatprep.subr.bf16.mxu1 %v8210_v30 }
 0x558   :  { %7390 = vmatpush3.bf16.msra.mxu0 %v7963_v14  ;;  %v8016_v14 = vld [vmem:[#allocation10 + $0xb0] sm:$0xff]  }
 0x559   :  { %7391 = vmatprep.subr.bf16.mxu0 %v8210_v30 }
 0x55a   :  { %7372 = vmatpush3.bf16.msra.mxu1 %v7964_v18  ;;  %v8017_v18 = vld [vmem:[#allocation10 + $0xf0] sm:$0xff]  }
 0x55b   :  { %7397 = vmatprep.subr.bf16.mxu1 %v8210_v30 }
 0x55c   :  { %7392 = vmatpush3.bf16.msra.mxu0 %v7965_v39  ;;  %v8018_v39 = vld [vmem:[#allocation10 + $0xa8] sm:$0xff]  }
 0x55d   :  { %7374 = vmatmul.mubr.bf16.vlgmr.msra.gmra.mxu1 %v4546_v37  ;;  %7417 = vmatprep.subr.bf16.mxu0 %v8210_v30  ;;  %v8020_v37 = vld [vmem:[#allocation10 + $0xa0] sm:$0xff]  }
 0x55e   :  { %7398 = vmatpush3.bf16.msra.mxu1 %v7966_v20  ;;  %7413 = vmatprep.mubr.msk.bf16.mxu1 %vm8211_vm5, %v8210_v30  ;;  %v8019_v20 = vld [vmem:[#allocation10 + $0xe8] sm:$0xff]  }
 0x55f   :  { %7394 = vmatmul.mubr.bf16.vlgmr.msra.gmra.mxu0 %v4654_v16  ;;  %7399 = vmatprep.subr.bf16.mxu1 %v8210_v30  ;;  %v8022_v16 = vld [vmem:[#allocation10 + $0x98] sm:$0xff]  }
 0x560   :  { %7418 = vmatpush3.bf16.msra.mxu0 %v7967_v5  ;;  %7433 = vmatprep.mubr.msk.bf16.mxu0 %vm8211_vm5, %v8210_v30  ;;  %v8021_v5 = vld [vmem:[#allocation10 + $0xe0] sm:$0xff]  }
 0x561   :  { %7419 = vmatprep.subr.bf16.mxu0 %v8210_v30 }
 0x562   :  { %7400 = vmatpush3.bf16.msra.mxu1 %v7968_v26  ;;  %v8023_v26 = vld [vmem:[#allocation10 + $0xd8] sm:$0xff]  }
 0x563   :  { %7401 = vmatprep.subr.bf16.mxu1 %v8210_v30 }
 0x564   :  { %7420 = vmatpush3.bf16.msra.mxu0 %v7969_v33  ;;  %v8024_v33 = vld [vmem:[#allocation10 + $0x90] sm:$0xff]  }
 0x565   :  { %7421 = vmatprep.subr.bf16.mxu0 %v8210_v30 }
 0x566   :  { %7402 = vmatpush3.bf16.msra.mxu1 %v7970_v29  ;;  %v8025_v29 = vld [vmem:[#allocation10 + $0xd0] sm:$0xff]  }
 0x567   :  { %7403 = vmatprep.subr.bf16.mxu1 %v8210_v30 }
 0x568   :  { %7422 = vmatpush3.bf16.msra.mxu0 %v7971_v41  ;;  %v8026_v41 = vld [vmem:[#allocation10 + $0x88] sm:$0xff]  }
 0x569   :  { %7423 = vmatprep.subr.bf16.mxu0 %v8210_v30 }
 0x56a   :  { %7404 = vmatpush3.bf16.msra.mxu1 %v7972_v1  ;;  %v8027_v1 = vld [vmem:[#allocation10 + $0xc8] sm:$0xff]  }
 0x56b   :  { %7405 = vmatprep.subr.bf16.mxu1 %v8210_v30 }
 0x56c   :  { %7424 = vmatpush3.bf16.msra.mxu0 %v7973_v43  ;;  %v8028_v43 = vld [vmem:[#allocation10 + $0x80] sm:$0xff]  }
 0x56d   :  { %7425 = vmatprep.subr.bf16.mxu0 %v8210_v30 }
 0x56e   :  { %7406 = vmatpush3.bf16.msra.mxu1 %v7974_v49  ;;  %v8029_v49 = vld [vmem:[#allocation10 + $0xc0] sm:$0xff]  }
 0x56f   :  { %7407 = vmatprep.subr.bf16.mxu1 %v8210_v30 }
 0x570   :  { %7426 = vmatpush3.bf16.msra.mxu0 %v7975_v51  ;;  %v8030_v51 = vld [vmem:[#allocation10 + $0x138] sm:$0xff]  }
 0x571   :  { %7427 = vmatprep.subr.bf16.mxu0 %v8210_v30 }
 0x572   :  { %7408 = vmatpush3.bf16.msra.mxu1 %v7976_v53  ;;  %v5409_v53 = vrot.slane %v9423_v23, 5 }
 0x573   :  { %7409 = vmatprep.subr.bf16.mxu1 %v8210_v30 }
 0x574   :  { %7428 = vmatpush3.bf16.msra.mxu0 %v7977_v44  ;;  %v8031_v44 = vld [vmem:[#allocation10 + $0x178] sm:$0xff]  }
 0x575   :  { %7429 = vmatprep.subr.bf16.mxu0 %v8210_v30 }
 0x576   :  { %7410 = vmatpush3.bf16.msra.mxu1 %v7978_v45  ;;  %v5516_v45 = vrot.slane %v9427_v58, 5 }
 0x577   :  { %7411 = vmatprep.subr.bf16.mxu1 %v8210_v30 }
 0x578   :  { %7430 = vmatpush3.bf16.msra.mxu0 %v7979_v59  ;;  %v8032_v59 = vld [vmem:[#allocation10 + $0x130] sm:$0xff]  }
 0x579   :  { %7431 = vmatprep.subr.bf16.mxu0 %v8210_v30 }
 0x57a   :  { %7412 = vmatpush3.bf16.msra.mxu1 %v7980_v61  ;;  %v8033_v61 = vld [vmem:[#allocation10 + $0x170] sm:$0xff]  }
 0x57b   :  { %7437 = vmatprep.subr.bf16.mxu1 %v8210_v30 }
 0x57c   :  { %7432 = vmatpush3.bf16.msra.mxu0 %v7981_v35  ;;  %v8034_v35 = vld [vmem:[#allocation10 + $0x128] sm:$0xff]  }
 0x57d   :  { %7414 = vmatmul.mubr.bf16.vlgmr.msra.gmra.mxu1 %v4762_v40  ;;  %7457 = vmatprep.subr.bf16.mxu0 %v8210_v30  ;;  %v8036_v40 = vld [vmem:[#allocation10 + $0x120] sm:$0xff]  }
 0x57e   :  { %7438 = vmatpush3.bf16.msra.mxu1 %v7982_v0  ;;  %7453 = vmatprep.mubr.msk.bf16.mxu1 %vm8211_vm5, %v8210_v30  ;;  %v8035_v0 = vld [vmem:[#allocation10 + $0x168] sm:$0xff]  }
 0x57f   :  { %7434 = vmatmul.mubr.bf16.vlgmr.msra.gmra.mxu0 %v4870_v60  ;;  %7439 = vmatprep.subr.bf16.mxu1 %v8210_v30  ;;  %v8038_v60 = vld [vmem:[#allocation10 + $0x118] sm:$0xff]  }
 0x580   :  { %7458 = vmatpush3.bf16.msra.mxu0 %v7983_v63  ;;  %7473 = vmatprep.mubr.msk.bf16.mxu0 %vm8211_vm5, %v8210_v30  ;;  %v8037_v63 = vld [vmem:[#allocation10 + $0x160] sm:$0xff]  }
 0x581   :  { %7459 = vmatprep.subr.bf16.mxu0 %v8210_v30 }
 0x582   :  { %7440 = vmatpush3.bf16.msra.mxu1 %v7984_v36  ;;  %v8039_v36 = vld [vmem:[#allocation10 + $0x158] sm:$0xff]  }
 0x583   :  { %7441 = vmatprep.subr.bf16.mxu1 %v8210_v30 }
 0x584   :  { %7460 = vmatpush3.bf16.msra.mxu0 %v7985_v52  ;;  %v8040_v52 = vld [vmem:[#allocation10 + $0x110] sm:$0xff]  }
 0x585   :  { %7461 = vmatprep.subr.bf16.mxu0 %v8210_v30 }
 0x586   :  { %7442 = vmatpush3.bf16.msra.mxu1 %v7986_v9  ;;  %v8041_v9 = vld [vmem:[#allocation10 + $0x150] sm:$0xff]  }
 0x587   :  { %7443 = vmatprep.subr.bf16.mxu1 %v8210_v30 }
 0x588   :  { %7462 = vmatpush3.bf16.msra.mxu0 %v7987_v32  ;;  %v8042_v32 = vld [vmem:[#allocation10 + $0x108] sm:$0xff]  }
 0x589   :  { %7463 = vmatprep.subr.bf16.mxu0 %v8210_v30 }
 0x58a   :  { %7444 = vmatpush3.bf16.msra.mxu1 %v7988_v24  ;;  %v8043_v24 = vld [vmem:[#allocation10 + $0x148] sm:$0xff]  }
 0x58b   :  { %7445 = vmatprep.subr.bf16.mxu1 %v8210_v30 }
 0x58c   :  { %7464 = vmatpush3.bf16.msra.mxu0 %v7989_v57  ;;  %v8044_v57 = vld [vmem:[#allocation10 + $0x100] sm:$0xff]  }
 0x58d   :  { %7465 = vmatprep.subr.bf16.mxu0 %v8210_v30 }
 0x58e   :  { %7446 = vmatpush3.bf16.msra.mxu1 %v7990_v3  ;;  %v8045_v3 = vld [vmem:[#allocation10 + $0x140] sm:$0xff]  }
 0x58f   :  { %7447 = vmatprep.subr.bf16.mxu1 %v8210_v30 }
 0x590   :  { %7466 = vmatpush3.bf16.msra.mxu0 %v7991_v22  ;;  %v8046_v22 = vld [vmem:[#allocation10 + $0x1b8] sm:$0xff]  }
 0x591   :  { %7467 = vmatprep.subr.bf16.mxu0 %v8210_v30 }
 0x592   :  { %7448 = vmatpush3.bf16.msra.mxu1 %v7992_v46  ;;  %v5623_v46 = vrot.slane %v9423_v23, 6 }
 0x593   :  { %7449 = vmatprep.subr.bf16.mxu1 %v8210_v30 }
 0x594   :  { %7468 = vmatpush3.bf16.msra.mxu0 %v7993_v55  ;;  %v9563_v55 = vld [vmem:[%s9607_s10] sm:$0x1]  ;;  %s8212_s10 = smov [#allocation11]  }
 0x595   :  { %7469 = vmatprep.subr.bf16.mxu0 %v8210_v30  ;;  %s6042_s25 = sshll.u32 %s8212_s10, 4  ;;  %s6043_s25 = int_to_ptr.vmem [resolvable:$true] %s6042_s25 }
 0x596   :  { %7450 = vmatpush3.bf16.msra.mxu1 %v7994_v48  ;;  %v8047_v48 = vld [vmem:[#allocation10 + $0x1f8] sm:$0xff]   ;;  %s8178_s26 = scalar_lea.vmem %s6043_s25, 32  ;;  %p8183_p2 = scmp.lt.s32.totalorder %s6043_s25, %s6043_s25 }
 0x597   :  { %7451 = vmatprep.subr.bf16.mxu1 %v8210_v30  ;;  %p8179_p1 = scmp.ne.s32.totalorder %s6043_s25, %s8178_s26  ;;  %p8184_p3 = scmp.lt.s32.totalorder %s8178_s26, %s8178_s26 }
 0x598   :  { %7470 = vmatpush3.bf16.msra.mxu0 %v7995_v62 }
 0x599   :  { %7471 = vmatprep.subr.bf16.mxu0 %v8210_v30  ;;  %p8185_p4 = por %p8184_p3, %p8183_p2 }
 0x59a   :  { %7452 = vmatpush3.bf16.msra.mxu1 %v7996_v11  ;;  %v5730_v11 = vrot.slane %v9427_v58, 6 }
 0x59b   :  { %7477 = vmatprep.subr.bf16.mxu1 %v8210_v30  ;;  %p8186_p5 = pnand %p8185_p4, %p8179_p1 }
 0x59c   :  { %7472 = vmatpush3.bf16.msra.mxu0 %v7997_v38 }
 0x59d   :  { %7454 = vmatmul.mubr.bf16.vlgmr.msra.gmra.mxu1 %v4978_v54  ;;  %7497 = vmatprep.subr.bf16.mxu0 %v8210_v30 }
 0x59e   :  { %7478 = vmatpush3.bf16.msra.mxu1 %v7998_v56  ;;  %7493 = vmatprep.mubr.msk.bf16.mxu1 %vm8211_vm5, %v8210_v30  ;;  %v8048_v56 = vld [vmem:[#allocation10 + $0x1b0] sm:$0xff]  }
 0x59f   :  { %7474 = vmatmul.mubr.bf16.vlgmr.msra.gmra.mxu0 %v5086_v34  ;;  %7479 = vmatprep.subr.bf16.mxu1 %v8210_v30 }
 0x5a0   :  { %7498 = vmatpush3.bf16.msra.mxu0 %v7999_v7  ;;  %7513 = vmatprep.mubr.msk.bf16.mxu0 %vm8211_vm5, %v8210_v30 }
 0x5a1   :  { %7499 = vmatprep.subr.bf16.mxu0 %v8210_v30 }
 0x5a2   :  { %7480 = vmatpush3.bf16.msra.mxu1 %v8000_v10  ;;  %v8049_v10 = vld [vmem:[#allocation10 + $0x1f0] sm:$0xff]  }
 0x5a3   :  { %7481 = vmatprep.subr.bf16.mxu1 %v8210_v30 }
 0x5a4   :  { %7500 = vmatpush3.bf16.msra.mxu0 %v8001_v15 }
 0x5a5   :  { %7501 = vmatprep.subr.bf16.mxu0 %v8210_v30 }
 0x5a6   :  { %7482 = vmatpush3.bf16.msra.mxu1 %v8002_v17 }
 0x5a7   :  { %7483 = vmatprep.subr.bf16.mxu1 %v8210_v30 }
 0x5a8   :  { %7502 = vmatpush3.bf16.msra.mxu0 %v8003_v50  ;;  %v8050_v50 = vld [vmem:[#allocation10 + $0x1a8] sm:$0xff]  }
 0x5a9   :  { %7503 = vmatprep.subr.bf16.mxu0 %v8210_v30 }
 0x5aa   :  { %7484 = vmatpush3.bf16.msra.mxu1 %v8004_v19 }
 0x5ab   :  { %7485 = vmatprep.subr.bf16.mxu1 %v8210_v30 }
 0x5ac   :  { %7504 = vmatpush3.bf16.msra.mxu0 %v8005_v21 }
 0x5ad   :  { %7505 = vmatprep.subr.bf16.mxu0 %v8210_v30 }
 0x5ae   :  { %7486 = vmatpush3.bf16.msra.mxu1 %v8006_v25  ;;  %v8051_v25 = vld [vmem:[#allocation10 + $0x1e8] sm:$0xff]  }
 0x5af   :  { %7487 = vmatprep.subr.bf16.mxu1 %v8210_v30 }
 0x5b0   :  { %7506 = vmatpush3.bf16.msra.mxu0 %v8007_v27 }
 0x5b1   :  { %7507 = vmatprep.subr.bf16.mxu0 %v8210_v30 }
 0x5b2   :  { %7488 = vmatpush3.bf16.msra.mxu1 %v8008_v28  ;;  %v8052_v28 = vld [vmem:[#allocation10 + $0x1a0] sm:$0xff]  }
 0x5b3   :  { %7489 = vmatprep.subr.bf16.mxu1 %v8210_v30 }
 0x5b4   :  { %7508 = vmatpush3.bf16.msra.mxu0 %v8009_v13  ;;  %v8053_v13 = vld [vmem:[#allocation10 + $0x1e0] sm:$0xff]  }
 0x5b5   :  { %7509 = vmatprep.subr.bf16.mxu0 %v8210_v30 }
 0x5b6   :  { %7490 = vmatpush3.bf16.msra.mxu1 %v8010_v42  ;;  %v8054_v42 = vld [vmem:[#allocation10 + $0x198] sm:$0xff]  }
 0x5b7   :  { %7491 = vmatprep.subr.bf16.mxu1 %v8210_v30 }
 0x5b8   :  { %7510 = vmatpush3.bf16.msra.mxu0 %v8011_v2  ;;  %v8055_v2 = vld [vmem:[#allocation10 + $0x1d8] sm:$0xff]  }
 0x5b9   :  { %7511 = vmatprep.subr.bf16.mxu0 %v8210_v30 }
 0x5ba   :  { %7492 = vmatpush3.bf16.msra.mxu1 %v8012_v31  ;;  %v8056_v31 = vld [vmem:[#allocation10 + $0x190] sm:$0xff]  }
 0x5bb   :  { %7517 = vmatprep.subr.bf16.mxu1 %v8210_v30 }
 0x5bc   :  { %7512 = vmatpush3.bf16.msra.mxu0 %v8013_v47  ;;  %v8057_v47 = vld [vmem:[#allocation10 + $0x1d0] sm:$0xff]  }
 0x5bd   :  { %7494 = vmatmul.mubr.bf16.vlgmr.msra.gmra.mxu1 %v5195_v6  ;;  %7537 = vmatprep.subr.bf16.mxu0 %v8210_v30  ;;  %v8059_v6 = vld [vmem:[#allocation10 + $0x1c8] sm:$0xff]  }
 0x5be   :  { %7518 = vmatpush3.bf16.msra.mxu1 %v8014_v4  ;;  %7533 = vmatprep.mubr.msk.bf16.mxu1 %vm8211_vm5, %v8210_v30  ;;  %v8058_v4 = vld [vmem:[#allocation10 + $0x188] sm:$0xff]  }
 0x5bf   :  { %7514 = vmatmul.mubr.bf16.vlgmr.msra.gmra.mxu0 %v5302_v12  ;;  %7519 = vmatprep.subr.bf16.mxu1 %v8210_v30  ;;  %v8061_v12 = vld [vmem:[#allocation10 + $0x1c0] sm:$0xff]  }
 0x5c0   :  { %7538 = vmatpush3.bf16.msra.mxu0 %v8015_v8  ;;  %7553 = vmatprep.mubr.msk.bf16.mxu0 %vm8211_vm5, %v8210_v30  ;;  %v8060_v8 = vld [vmem:[#allocation10 + $0x180] sm:$0xff]  }
 0x5c1   :  { %7539 = vmatprep.subr.bf16.mxu0 %v8210_v30 }
 0x5c2   :  { %7520 = vmatpush3.bf16.msra.mxu1 %v8016_v14  ;;  %v5837_v14 = vrot.slane %v9423_v23, 7 }
 0x5c3   :  { %7521 = vmatprep.subr.bf16.mxu1 %v8210_v30 }
 0x5c4   :  { %7540 = vmatpush3.bf16.msra.mxu0 %v8017_v18 }
 0x5c5   :  { %7541 = vmatprep.subr.bf16.mxu0 %v8210_v30 }
 0x5c6   :  { %7522 = vmatpush3.bf16.msra.mxu1 %v8018_v39  ;;  %v5944_v39 = vrot.slane %v9427_v58, 7 }
 0x5c7   :  { %7523 = vmatprep.subr.bf16.mxu1 %v8210_v30 }
 0x5c8   :  { %7542 = vmatpush3.bf16.msra.mxu0 %v8019_v20 }
 0x5c9   :  { %7543 = vmatprep.subr.bf16.mxu0 %v8210_v30 }
 0x5ca   :  { %7524 = vmatpush3.bf16.msra.mxu1 %v8020_v37 }
 0x5cb   :  { %7525 = vmatprep.subr.bf16.mxu1 %v8210_v30 }
 0x5cc   :  { %7544 = vmatpush3.bf16.msra.mxu0 %v8021_v5 }
 0x5cd   :  { %7545 = vmatprep.subr.bf16.mxu0 %v8210_v30 }
 0x5ce   :  { %7526 = vmatpush3.bf16.msra.mxu1 %v8022_v16 }
 0x5cf   :  { %7527 = vmatprep.subr.bf16.mxu1 %v8210_v30 }
 0x5d0   :  { %7546 = vmatpush3.bf16.msra.mxu0 %v8023_v26 }
 0x5d1   :  { %7547 = vmatprep.subr.bf16.mxu0 %v8210_v30 }
 0x5d2   :  { %7528 = vmatpush3.bf16.msra.mxu1 %v8024_v33 }
 0x5d3   :  { %7529 = vmatprep.subr.bf16.mxu1 %v8210_v30 }
 0x5d4   :  { %7548 = vmatpush3.bf16.msra.mxu0 %v8025_v29 }
 0x5d5   :  { %7549 = vmatprep.subr.bf16.mxu0 %v8210_v30 }
 0x5d6   :  { %7530 = vmatpush3.bf16.msra.mxu1 %v8026_v41 }
 0x5d7   :  { %7531 = vmatprep.subr.bf16.mxu1 %v8210_v30 }
 0x5d8   :  { %7550 = vmatpush3.bf16.msra.mxu0 %v8027_v1 }
 0x5d9   :  { %7551 = vmatprep.subr.bf16.mxu0 %v8210_v30 }
 0x5da   :  { %7532 = vmatpush3.bf16.msra.mxu1 %v8028_v43 }
 0x5db   :  { %7557 = vmatprep.subr.bf16.mxu1 %v8210_v30 }
 0x5dc   :  { %7552 = vmatpush3.bf16.msra.mxu0 %v8029_v49 }
 0x5dd   :  { %7534 = vmatmul.mubr.bf16.vlgmr.msra.gmra.mxu1 %v5409_v53  ;;  %7577 = vmatprep.subr.bf16.mxu0 %v8210_v30 }
 0x5de   :  { %7558 = vmatpush3.bf16.msra.mxu1 %v8030_v51  ;;  %7573 = vmatprep.mubr.msk.bf16.mxu1 %vm8211_vm5, %v8210_v30 }
 0x5df   :  { %7554 = vmatmul.mubr.bf16.vlgmr.msra.gmra.mxu0 %v5516_v45  ;;  %7559 = vmatprep.subr.bf16.mxu1 %v8210_v30 }
 0x5e0   :  { %7578 = vmatpush3.bf16.msra.mxu0 %v8031_v44  ;;  %7593 = vmatprep.mubr.msk.bf16.mxu0 %vm8211_vm5, %v8210_v30 }
 0x5e1   :  { %7579 = vmatprep.subr.bf16.mxu0 %v8210_v30 }
 0x5e2   :  { %7560 = vmatpush3.bf16.msra.mxu1 %v8032_v59 }
 0x5e3   :  { %7561 = vmatprep.subr.bf16.mxu1 %v8210_v30 }
 0x5e4   :  { %7580 = vmatpush3.bf16.msra.mxu0 %v8033_v61 }
 0x5e5   :  { %7581 = vmatprep.subr.bf16.mxu0 %v8210_v30 }
 0x5e6   :  { %7562 = vmatpush3.bf16.msra.mxu1 %v8034_v35 }
 0x5e7   :  { %7563 = vmatprep.subr.bf16.mxu1 %v8210_v30 }
 0x5e8   :  { %7582 = vmatpush3.bf16.msra.mxu0 %v8035_v0 }
 0x5e9   :  { %7583 = vmatprep.subr.bf16.mxu0 %v8210_v30 }
 0x5ea   :  { %7564 = vmatpush3.bf16.msra.mxu1 %v8036_v40 }
 0x5eb   :  { %7565 = vmatprep.subr.bf16.mxu1 %v8210_v30 }
 0x5ec   :  { %7584 = vmatpush3.bf16.msra.mxu0 %v8037_v63 }
 0x5ed   :  { %7585 = vmatprep.subr.bf16.mxu0 %v8210_v30 }
 0x5ee   :  { %7566 = vmatpush3.bf16.msra.mxu1 %v8038_v60 }
 0x5ef   :  { %7567 = vmatprep.subr.bf16.mxu1 %v8210_v30 }
 0x5f0   :  { %7586 = vmatpush3.bf16.msra.mxu0 %v8039_v36 }
 0x5f1   :  { %7587 = vmatprep.subr.bf16.mxu0 %v8210_v30 }
 0x5f2   :  { %7568 = vmatpush3.bf16.msra.mxu1 %v8040_v52 }
 0x5f3   :  { %7569 = vmatprep.subr.bf16.mxu1 %v8210_v30 }
 0x5f4   :  { %7588 = vmatpush3.bf16.msra.mxu0 %v8041_v9 }
 0x5f5   :  { %7589 = vmatprep.subr.bf16.mxu0 %v8210_v30 }
 0x5f6   :  { %7570 = vmatpush3.bf16.msra.mxu1 %v8042_v32 }
 0x5f7   :  { %7571 = vmatprep.subr.bf16.mxu1 %v8210_v30 }
 0x5f8   :  { %7590 = vmatpush3.bf16.msra.mxu0 %v8043_v24 }
 0x5f9   :  { %7591 = vmatprep.subr.bf16.mxu0 %v8210_v30 }
 0x5fa   :  { %7572 = vmatpush3.bf16.msra.mxu1 %v8044_v57 }
 0x5fb   :  { %7597 = vmatprep.subr.bf16.mxu1 %v8210_v30 }
 0x5fc   :  { %7592 = vmatpush3.bf16.msra.mxu0 %v8045_v3 }
 0x5fd   :  { %7574 = vmatmul.mubr.bf16.vlgmr.msra.gmra.mxu1 %v5623_v46  ;;  %v4411_v62 = vpop.f32.mrf.mxu1  ;;  %7617 = vmatprep.subr.bf16.mxu0 %v8210_v30 }
 0x5fe   :  { %v4417_v38 = vadd.f32 %v4411_v62, %v9563_v55  ;;  %7598 = vmatpush3.bf16.msra.mxu1 %v8046_v22  ;;  %7613 = vmatprep.mubr.msk.bf16.mxu1 %vm8211_vm5, %v8210_v30 }
 0x5ff   :  { %7594 = vmatmul.mubr.bf16.vlgmr.msra.gmra.mxu0 %v5730_v11  ;;  %v7335_v54 = vpop.f32.mrf.mxu1  ;;  %v4521_v7 = vpop.f32.mrf.mxu0  ;;  %7599 = vmatprep.subr.bf16.mxu1 %v8210_v30 }
 0x600   :  { %v9571_v34 = vadd.f32 %v4521_v7, %v4417_v38  ;;  %7618 = vmatpush3.bf16.msra.mxu0 %v8047_v48  ;;  %7633 = vmatprep.mubr.msk.bf16.mxu0 %vm8211_vm5, %v8210_v30 }
 0x601   :  { %v4414_v15 = vpop.f32.mrf.mxu1  ;;  %v7355_v17 = vpop.f32.mrf.mxu0  ;;  %7619 = vmatprep.subr.bf16.mxu0 %v8210_v30 }
 0x602   :  { %7600 = vmatpush3.bf16.msra.mxu1 %v8048_v56 }
 0x603   :  { %v7336_v19 = vpop.f32.mrf.mxu1  ;;  %v4524_v21 = vpop.f32.mrf.mxu0  ;;  %7601 = vmatprep.subr.bf16.mxu1 %v8210_v30 }
 0x604   :  { %7620 = vmatpush3.bf16.msra.mxu0 %v8049_v10 }
 0x605   :  { %v7356_v27 = vpop.f32.mrf.mxu0  ;;  %7621 = vmatprep.subr.bf16.mxu0 %v8210_v30 }
 0x606   :  { %7602 = vmatpush3.bf16.msra.mxu1 %v8050_v50 }
 0x607   :  { %7603 = vmatprep.subr.bf16.mxu1 %v8210_v30 }
 0x608   :  { %7622 = vmatpush3.bf16.msra.mxu0 %v8051_v25 }
 0x609   :  { %7623 = vmatprep.subr.bf16.mxu0 %v8210_v30 }
 0x60a   :  { %7604 = vmatpush3.bf16.msra.mxu1 %v8052_v28 }
 0x60b   :  { %7605 = vmatprep.subr.bf16.mxu1 %v8210_v30 }
 0x60c   :  { %7624 = vmatpush3.bf16.msra.mxu0 %v8053_v13 }
 0x60d   :  { %7625 = vmatprep.subr.bf16.mxu0 %v8210_v30 }
 0x60e   :  { %7606 = vmatpush3.bf16.msra.mxu1 %v8054_v42 }
 0x60f   :  { %7607 = vmatprep.subr.bf16.mxu1 %v8210_v30 }
 0x610   :  { %7626 = vmatpush3.bf16.msra.mxu0 %v8055_v2 }
 0x611   :  { %7627 = vmatprep.subr.bf16.mxu0 %v8210_v30 }
 0x612   :  { %7608 = vmatpush3.bf16.msra.mxu1 %v8056_v31 }
 0x613   :  { %7609 = vmatprep.subr.bf16.mxu1 %v8210_v30 }
 0x614   :  { %7628 = vmatpush3.bf16.msra.mxu0 %v8057_v47 }
 0x615   :  { %7629 = vmatprep.subr.bf16.mxu0 %v8210_v30 }
 0x616   :  { %7610 = vmatpush3.bf16.msra.mxu1 %v8058_v4 }
 0x617   :  { %7611 = vmatprep.subr.bf16.mxu1 %v8210_v30 }
 0x618   :  { %7630 = vmatpush3.bf16.msra.mxu0 %v8059_v6 }
 0x619   :  { %7631 = vmatprep.subr.bf16.mxu0 %v8210_v30 }
 0x61a   :  { %7612 = vmatpush3.bf16.msra.mxu1 %v8060_v8 }
 0x61c   :  { %7632 = vmatpush3.bf16.msra.mxu0 %v8061_v12 }
 0x61d   :  { %v4630_v18 = vpop.f32.mrf.mxu1  ;;  %7614 = vmatmul.mubr.bf16.vlgmr.msra.gmra.mxu1 %v5837_v14 }
 0x61e   :  { %v4636_v44 = vadd.f32 %v4630_v18, %v9571_v34 }
 0x61f   :  { %v7375_v20 = vpop.f32.mrf.mxu1  ;;  %v4738_v37 = vpop.f32.mrf.mxu0  ;;  %7634 = vmatmul.mubr.bf16.vlgmr.msra.gmra.mxu0 %v5944_v39 }
 0x620   :  { %v4744_v45 = vadd.f32 %v4738_v37, %v4636_v44 }
 0x621   :  { %v4633_v5 = vpop.f32.mrf.mxu1  ;;  %v7395_v16 = vpop.f32.mrf.mxu0 }
 0x623   :  { %v7376_v26 = vpop.f32.mrf.mxu1  ;;  %v4741_v33 = vpop.f32.mrf.mxu0 }
 0x625   :  { %v7396_v29 = vpop.f32.mrf.mxu0 }
 0x63d   :  { %v4846_v41 = vpop.f32.mrf.mxu1 }
 0x63e   :  { %v4852_v58 = vadd.f32 %v4846_v41, %v4744_v45 }
 0x63f   :  { %v7415_v1 = vpop.f32.mrf.mxu1  ;;  %v4954_v43 = vpop.f32.mrf.mxu0 }
 0x640   :  { %v4960_v59 = vadd.f32 %v4954_v43, %v4852_v58 }
 0x641   :  { %v4849_v30 = vpop.f32.mrf.mxu1  ;;  %v7435_v49 = vpop.f32.mrf.mxu0 }
 0x643   :  { %v7416_v51 = vpop.f32.mrf.mxu1  ;;  %v4957_v23 = vpop.f32.mrf.mxu0 }
 0x645   :  { %v7436_v53 = vpop.f32.mrf.mxu0 }
 0x65d   :  { %v5062_v61 = vpop.f32.mrf.mxu1 }
 0x65e   :  { %v5068_v35 = vadd.f32 %v5062_v61, %v4960_v59 }
 0x65f   :  { %v7455_v0 = vpop.f32.mrf.mxu1  ;;  %v5170_v40 = vpop.f32.mrf.mxu0 }
 0x660   :  { %v5176_v63 = vadd.f32 %v5170_v40, %v5068_v35 }
 0x661   :  { %v5065_v60 = vpop.f32.mrf.mxu1  ;;  %v7475_v36 = vpop.f32.mrf.mxu0 }
 0x662   :  { %5178 = vst.msk [vmem:[#allocation11] sm:$0x1] %vm5177_vm2, %v5176_v63 }
 0x663   :  { %v7456_v52 = vpop.f32.mrf.mxu1  ;;  %v5173_v9 = vpop.f32.mrf.mxu0 }
 0x665   :  { %v7476_v32 = vpop.f32.mrf.mxu0 }
 0x67d   :  { %v5279_v24 = vpop.f32.mrf.mxu1 }
 0x67e   :  { %v5285_v57 = vadd.f32 %v5279_v24, %v9563_v55 }
 0x67f   :  { %v7495_v3 = vpop.f32.mrf.mxu1  ;;  %v5386_v22 = vpop.f32.mrf.mxu0 }
 0x680   :  { %v5392_v46 = vadd.f32 %v5386_v22, %v5285_v57 }
 0x681   :  { %v5282_v48 = vpop.f32.mrf.mxu1  ;;  %v7515_v62 = vpop.f32.mrf.mxu0 }
 0x683   :  { %v7496_v11 = vpop.f32.mrf.mxu1  ;;  %v5389_v38 = vpop.f32.mrf.mxu0 }
 0x685   :  { %v7516_v56 = vpop.f32.mrf.mxu0 }
 0x69d   :  { %v5493_v54 = vpop.f32.mrf.mxu1 }
 0x69e   :  { %v5499_v31 = vadd.f32 %v5493_v54, %v5392_v46 }
 0x69f   :  { %v7535_v7 = vpop.f32.mrf.mxu1  ;;  %v5600_v34 = vpop.f32.mrf.mxu0 }
 0x6a0   :  { %v5606_v47 = vadd.f32 %v5600_v34, %v5499_v31 }
 0x6a1   :  { %v5496_v10 = vpop.f32.mrf.mxu1  ;;  %v7555_v15 = vpop.f32.mrf.mxu0 }
 0x6a3   :  { %v7536_v17 = vpop.f32.mrf.mxu1  ;;  %v5603_v50 = vpop.f32.mrf.mxu0 }
 0x6a5   :  { %v7556_v19 = vpop.f32.mrf.mxu0 }
 0x6bd   :  { %v5707_v21 = vpop.f32.mrf.mxu1 }
 0x6be   :  { %v5713_v4 = vadd.f32 %v5707_v21, %v5606_v47 }
 0x6bf   :  { %v7575_v25 = vpop.f32.mrf.mxu1  ;;  %v5814_v27 = vpop.f32.mrf.mxu0 }
 0x6c0   :  { %v5820_v6 = vadd.f32 %v5814_v27, %v5713_v4 }
 0x6c1   :  { %v5710_v55 = vpop.f32.mrf.mxu1  ;;  %v7595_v28 = vpop.f32.mrf.mxu0 }
 0x6c3   :  { %v7576_v13 = vpop.f32.mrf.mxu1  ;;  %v5817_v42 = vpop.f32.mrf.mxu0 }
 0x6c5   :  { %v7596_v2 = vpop.f32.mrf.mxu0 }
 0x6dd   :  { %v5921_v8 = vpop.f32.mrf.mxu1 }
 0x6de   :  { %v5927_v12 = vadd.f32 %v5921_v8, %v5820_v6 }
 0x6df   :  { %v7615_v14 = vpop.f32.mrf.mxu1  ;;  %v6028_v18 = vpop.f32.mrf.mxu0 }
 0x6e0   :  { %v6034_v39 = vadd.f32 %v6028_v18, %v5927_v12 }
 0x6e1   :  { %v5924_v20 = vpop.f32.mrf.mxu1  ;;  %v7635_v37 = vpop.f32.mrf.mxu0 }
 0x6e2   :  { %6035 = vst.msk [vmem:[#allocation11 + $0x1] sm:$0x1] %vm5177_vm2, %v6034_v39 }
 0x6e3   :  { %v7616_v5 = vpop.f32.mrf.mxu1  ;;  %v6031_v16 = vpop.f32.mrf.mxu0 }
 0x6e4   :  { %8189 = shalt.err (!%p8186_p5)
}
 0x6e5   :  { %6045 = dma.vmem_to_hbm [thread:$0]  %s6043_s25, 32, %s9608_s11, [#allocation7]   ;;  %v7636_v26 = vpop.f32.mrf.mxu0 }
 0x6e6   :  { %8202 = dma.done.wait [#allocation7], 32  }
 0x6e7   :  { %8203 = vsyncadd [#allocation7], 4294967264 }
 0x6e8   :  { %6053 = vsyncpa [#allocation6], 1 }
 0x6e9   :  { %6054 = vsyncpa [#allocation9], 1 }
 0x6ea   :  { %6055 = vsyncpa [#allocation7], 1 }

</bundles_post_ra>
